<compile_context>
chip_gen: v7x
topology: tpu7x:2x2x1
jax: 0.10.0
libtpu: 0.0.40
codegen_flags: <defaults>
</compile_context>

<pallas_src>
import functools

import jax
import jax.numpy as jnp
from jax.experimental import pallas as pl
from jax.experimental.pallas import tpu as pltpu


def _memory_kernel(n_valid, need_mask, x_ref, gts_ref, w1_ref, b1_ref, w2_ref,
                   b2_ref, w3_ref, b3_ref, memt_ref, loss_ref):
    # x_ref:   (Nt, Cq) bf16       gts_ref: (Nt, 1) i32
    # w*_ref:  (Cin, Cout) bf16    b*_ref:  (1, Cout) f32
    # memt_ref:(Cs, num_class) bf16  (normalized prototypes, x1/0.2 folded in)
    # loss_ref:(1, 128) f32 lane-dense partial-loss slab (one per grid step)
    nt = x_ref.shape[0]
    x = x_ref[...]

    # proj_mlp: Conv1x1 + folded BN + ReLU, x2, then final Conv1x1.
    # bf16 MXU operands, f32 accumulation, f32 bias/ReLU.
    h = jnp.dot(x, w1_ref[...], preferred_element_type=jnp.float32) + b1_ref[...]
    h = jnp.maximum(h, 0.0).astype(x.dtype)
    h = jnp.dot(h, w2_ref[...], preferred_element_type=jnp.float32) + b2_ref[...]
    h = jnp.maximum(h, 0.0).astype(x.dtype)
    h = jnp.dot(h, w3_ref[...], preferred_element_type=jnp.float32) + b3_ref[...]

    # F.normalize(dim=channel) with eps=1e-12, applied as an rsqrt scale on the
    # small (Nt, num_class) logits instead of dividing the (Nt, Cs) features:
    #   t1 = h / max(||h||, 1e-12);  logits = (t1 @ memt) / 0.2
    #   == (h @ (memt/0.2)) * rsqrt(max(sum(h^2), 1e-24))
    ss = jnp.sum(h * h, axis=-1, keepdims=True)                   # (Nt, 1) f32
    inv_norm = jax.lax.rsqrt(jnp.maximum(ss, 1e-24))
    logits = jnp.dot(h.astype(memt_ref.dtype), memt_ref[...],
                     preferred_element_type=jnp.float32) * inv_norm  # (Nt, C)

    # Cross entropy per point (f32), tile-reduced; padded rows masked only when
    # N is not a multiple of the tile (static branch -> no mask on common path).
    m = jnp.max(logits, axis=-1, keepdims=True)
    lse = m + jnp.log(jnp.sum(jnp.exp(logits - m), axis=-1, keepdims=True))
    cls = jax.lax.broadcasted_iota(jnp.int32, logits.shape, 1)
    tgt = jnp.sum(jnp.where(cls == gts_ref[...], logits, 0.0),
                  axis=-1, keepdims=True)                          # (Nt, 1)
    ce = lse - tgt
    if need_mask:
        row = (pl.program_id(1) * nt +
               jax.lax.broadcasted_iota(jnp.int32, (nt, 1), 0))
        ce = jnp.where(row < n_valid, ce, 0.0)
    partial = jnp.sum(ce)

    # Lane-dense store (unmasked vst); wrapper reads lane 0.
    loss_ref[...] = jnp.broadcast_to(partial, loss_ref.shape)


def _fold_bn(w, bias, gamma, beta, mean, var, eps=1e-5):
    """Fold eval-mode BatchNorm1d into a 1x1 conv.  w: (Cout, Cin)."""
    scale = gamma / jnp.sqrt(var + eps)
    w_f = w * scale[:, None]
    b_f = (bias - mean) * scale + beta
    return w_f.T, b_f[None, :]          # (Cin, Cout), (1, Cout)


def prepare_params(params, memory, dtype=jnp.bfloat16):
    """BN folding, weight transposes, normalized+temperature-scaled memory."""
    w1t, b1 = _fold_bn(params["w1"], params["b1"], params["g1"], params["be1"],
                       params["m1"], params["v1"])
    w2t, b2 = _fold_bn(params["w2"], params["b2"], params["g2"], params["be2"],
                       params["m2"], params["v2"])
    w3t = params["w3"].T
    b3 = params["b3"][None, :]
    # memory.mean(dim=1) then F.normalize(dim=-1); fold the 1/0.2 temperature.
    mem_feat = memory.mean(axis=1)                                # (num_class, Cs)
    mem_norm = mem_feat / jnp.maximum(
        jnp.sqrt(jnp.sum(mem_feat * mem_feat, axis=-1, keepdims=True)), 1e-12)
    memt = mem_norm.T * 5.0                                       # (Cs, num_class)
    return (w1t.astype(dtype), b1.astype(jnp.float32),
            w2t.astype(dtype), b2.astype(jnp.float32),
            w3t.astype(dtype), b3.astype(jnp.float32),
            memt.astype(dtype))


def memory_forward(features, gts, params, memory, *, n_tile=2048,
                   compute_dtype=jnp.bfloat16):
    """features: (B, N, Cq), gts: (B, N) int.  Returns (features, loss)."""
    b, n, cq = features.shape
    num_class = memory.shape[0]
    w1t, b1, w2t, b2, w3t, b3, memt = prepare_params(params, memory,
                                                     dtype=compute_dtype)
    cs = w1t.shape[1]

    # Tile the point dimension (multiple of 16 for bf16 sublane packing),
    # padding N up to a whole number of tiles.
    n_tile = min(n_tile, pl.cdiv(n, 16) * 16)
    n_tile = pl.cdiv(n_tile, 16) * 16
    n_tiles = pl.cdiv(n, n_tile)
    n_pad = n_tiles * n_tile

    x = features.astype(compute_dtype)
    gts3 = gts.astype(jnp.int32)[..., None]                      # (B, N, 1)
    if n_pad != n:
        x = jnp.pad(x, ((0, 0), (0, n_pad - n), (0, 0)))
        gts3 = jnp.pad(gts3, ((0, 0), (0, n_pad - n), (0, 0)))

    kernel = functools.partial(_memory_kernel, n, n_pad != n)

    # TODO(synk): if xprof shows exposed DMA on the feature stream (v5e), bump
    # its BlockSpec to pipeline_mode=pl.Buffered(3).
    loss_parts = pl.pallas_call(
        kernel,
        out_shape=jax.ShapeDtypeStruct((b, n_tiles, 1, 128), jnp.float32),
        grid_spec=pltpu.PrefetchScalarGridSpec(
            num_scalar_prefetch=0,
            grid=(b, n_tiles),
            in_specs=[
                pl.BlockSpec((None, n_tile, cq), lambda bi, ti: (bi, ti, 0)),
                pl.BlockSpec((None, n_tile, 1), lambda bi, ti: (bi, ti, 0)),
                pl.BlockSpec((cq, cs), lambda bi, ti: (0, 0)),
                pl.BlockSpec((1, cs), lambda bi, ti: (0, 0)),
                pl.BlockSpec((cs, cs), lambda bi, ti: (0, 0)),
                pl.BlockSpec((1, cs), lambda bi, ti: (0, 0)),
                pl.BlockSpec((cs, cs), lambda bi, ti: (0, 0)),
                pl.BlockSpec((1, cs), lambda bi, ti: (0, 0)),
                pl.BlockSpec((cs, num_class), lambda bi, ti: (0, 0)),
            ],
            out_specs=pl.BlockSpec((None, None, 1, 128),
                                   lambda bi, ti: (bi, ti, 0, 0)),
        ),
        compiler_params=pltpu.CompilerParams(
            dimension_semantics=("parallel", "parallel"),
            vmem_limit_bytes=32 * 1024 * 1024),
    )(x, gts3, w1t, b1, w2t, b2, w3t, b3, memt)

    contrast_loss = jnp.sum(loss_parts[:, :, 0, 0]) / (b * n)    # CE 'mean'
    res = features                               # module returns input unchanged
    return res, contrast_loss


def _reference_loss(features, gts, params, memory):
    """Pure-JAX f32 reference of the same forward (for a sanity check)."""
    w1t, b1, w2t, b2, w3t, b3, memt = prepare_params(params, memory,
                                                     dtype=jnp.float32)
    hp = jax.lax.Precision.HIGHEST
    h = jnp.maximum(jnp.dot(features, w1t, precision=hp) + b1, 0.0)
    h = jnp.maximum(jnp.dot(h, w2t, precision=hp) + b2, 0.0)
    h = jnp.dot(h, w3t, precision=hp) + b3
    t1 = h / jnp.maximum(jnp.linalg.norm(h, axis=-1, keepdims=True), 1e-12)
    logits = jnp.dot(t1, memt, precision=hp)         # temperature folded in memt
    lse = jax.scipy.special.logsumexp(logits, axis=-1)
    tgt = jnp.take_along_axis(logits, gts[..., None].astype(jnp.int32),
                              axis=-1)[..., 0]
    return jnp.mean(lse - tgt)


# TODO(synk): Memory.update() (stateful, data-dependent masked writeback of the
# memory buffer) and the `self.training and not is_full()` early-exit have no
# clean Pallas equivalent and are out of scope for the forward kernel.

if __name__ == "__main__":
    num_class, length = 8, 16
    store_channels, query_channels = 32, 32
    b, n = 2, 1000                 # non-multiple of the tile to exercise masking

    key = jax.random.PRNGKey(0)
    ks = jax.random.split(key, 16)

    params = {
        # conv weights (torch layout (Cout, Cin)) and biases
        "w1": jax.random.normal(ks[0], (store_channels, query_channels), jnp.float32) * 0.1,
        "b1": jax.random.normal(ks[1], (store_channels,), jnp.float32) * 0.05,
        "w2": jax.random.normal(ks[2], (store_channels, store_channels), jnp.float32) * 0.1,
        "b2": jax.random.normal(ks[3], (store_channels,), jnp.float32) * 0.05,
        "w3": jax.random.normal(ks[4], (store_channels, store_channels), jnp.float32) * 0.1,
        "b3": jax.random.normal(ks[5], (store_channels,), jnp.float32) * 0.05,
        # BatchNorm1d (eval) stats/affine
        "g1": jax.random.uniform(ks[6], (store_channels,), jnp.float32, 0.5, 1.5),
        "be1": jax.random.normal(ks[7], (store_channels,), jnp.float32) * 0.05,
        "m1": jax.random.normal(ks[8], (store_channels,), jnp.float32) * 0.05,
        "v1": jax.random.uniform(ks[9], (store_channels,), jnp.float32, 0.5, 1.5),
        "g2": jax.random.uniform(ks[10], (store_channels,), jnp.float32, 0.5, 1.5),
        "be2": jax.random.normal(ks[11], (store_channels,), jnp.float32) * 0.05,
        "m2": jax.random.normal(ks[12], (store_channels,), jnp.float32) * 0.05,
        "v2": jax.random.uniform(ks[13], (store_channels,), jnp.float32, 0.5, 1.5),
    }
    # memory buffer, initialized as if already populated (zeros would also work)
    memory = jax.random.normal(ks[14], (num_class, length, store_channels), jnp.float32)

    kf, kg = jax.random.split(ks[15])
    features = jax.random.normal(kf, (b, n, query_channels), jnp.float32)
    gts = jax.random.randint(kg, (b, n), 0, num_class, jnp.int32)

    # Small tile so the demo exercises the (batch, tile) grid + row masking.
    res, loss = memory_forward(features, gts, params, memory, n_tile=512)
    res = jax.block_until_ready(res)
    loss = jax.block_until_ready(loss)

    ref = jax.block_until_ready(_reference_loss(features, gts, params, memory))
    assert res.shape == features.shape
    # bf16 feature/weight stream vs. f32 HIGHEST reference: loose-ish tolerance.
    assert bool(jnp.allclose(loss, ref, rtol=5e-2, atol=5e-2)), (loss, ref)
    print("KERNEL_OK")
</pallas_src>

<mosaic_0001>
module attributes {stable_mosaic.version = 11 : i64} {
  func.func @_memory_kernel(%arg0: i32, %arg1: i32, %arg2: memref<1x512x32xbf16, #tpu.memory_space<vmem>>, %arg3: memref<1x512x1xi32, #tpu.memory_space<vmem>>, %arg4: memref<32x32xbf16, #tpu.memory_space<vmem>>, %arg5: memref<1x32xf32, #tpu.memory_space<vmem>>, %arg6: memref<32x32xbf16, #tpu.memory_space<vmem>>, %arg7: memref<1x32xf32, #tpu.memory_space<vmem>>, %arg8: memref<32x32xbf16, #tpu.memory_space<vmem>>, %arg9: memref<1x32xf32, #tpu.memory_space<vmem>>, %arg10: memref<32x8xbf16, #tpu.memory_space<vmem>>, %arg11: memref<1x1x1x128xf32, #tpu.memory_space<vmem>>) attributes {dimension_semantics = [#tpu.dimension_semantics<parallel>, #tpu.dimension_semantics<parallel>], iteration_bounds = array<i64: 2, 2>, scalar_prefetch = 0 : i64, scratch_operands = 0 : i64, tpu.core_type = #tpu.core_type<tc>, window_params = [{transform_indices = @transform_0, window_bounds = array<i64: 1, 512, 32>}, {transform_indices = @transform_1, window_bounds = array<i64: 1, 512, 1>}, {pipeline_mode = #tpu.pipeline_mode<synchronous>, transform_indices = @transform_2, window_bounds = array<i64: 32, 32>}, {pipeline_mode = #tpu.pipeline_mode<synchronous>, transform_indices = @transform_3, window_bounds = array<i64: 1, 32>}, {pipeline_mode = #tpu.pipeline_mode<synchronous>, transform_indices = @transform_4, window_bounds = array<i64: 32, 32>}, {pipeline_mode = #tpu.pipeline_mode<synchronous>, transform_indices = @transform_5, window_bounds = array<i64: 1, 32>}, {pipeline_mode = #tpu.pipeline_mode<synchronous>, transform_indices = @transform_6, window_bounds = array<i64: 32, 32>}, {pipeline_mode = #tpu.pipeline_mode<synchronous>, transform_indices = @transform_7, window_bounds = array<i64: 1, 32>}, {pipeline_mode = #tpu.pipeline_mode<synchronous>, transform_indices = @transform_8, window_bounds = array<i64: 32, 8>}, {transform_indices = @transform_9, window_bounds = array<i64: 1, 1, 1, 128>}]} {
    %c0 = arith.constant 0 : index
    %c0_0 = arith.constant 0 : index
    %c0_1 = arith.constant 0 : index
    %0 = vector.load %arg2[%c0, %c0_0, %c0_1] : memref<1x512x32xbf16, #tpu.memory_space<vmem>>, vector<1x512x32xbf16>
    %1 = vector.shape_cast %0 : vector<1x512x32xbf16> to vector<512x32xbf16>
    %c0_2 = arith.constant 0 : index
    %c0_3 = arith.constant 0 : index
    %2 = vector.load %arg4[%c0_2, %c0_3] : memref<32x32xbf16, #tpu.memory_space<vmem>>, vector<32x32xbf16>
    %cst = arith.constant dense<0.000000e+00> : vector<512x32xf32>
    %3 = tpu.matmul %1, %2, %cst {dimension_numbers = #tpu.dot_dimension_numbers<[1], [0], [0], [1], [0, 0, 1, 1], [], []>} : vector<512x32xbf16>, vector<32x32xbf16>, vector<512x32xf32> -> vector<512x32xf32>
    %c0_4 = arith.constant 0 : index
    %c0_5 = arith.constant 0 : index
    %4 = vector.load %arg5[%c0_4, %c0_5] : memref<1x32xf32, #tpu.memory_space<vmem>>, vector<1x32xf32>
    %5 = vector.broadcast %4 : vector<1x32xf32> to vector<512x32xf32>
    %6 = arith.addf %3, %5 : vector<512x32xf32>
    %cst_6 = arith.constant 0.000000e+00 : f32
    %7 = vector.broadcast %cst_6 : f32 to vector<512x32xf32>
    %8 = arith.maximumf %6, %7 : vector<512x32xf32>
    %9 = arith.truncf %8 : vector<512x32xf32> to vector<512x32xbf16>
    %c0_7 = arith.constant 0 : index
    %c0_8 = arith.constant 0 : index
    %10 = vector.load %arg6[%c0_7, %c0_8] : memref<32x32xbf16, #tpu.memory_space<vmem>>, vector<32x32xbf16>
    %cst_9 = arith.constant dense<0.000000e+00> : vector<512x32xf32>
    %11 = tpu.matmul %9, %10, %cst_9 {dimension_numbers = #tpu.dot_dimension_numbers<[1], [0], [0], [1], [0, 0, 1, 1], [], []>} : vector<512x32xbf16>, vector<32x32xbf16>, vector<512x32xf32> -> vector<512x32xf32>
    %c0_10 = arith.constant 0 : index
    %c0_11 = arith.constant 0 : index
    %12 = vector.load %arg7[%c0_10, %c0_11] : memref<1x32xf32, #tpu.memory_space<vmem>>, vector<1x32xf32>
    %13 = vector.broadcast %12 : vector<1x32xf32> to vector<512x32xf32>
    %14 = arith.addf %11, %13 : vector<512x32xf32>
    %cst_12 = arith.constant 0.000000e+00 : f32
    %15 = vector.broadcast %cst_12 : f32 to vector<512x32xf32>
    %16 = arith.maximumf %14, %15 : vector<512x32xf32>
    %17 = arith.truncf %16 : vector<512x32xf32> to vector<512x32xbf16>
    %c0_13 = arith.constant 0 : index
    %c0_14 = arith.constant 0 : index
    %18 = vector.load %arg8[%c0_13, %c0_14] : memref<32x32xbf16, #tpu.memory_space<vmem>>, vector<32x32xbf16>
    %cst_15 = arith.constant dense<0.000000e+00> : vector<512x32xf32>
    %19 = tpu.matmul %17, %18, %cst_15 {dimension_numbers = #tpu.dot_dimension_numbers<[1], [0], [0], [1], [0, 0, 1, 1], [], []>} : vector<512x32xbf16>, vector<32x32xbf16>, vector<512x32xf32> -> vector<512x32xf32>
    %c0_16 = arith.constant 0 : index
    %c0_17 = arith.constant 0 : index
    %20 = vector.load %arg9[%c0_16, %c0_17] : memref<1x32xf32, #tpu.memory_space<vmem>>, vector<1x32xf32>
    %21 = vector.broadcast %20 : vector<1x32xf32> to vector<512x32xf32>
    %22 = arith.addf %19, %21 : vector<512x32xf32>
    %23 = arith.mulf %22, %22 : vector<512x32xf32>
    %cst_18 = arith.constant dense<0.000000e+00> : vector<512xf32>
    %24 = vector.multi_reduction <add>, %23, %cst_18 [1] : vector<512x32xf32> to vector<512xf32>
    %25 = vector.shape_cast %24 : vector<512xf32> to vector<512x1xf32>
    %cst_19 = arith.constant 1.000000e-24 : f32
    %26 = vector.broadcast %cst_19 : f32 to vector<512x1xf32>
    %27 = arith.maximumf %25, %26 : vector<512x1xf32>
    %28 = math.rsqrt %27 : vector<512x1xf32>
    %29 = arith.truncf %22 : vector<512x32xf32> to vector<512x32xbf16>
    %c0_20 = arith.constant 0 : index
    %c0_21 = arith.constant 0 : index
    %30 = vector.load %arg10[%c0_20, %c0_21] : memref<32x8xbf16, #tpu.memory_space<vmem>>, vector<32x8xbf16>
    %cst_22 = arith.constant dense<0.000000e+00> : vector<512x8xf32>
    %31 = tpu.matmul %29, %30, %cst_22 {dimension_numbers = #tpu.dot_dimension_numbers<[1], [0], [0], [1], [0, 0, 1, 1], [], []>} : vector<512x32xbf16>, vector<32x8xbf16>, vector<512x8xf32> -> vector<512x8xf32>
    %32 = vector.broadcast %28 : vector<512x1xf32> to vector<512x8xf32>
    %33 = arith.mulf %31, %32 : vector<512x8xf32>
    %cst_23 = arith.constant dense<0xFF800000> : vector<512xf32>
    %34 = vector.multi_reduction <maximumf>, %33, %cst_23 [1] : vector<512x8xf32> to vector<512xf32>
    %35 = vector.shape_cast %34 : vector<512xf32> to vector<512x1xf32>
    %36 = vector.broadcast %35 : vector<512x1xf32> to vector<512x8xf32>
    %37 = arith.subf %33, %36 : vector<512x8xf32>
    %38 = math.exp %37 : vector<512x8xf32>
    %cst_24 = arith.constant dense<0.000000e+00> : vector<512xf32>
    %39 = vector.multi_reduction <add>, %38, %cst_24 [1] : vector<512x8xf32> to vector<512xf32>
    %40 = vector.shape_cast %39 : vector<512xf32> to vector<512x1xf32>
    %41 = math.log %40 : vector<512x1xf32>
    %42 = arith.addf %35, %41 : vector<512x1xf32>
    %43 = tpu.iota {dimensions = array<i32: 1>} : vector<512x8xi32>
    %c0_25 = arith.constant 0 : index
    %c0_26 = arith.constant 0 : index
    %c0_27 = arith.constant 0 : index
    %44 = vector.load %arg3[%c0_25, %c0_26, %c0_27] : memref<1x512x1xi32, #tpu.memory_space<vmem>>, vector<1x512x1xi32>
    %45 = vector.shape_cast %44 : vector<1x512x1xi32> to vector<512x1xi32>
    %46 = vector.broadcast %45 : vector<512x1xi32> to vector<512x8xi32>
    %47 = arith.cmpi eq, %43, %46 : vector<512x8xi32>
    %cst_28 = arith.constant 0.000000e+00 : f32
    %48 = vector.broadcast %cst_28 : f32 to vector<512x8xf32>
    %49 = arith.select %47, %33, %48 : vector<512x8xi1>, vector<512x8xf32>
    %cst_29 = arith.constant dense<0.000000e+00> : vector<512xf32>
    %50 = vector.multi_reduction <add>, %49, %cst_29 [1] : vector<512x8xf32> to vector<512xf32>
    %51 = vector.shape_cast %50 : vector<512xf32> to vector<512x1xf32>
    %52 = arith.subf %42, %51 : vector<512x1xf32>
    %c512_i32 = arith.constant 512 : i32
    %53 = arith.muli %arg1, %c512_i32 : i32
    %54 = tpu.iota {dimensions = array<i32: 0>} : vector<512x1xi32>
    %55 = vector.broadcast %53 : i32 to vector<512x1xi32>
    %56 = arith.addi %55, %54 : vector<512x1xi32>
    %c1000_i32 = arith.constant 1000 : i32
    %57 = vector.broadcast %c1000_i32 : i32 to vector<512x1xi32>
    %58 = arith.cmpi slt, %56, %57 : vector<512x1xi32>
    %cst_30 = arith.constant 0.000000e+00 : f32
    %59 = vector.broadcast %cst_30 : f32 to vector<512x1xf32>
    %60 = arith.select %58, %52, %59 : vector<512x1xi1>, vector<512x1xf32>
    %61 = vector.shape_cast %60 : vector<512x1xf32> to vector<1x512x1xf32>
    %cst_31 = arith.constant dense<0.000000e+00> : vector<1xf32>
    %62 = vector.multi_reduction <add>, %61, %cst_31 [1, 2] : vector<1x512x1xf32> to vector<1xf32>
    %63 = vector.shape_cast %62 : vector<1xf32> to vector<1x1x1xf32>
    %64 = vector.extract %63[0, 0, 0] : f32 from vector<1x1x1xf32>
    %65 = vector.broadcast %64 : f32 to vector<1x128xf32>
    %c0_32 = arith.constant 0 : index
    %c0_33 = arith.constant 0 : index
    %c0_34 = arith.constant 0 : index
    %c0_35 = arith.constant 0 : index
    %66 = vector.load %arg11[%c0_32, %c0_33, %c0_34, %c0_35] : memref<1x1x1x128xf32, #tpu.memory_space<vmem>>, vector<1x1x1x128xf32>
    %67 = vector.shape_cast %66 : vector<1x1x1x128xf32> to vector<1x128xf32>
    %68 = vector.shape_cast %65 : vector<1x128xf32> to vector<1x1x1x128xf32>
    tpu.vector_store %arg11[%c0_32, %c0_33, %c0_34, %c0_35], %68 {strides = array<i32>} : memref<1x1x1x128xf32, #tpu.memory_space<vmem>>, vector<1x1x1x128xf32>,
    return
  }
  func.func @transform_0(%arg0: i32, %arg1: i32) -> (i32, i32, i32) {
    %c0_i32 = arith.constant 0 : i32
    %c0_i32_0 = arith.constant 0 : i32
    return %arg0, %arg1, %c0_i32 : i32, i32, i32
  }
  func.func @transform_1(%arg0: i32, %arg1: i32) -> (i32, i32, i32) {
    %c0_i32 = arith.constant 0 : i32
    %c0_i32_0 = arith.constant 0 : i32
    return %arg0, %arg1, %c0_i32 : i32, i32, i32
  }
  func.func @transform_2(%arg0: i32, %arg1: i32) -> (i32, i32) {
    %c0_i32 = arith.constant 0 : i32
    %c0_i32_0 = arith.constant 0 : i32
    %c0_i32_1 = arith.constant 0 : i32
    return %c0_i32, %c0_i32_0 : i32, i32
  }
  func.func @transform_3(%arg0: i32, %arg1: i32) -> (i32, i32) {
    %c0_i32 = arith.constant 0 : i32
    %c0_i32_0 = arith.constant 0 : i32
    %c0_i32_1 = arith.constant 0 : i32
    return %c0_i32, %c0_i32_0 : i32, i32
  }
  func.func @transform_4(%arg0: i32, %arg1: i32) -> (i32, i32) {
    %c0_i32 = arith.constant 0 : i32
    %c0_i32_0 = arith.constant 0 : i32
    %c0_i32_1 = arith.constant 0 : i32
    return %c0_i32, %c0_i32_0 : i32, i32
  }
  func.func @transform_5(%arg0: i32, %arg1: i32) -> (i32, i32) {
    %c0_i32 = arith.constant 0 : i32
    %c0_i32_0 = arith.constant 0 : i32
    %c0_i32_1 = arith.constant 0 : i32
    return %c0_i32, %c0_i32_0 : i32, i32
  }
  func.func @transform_6(%arg0: i32, %arg1: i32) -> (i32, i32) {
    %c0_i32 = arith.constant 0 : i32
    %c0_i32_0 = arith.constant 0 : i32
    %c0_i32_1 = arith.constant 0 : i32
    return %c0_i32, %c0_i32_0 : i32, i32
  }
  func.func @transform_7(%arg0: i32, %arg1: i32) -> (i32, i32) {
    %c0_i32 = arith.constant 0 : i32
    %c0_i32_0 = arith.constant 0 : i32
    %c0_i32_1 = arith.constant 0 : i32
    return %c0_i32, %c0_i32_0 : i32, i32
  }
  func.func @transform_8(%arg0: i32, %arg1: i32) -> (i32, i32) {
    %c0_i32 = arith.constant 0 : i32
    %c0_i32_0 = arith.constant 0 : i32
    %c0_i32_1 = arith.constant 0 : i32
    return %c0_i32, %c0_i32_0 : i32, i32
  }
  func.func @transform_9(%arg0: i32, %arg1: i32) -> (i32, i32, i32, i32) {
    %c0_i32 = arith.constant 0 : i32
    %c0_i32_0 = arith.constant 0 : i32
    %c0_i32_1 = arith.constant 0 : i32
    return %arg0, %arg1, %c0_i32, %c0_i32_0 : i32, i32, i32, i32
  }
}

</mosaic_0001>

<bundles_post_ra>
// kernel: tpu_custom_call.1
= control target key start
LH: loop header
LB: loop body
LE: loop exit
PB: predicated region body
PF: predicated region fallthrough
CT: control target
= control target key end

     0   :  { %s8568_s0 = inlined_call_operand.vmem [shape: bf16[2,1024,32], index: 0, kind: input, shape index: {}]   ;;  %s8569_s1 = inlined_call_operand.vmem [shape: s32[2,1024,1], index: 1, kind: input, shape index: {}]   ;;  %s8570_s2 = inlined_call_operand.vmem [shape: bf16[32,32], index: 2, kind: input, shape index: {}]   ;;  %s8571_s3 = inlined_call_operand.vmem [shape: f32[1,32], index: 3, kind: input, shape index: {}]   ;;  %s8572_s4 = inlined_call_operand.vmem [shape: bf16[32,32], index: 4, kind: input, shape index: {}]   ;;  %s8573_s5 = inlined_call_operand.vmem [shape: f32[1,32], index: 5, kind: input, shape index: {}]   ;;  %s8574_s6 = inlined_call_operand.vmem [shape: bf16[32,32], index: 6, kind: input, shape index: {}]   ;;  %s8575_s7 = inlined_call_operand.vmem [shape: f32[1,32], index: 7, kind: input, shape index: {}]   ;;  %s8576_s8 = inlined_call_operand.vmem [shape: bf16[32,8], index: 8, kind: input, shape index: {}]   ;;  %s8577_s9 = inlined_call_operand.hbm [shape: f32[2,2,1,128], index: 9, kind: output, shape index: {}]  }
   0x1   :  { %8664 = sst [smem:[#allocation112_spill]] %s8568_s0 }
   0x2   :  { %8665 = sst [smem:[#allocation113_spill]] %s8569_s1 }
   0x3   :  { %14 = vsyncpa [#allocation3], 0 }
   0x4   :  { %16 = vsyncpa [#allocation3 + $0x1], 0  ;;  %s6078_s30 = smov 0   ;;  %s6080_s10 = smov 0  }
   0x5   :  { %s6082_s11 = smov 0   ;;  %s6084_s12 = smov 0  }
   0x6   :  { %s6086_s13 = smov 0   ;;  %s6088_s14 = smov 0  }
   0x7   :  { %s6090_s15 = smov 0   ;;  %s6092_s16 = smov 0  }
   0x8 LB: > { %s4835_s17 = sadd.s32 4294967295, %s6024_s16   ;;  %s4836_s18 = sadd.s32 4294967294, %s6024_s16   ;;  %s6024_s16 = sphi %s6092_s16, %s22_s16   ;;  %s6020_s15 = sphi %s6090_s15, %s9009_s15   ;;  %s6016_s14 = sphi %s6088_s14, %s9008_s14   ;;  %s6012_s13 = sphi %s6086_s13, %s9007_s13   ;;  %s6008_s12 = sphi %s6084_s12, %s9006_s12   ;;  %s6004_s11 = sphi %s6082_s11, %s9005_s11   ;;  %s6000_s10 = sphi %s6080_s10, %s9004_s10   ;;  %s5996_s30 = sphi %s6078_s30, %s9003_s30  }
   0x9   : > { %s31_s19 = sadd.s32 1, %s6016_s14  ;;  %s34_s20 = sadd.s32 1, %s6020_s15 }
   0xa   : > { %p32_p0 = scmp.ge.s32.totalorder %s31_s19, 2  ;;  %p256_p1 = scmp.ne.s32.totalorder %s6004_s11, %s6000_s10 }
   0xb   : > { %p257_p2 = scmp.eq.s32.totalorder %s4835_s17, 3  ;;  %p262_p5 = scmp.ne.s32.totalorder %s6000_s10, %s5996_s30 }
   0xc   : > { %s9011_s19 = smov (%p32_p0, %s31_s19), 0  ;;  %s9013_s20 = smov (!%p32_p0, %s34_s20), %s6020_s15 }
   0xd   : > { %8666 = sst [smem:[#allocation5_spill]] %s9011_s19  ;;  %s242_s21 = ssub.s32 %s6016_s14, %s9011_s19 }
   0xe   : > { %p6129_p3 = por %p257_p2, %p256_p1  ;;  %p36_p4 = scmp.ge.s32.totalorder %s9013_s20, 2 }
   0xf   : > { %p263_p6 = scmp.eq.s32.totalorder %s4836_s18, 3  ;;  %p4839_p7 = scmp.ge.s32.totalorder %s6024_s16, 1 }
  0x10   : > { %s9015_s20 = smov (%p36_p4, %s9013_s20), 0  ;;  %p328_p9 = scmp.lt.s32.totalorder %s6024_s16, 5 }
  0x11   : > { %8668 = sst [smem:[#allocation6_spill]] %s9015_s20  ;;  %p6138_p8 = por %p263_p6, %p262_p5 }
  0x12   : > { %s241_s24 = ssub.s32 %s6020_s15, %s9015_s20  ;;  %s246_s25 = sadd.s32 1, %s6004_s11 }
  0x13   : > { %s243_s26 = sor.u32 %s242_s21, %s241_s24  ;;  %p329_p10 = pnand %p4839_p7, %p328_p9 }
  0x14   : > { %p244_p11 = scmp.eq.s32.totalorder %s243_s26, 0 }
  0x15   : > { %332 = sbr.rel (%p329_p10) target bundleno = 1757 (0x6dd), region = 56 }
  0x16   : > { %s6147_s27 = scalar_select %p244_p11, %s6004_s11, %s246_s25  }
  0x1c   : > { %v5506_v0 = vld [vmem:[%s8570_s2] sm:$0xff]   ;;  %s4840_s17 = sshll.u32 %s6008_s12, 6  ;;  %v5507_v1 = vld [vmem:[%s8570_s2 + $0x8] sm:$0xff]   ;;  %p377_p12 = scmp.lt.s32.totalorder %s6012_s13, 1  ;;  %vm644_vm0 = vcmask 261120   ;;  %v6026_v47 = vmov 0  }
  0x1d   : > { %5158 = vmatprep.subr.bf16.mxu0 %v5506_v0  ;;  %p379_p13 = scmp.lt.s32.totalorder %s4840_s17, 127  ;;  %s8670_s0 = sld [smem:[#allocation112_spill]]  ;;  %v5540_v26 = vld [vmem:[%s8572_s4] sm:$0xff]   ;;  %v5541_v28 = vld [vmem:[%s8572_s4 + $0x8] sm:$0xff]   ;;  %5504 = vset.pattern.permute.xlu0 %v6026_v47  ;;  %vm2919_vm1 = vcmask 64512  }
  0x1e   : > { %5159 = vmatpush3.bf16.msra.mxu0 %v5506_v0  ;;  %s378_s21 = scalar_select %p377_p12, %s6012_s13, 1  ;;  %5226 = vmatprep.subr.bf16.mxu1 %v5540_v26  ;;  %v5542_v36 = vld [vmem:[%s8574_s6] sm:$0xff]   ;;  %v5543_v45 = vld [vmem:[%s8574_s6 + $0x8] sm:$0xff]  }
  0x1f   : > { %5160 = vmatprep.subr.bf16.mxu0 %v5507_v1  ;;  %s9017_s17 = smov (!%p379_p13, %s4840_s17), 127  ;;  %5227 = vmatpush3.bf16.msra.mxu1 %v5540_v26  ;;  %v6242_v37 = vld [vmem:[%s8571_s3] ss:$0 sm:$0xff]  ;;  %s8671_s1 = sld [smem:[#allocation113_spill]] }
  0x20   : > { %s4841_s24 = sshll.u32 %s378_s21, 7  ;;  %5228 = vmatprep.subr.bf16.mxu1 %v5541_v28  ;;  %5505 = vset.pattern.permute.xlu1 %v6026_v47  ;;  %s5017_s21 = sshll.u32 %s6008_s12, 9 }
  0x21   : > { %s6158_s25 = sadd.s32 %s4841_s24, %s9017_s17 }
  0x22   : > { %5161 = vmatpush3.bf16.msra.mxu0 %v5507_v1  ;;  %s4842_s26 = sshll.u32 %s6158_s25, 2  ;;  %s4845_s17 = sshll.u32 %s6158_s25, 3 }
  0x23   : > { %s6164_s20 = scalar_lea.vmem %s8670_s0, %s4842_s26  ;;  %5229 = vmatpush3.bf16.msra.mxu1 %v5541_v28  ;;  %5294 = vmatprep.subr.bf16.mxu0 %v5542_v36  ;;  %s5018_s25 = sshll.u32 %s6012_s13, 1 }
  0x24   : > { %v5508_v2 = vld [vmem:[%s6164_s20] sm:$0xff]   ;;  %v5509_v3 = vld [vmem:[%s6164_s20 + $0x8] sm:$0xff]   ;;  %v5510_v4 = vld [vmem:[%s6164_s20 + $0x10] sm:$0xff]   ;;  %s4739_s26 = sadd.s32 %s6008_s12, %s5018_s25  ;;  %s6027_s12 = smov [#allocation2]  }
  0x25   : > { %5162 = vmatprep.mubr.msk.bf16.mxu0 %vm644_vm0, %v5508_v2  ;;  %v5511_v5 = vld [vmem:[%s6164_s20 + $0x18] sm:$0xff]   ;;  %v5512_v6 = vld [vmem:[%s6164_s20 + $0x20] sm:$0xff]   ;;  %v5513_v7 = vld [vmem:[%s6164_s20 + $0x28] sm:$0xff]   ;;  %s6255_s24 = scalar_lea.vmem %s8671_s1, %s4845_s17  ;;  %s5934_s13 = sshll.u32 %s6027_s12, 4  ;;  %s5935_s13 = int_to_ptr.vmem [resolvable:$false] %s5934_s13 }
  0x26   : > { %5163 = vmatmul.mubr.msk.bf16.vlgmr.msra.gmra.mrb[0].mxu0 %vm644_vm0, %v5509_v3  ;;  %v5514_v8 = vld [vmem:[%s6164_s20 + $0x30] sm:$0xff]   ;;  %v5515_v9 = vld [vmem:[%s6164_s20 + $0x38] sm:$0xff]   ;;  %v5516_v10 = vld [vmem:[%s6164_s20 + $0x40] sm:$0xff]   ;;  %s5936_s25 = scalar_lea.vmem %s5935_s13, 32 }
  0x27   : > { %5166 = vmatprep.mubr.msk.bf16.mxu0 %vm644_vm0, %v5510_v4  ;;  %v5517_v11 = vld [vmem:[%s6164_s20 + $0x48] sm:$0xff]   ;;  %v5518_v12 = vld [vmem:[%s6164_s20 + $0x50] sm:$0xff]   ;;  %v5519_v13 = vld [vmem:[%s6164_s20 + $0x58] sm:$0xff]   ;;  %5295 = vmatpush3.bf16.msra.mxu0 %v5542_v36 }
  0x28   : > { %v5520_v14 = vld [vmem:[%s6164_s20 + $0x60] sm:$0xff]   ;;  %v5521_v15 = vld [vmem:[%s6164_s20 + $0x68] sm:$0xff]   ;;  %v5522_v16 = vld [vmem:[%s6164_s20 + $0x70] sm:$0xff]   ;;  %5296 = vmatprep.subr.bf16.mxu0 %v5543_v45 }
  0x29   : > { %v5523_v17 = vld [vmem:[%s6164_s20 + $0x78] sm:$0xff]   ;;  %v5524_v18 = vld [vmem:[%s6164_s20 + $0x80] sm:$0xff]   ;;  %v5525_v19 = vld [vmem:[%s6164_s20 + $0x88] sm:$0xff]  }
  0x2a   : > { %v5526_v20 = vld [vmem:[%s6164_s20 + $0x90] sm:$0xff]   ;;  %v5527_v21 = vld [vmem:[%s6164_s20 + $0x98] sm:$0xff]   ;;  %v5528_v22 = vld [vmem:[%s6164_s20 + $0xa0] sm:$0xff]  }
  0x2b   : > { %v5529_v23 = vld [vmem:[%s6164_s20 + $0xa8] sm:$0xff]   ;;  %v5530_v24 = vld [vmem:[%s6164_s20 + $0xb0] sm:$0xff]   ;;  %v5531_v25 = vld [vmem:[%s6164_s20 + $0xb8] sm:$0xff]   ;;  %5297 = vmatpush3.bf16.msra.mxu0 %v5543_v45 }
  0x2c   : > { %v5532_v27 = vld [vmem:[%s6164_s20 + $0xc0] sm:$0xff]   ;;  %v5533_v29 = vld [vmem:[%s6164_s20 + $0xc8] sm:$0xff]   ;;  %v5534_v30 = vld [vmem:[%s6164_s20 + $0xd0] sm:$0xff]  }
  0x2d   : > { %v5535_v31 = vld [vmem:[%s6164_s20 + $0xd8] sm:$0xff]   ;;  %v5536_v32 = vld [vmem:[%s6164_s20 + $0xe0] sm:$0xff]   ;;  %v5537_v33 = vld [vmem:[%s6164_s20 + $0xe8] sm:$0xff]  }
  0x2e   : > { %5167 = vmatmul.mubr.msk.bf16.gmra.mrb[4].mxu0 %vm644_vm0, %v5511_v5  ;;  %v5538_v34 = vld [vmem:[%s6164_s20 + $0xf0] sm:$0xff]   ;;  %v5539_v35 = vld [vmem:[%s6164_s20 + $0xf8] sm:$0xff]   ;;  %v3690_v50 = vld [vmem:[%s6255_s24] sm:$0xff]  ;;  %s5019_s20 = sshll.u32 %s4739_s26, 4 }
  0x2f   : > { %5170 = vmatprep.mubr.msk.bf16.mxu0 %vm644_vm0, %v5512_v6  ;;  %3755 = vperm.xlu0 %5504, %v3690_v50   ;;  %v3699_v54 = vld [vmem:[%s6255_s24 + $0x48] sm:$0xff]  ;;  %v3701_v0 = vld [vmem:[%s6255_s24 + $0x58] sm:$0xff] }
  0x30   : > { %v3703_v6 = vld [vmem:[%s6255_s24 + $0x68] sm:$0xff] }
  0x33   : > { %3782 = vperm.xlu0 %5504, %v3699_v54  }
  0x36   : > { %5171 = vmatmul.mubr.msk.bf16.gmra.mrb[8].mxu0 %vm644_vm0, %v5513_v7 }
  0x37   : > { %5174 = vmatprep.mubr.msk.bf16.mxu0 %vm644_vm0, %v5514_v8  ;;  %3788 = vperm.xlu0 %5504, %v3701_v0  }
  0x3b   : > { %3794 = vperm.xlu0 %5504, %v3703_v6  }
  0x3e   : > { %5175 = vmatmul.mubr.msk.bf16.gmra.mrb[12].mxu0 %vm644_vm0, %v5515_v9 }
  0x3f   : > { %5178 = vmatprep.mubr.msk.bf16.mxu0 %vm644_vm0, %v5516_v10 }
  0x46   : > { %5179 = vmatmul.mubr.msk.bf16.gmra.mrb[16].mxu0 %vm644_vm0, %v5517_v11 }
  0x47   : > { %5182 = vmatprep.mubr.msk.bf16.mxu0 %vm644_vm0, %v5518_v12 }
  0x4e   : > { %5183 = vmatmul.mubr.msk.bf16.gmra.mrb[20].mxu0 %vm644_vm0, %v5519_v13 }
  0x4f   : > { %5186 = vmatprep.mubr.msk.bf16.mxu0 %vm644_vm0, %v5520_v14 }
  0x56   : > { %5187 = vmatmul.mubr.msk.bf16.gmra.mrb[24].mxu0 %vm644_vm0, %v5521_v15 }
  0x57   : > { %5190 = vmatprep.mubr.msk.bf16.mxu0 %vm644_vm0, %v5522_v16  ;;  %v3705_v16 = vld [vmem:[%s6255_s24 + $0x78] sm:$0xff] }
  0x58   : > { %3800 = vperm.xlu0 %5504, %v3705_v16  }
  0x5e   : > { %5191 = vmatmul.mubr.msk.bf16.gmra.mrb[28].mxu0 %vm644_vm0, %v5523_v17 }
  0x5f   : > { %5194 = vmatprep.mubr.msk.bf16.mxu0 %vm644_vm0, %v5524_v18 }
  0x66   : > { %5195 = vmatmul.mubr.msk.bf16.gmra.mrb[32].mxu0 %vm644_vm0, %v5525_v19 }
  0x67   : > { %5198 = vmatprep.mubr.msk.bf16.mxu0 %vm644_vm0, %v5526_v20 }
  0x6e   : > { %5199 = vmatmul.mubr.msk.bf16.gmra.mrb[36].mxu0 %vm644_vm0, %v5527_v21 }
  0x6f   : > { %5202 = vmatprep.mubr.msk.bf16.mxu0 %vm644_vm0, %v5528_v22  ;;  %v3707_v22 = vld [vmem:[%s6255_s24 + $0x88] sm:$0xff] }
  0x70   : > { %3806 = vperm.xlu0 %5504, %v3707_v22  }
  0x76   : > { %5203 = vmatmul.mubr.msk.bf16.gmra.mrb[40].mxu0 %vm644_vm0, %v5529_v23 }
  0x77   : > { %5206 = vmatprep.mubr.msk.bf16.mxu0 %vm644_vm0, %v5530_v24 }
  0x7e   : > { %5207 = vmatmul.mubr.msk.bf16.gmra.mrb[44].mxu0 %vm644_vm0, %v5531_v25 }
  0x7f   : > { %5210 = vmatprep.mubr.msk.bf16.mxu0 %vm644_vm0, %v5532_v27 }
  0x86   : > { %5211 = vmatmul.mubr.msk.bf16.gmra.mrb[48].mxu0 %vm644_vm0, %v5533_v29 }
  0x87   : > { %5214 = vmatprep.mubr.msk.bf16.mxu0 %vm644_vm0, %v5534_v30 }
  0x8e   : > { %5215 = vmatmul.mubr.msk.bf16.gmra.mrb[52].mxu0 %vm644_vm0, %v5535_v31 }
  0x8f   : > { %5218 = vmatprep.mubr.msk.bf16.mxu0 %vm644_vm0, %v5536_v32  ;;  %v3709_v32 = vld [vmem:[%s6255_s24 + $0x98] sm:$0xff] }
  0x90   : > { %3812 = vperm.xlu0 %5504, %v3709_v32  }
  0x96   : > { %5219 = vmatmul.mubr.msk.bf16.gmra.mrb[56].mxu0 %vm644_vm0, %v5537_v33 }
  0x97   : > { %5222 = vmatprep.mubr.msk.bf16.mxu0 %vm644_vm0, %v5538_v34 }
  0x9e   : > { %5223 = vmatmul.mubr.msk.bf16.gmra.mrb[60].mxu0 %vm644_vm0, %v5539_v35 }
  0xf9   : > { %v5164_v38 = vpop.f32.mrb[0].mxu0 }
  0xfa   : > { %v784_v39 = vadd.f32 %v5164_v38, %v6242_v37  ;;  %v775_v40 = vpop.f32.mrb[1].mxu0 }
  0xfb   : > { %v776_v41 = vadd.f32 %v6242_v37, %v775_v40  ;;  %v5165_v42 = vpop.f32.mrb[2].mxu0 }
  0xfc   : > { %v787_v43 = vadd.f32 %v5165_v42, %v6242_v37  ;;  %v778_v44 = vpop.f32.mrb[3].mxu0  ;;  %v1032_v48 = vmax.f32 %v784_v39, 0.0  ;;  %v3711_v39 = vld [vmem:[%s6255_s24 + $0xa8] sm:$0xff] }
  0xfd   : > { %v779_v46 = vadd.f32 %v6242_v37, %v778_v44  ;;  %v1030_v51 = vmax.f32 %v776_v41, 0.0  ;;  %3818 = vperm.xlu0 %5504, %v3711_v39  }
  0xfe   : > { %v1033_v49 = vmax.f32 %v787_v43, 0.0 }
  0xff   : > { %v1031_v52 = vmax.f32 %v779_v46, 0.0 }
 0x100   : > { %v1095_v53 = vpack.c.bf16 %v1033_v49, %v1032_v48  ;;  %v3713_v49 = vld [vmem:[%s6255_s24 + $0xb8] sm:$0xff] }
 0x101   : > { %v5168_v55 = vpop.f32.mrb[4].mxu0  ;;  %v1094_v56 = vpack.c.bf16 %v1031_v52, %v1030_v51  ;;  %3824 = vperm.xlu0 %5504, %v3713_v49  }
 0x102   : > { %v800_v57 = vadd.f32 %v5168_v55, %v6242_v37  ;;  %v791_v58 = vpop.f32.mrb[5].mxu0  ;;  %v3715_v55 = vld [vmem:[%s6255_s24 + $0xc8] sm:$0xff] }
 0x103   : > { %v792_v59 = vadd.f32 %v6242_v37, %v791_v58  ;;  %v5169_v60 = vpop.f32.mrb[6].mxu0  ;;  %5230 = vmatprep.mubr.msk.bf16.mxu1 %vm644_vm0, %v1094_v56 }
 0x104   : > { %v1036_v61 = vmax.f32 %v800_v57, 0.0  ;;  %v803_v62 = vadd.f32 %v5169_v60, %v6242_v37  ;;  %v794_v63 = vpop.f32.mrb[7].mxu0  ;;  %5231 = vmatmul.mubr.msk.bf16.vlgmr.msra.gmra.mrb[0].mxu1 %vm644_vm0, %v1095_v53 }
 0x105   : > { %v1034_v1 = vmax.f32 %v792_v59, 0.0  ;;  %v795_v2 = vadd.f32 %v6242_v37, %v794_v63  ;;  %3830 = vperm.xlu0 %5504, %v3715_v55  }
 0x106   : > { %v1037_v3 = vmax.f32 %v803_v62, 0.0 }
 0x107   : > { %v1035_v4 = vmax.f32 %v795_v2, 0.0 }
 0x108   : > { %v1097_v5 = vpack.c.bf16 %v1037_v3, %v1036_v61 }
 0x109   : > { %v1096_v7 = vpack.c.bf16 %v1035_v4, %v1034_v1  ;;  %v5172_v8 = vpop.f32.mrb[8].mxu0 }
 0x10a   : > { %v816_v9 = vadd.f32 %v5172_v8, %v6242_v37  ;;  %v807_v10 = vpop.f32.mrb[9].mxu0 }
 0x10b   : > { %v808_v11 = vadd.f32 %v6242_v37, %v807_v10  ;;  %v5173_v12 = vpop.f32.mrb[10].mxu0  ;;  %5234 = vmatprep.mubr.msk.bf16.mxu1 %vm644_vm0, %v1096_v7 }
 0x10c   : > { %v1040_v13 = vmax.f32 %v816_v9, 0.0  ;;  %v819_v14 = vadd.f32 %v5173_v12, %v6242_v37  ;;  %v810_v15 = vpop.f32.mrb[11].mxu0  ;;  %5235 = vmatmul.mubr.msk.bf16.gmra.mrb[4].mxu1 %vm644_vm0, %v1097_v5 }
 0x10d   : > { %v1038_v17 = vmax.f32 %v808_v11, 0.0  ;;  %v811_v18 = vadd.f32 %v6242_v37, %v810_v15 }
 0x10e   : > { %v1041_v19 = vmax.f32 %v819_v14, 0.0 }
 0x10f   : > { %v1039_v20 = vmax.f32 %v811_v18, 0.0 }
 0x110   : > { %v1099_v21 = vpack.c.bf16 %v1041_v19, %v1040_v13 }
 0x111   : > { %v1098_v23 = vpack.c.bf16 %v1039_v20, %v1038_v17  ;;  %v5176_v24 = vpop.f32.mrb[12].mxu0 }
 0x112   : > { %v832_v25 = vadd.f32 %v5176_v24, %v6242_v37  ;;  %v823_v26 = vpop.f32.mrb[13].mxu0 }
 0x113   : > { %v824_v27 = vadd.f32 %v6242_v37, %v823_v26  ;;  %v5177_v28 = vpop.f32.mrb[14].mxu0  ;;  %5238 = vmatprep.mubr.msk.bf16.mxu1 %vm644_vm0, %v1098_v23 }
 0x114   : > { %v1044_v29 = vmax.f32 %v832_v25, 0.0  ;;  %v835_v30 = vadd.f32 %v5177_v28, %v6242_v37  ;;  %v826_v31 = vpop.f32.mrb[15].mxu0  ;;  %5239 = vmatmul.mubr.msk.bf16.gmra.mrb[8].mxu1 %vm644_vm0, %v1099_v21 }
 0x115   : > { %v1042_v33 = vmax.f32 %v824_v27, 0.0  ;;  %v827_v34 = vadd.f32 %v6242_v37, %v826_v31 }
 0x116   : > { %v1045_v35 = vmax.f32 %v835_v30, 0.0 }
 0x117   : > { %v1043_v36 = vmax.f32 %v827_v34, 0.0 }
 0x118   : > { %v1101_v38 = vpack.c.bf16 %v1045_v35, %v1044_v29 }
 0x119   : > { %v1100_v40 = vpack.c.bf16 %v1043_v36, %v1042_v33  ;;  %v5180_v41 = vpop.f32.mrb[16].mxu0 }
 0x11a   : > { %v848_v42 = vadd.f32 %v5180_v41, %v6242_v37  ;;  %v839_v43 = vpop.f32.mrb[17].mxu0 }
 0x11b   : > { %v840_v44 = vadd.f32 %v6242_v37, %v839_v43  ;;  %v5181_v45 = vpop.f32.mrb[18].mxu0  ;;  %5242 = vmatprep.mubr.msk.bf16.mxu1 %vm644_vm0, %v1100_v40 }
 0x11c   : > { %v1048_v46 = vmax.f32 %v848_v42, 0.0  ;;  %v851_v47 = vadd.f32 %v5181_v45, %v6242_v37  ;;  %v842_v48 = vpop.f32.mrb[19].mxu0  ;;  %5243 = vmatmul.mubr.msk.bf16.gmra.mrb[12].mxu1 %vm644_vm0, %v1101_v38 }
 0x11d   : > { %v1046_v50 = vmax.f32 %v840_v44, 0.0  ;;  %v843_v51 = vadd.f32 %v6242_v37, %v842_v48 }
 0x11e   : > { %v1049_v52 = vmax.f32 %v851_v47, 0.0 }
 0x11f   : > { %v1047_v53 = vmax.f32 %v843_v51, 0.0 }
 0x120   : > { %v1103_v54 = vpack.c.bf16 %v1049_v52, %v1048_v46 }
 0x121   : > { %v1102_v56 = vpack.c.bf16 %v1047_v53, %v1046_v50  ;;  %v5184_v57 = vpop.f32.mrb[20].mxu0 }
 0x122   : > { %v864_v58 = vadd.f32 %v5184_v57, %v6242_v37  ;;  %v855_v59 = vpop.f32.mrb[21].mxu0 }
 0x123   : > { %v856_v60 = vadd.f32 %v6242_v37, %v855_v59  ;;  %v5185_v61 = vpop.f32.mrb[22].mxu0  ;;  %5246 = vmatprep.mubr.msk.bf16.mxu1 %vm644_vm0, %v1102_v56 }
 0x124   : > { %v1052_v62 = vmax.f32 %v864_v58, 0.0  ;;  %v867_v63 = vadd.f32 %v5185_v61, %v6242_v37  ;;  %v858_v0 = vpop.f32.mrb[23].mxu0  ;;  %5247 = vmatmul.mubr.msk.bf16.gmra.mrb[16].mxu1 %vm644_vm0, %v1103_v54 }
 0x125   : > { %v1050_v1 = vmax.f32 %v856_v60, 0.0  ;;  %v859_v2 = vadd.f32 %v6242_v37, %v858_v0 }
 0x126   : > { %v1053_v3 = vmax.f32 %v867_v63, 0.0 }
 0x127   : > { %v1051_v4 = vmax.f32 %v859_v2, 0.0 }
 0x128   : > { %v1105_v5 = vpack.c.bf16 %v1053_v3, %v1052_v62 }
 0x129   : > { %v1104_v6 = vpack.c.bf16 %v1051_v4, %v1050_v1  ;;  %v5188_v7 = vpop.f32.mrb[24].mxu0 }
 0x12a   : > { %v880_v8 = vadd.f32 %v5188_v7, %v6242_v37  ;;  %v871_v9 = vpop.f32.mrb[25].mxu0 }
 0x12b   : > { %v872_v10 = vadd.f32 %v6242_v37, %v871_v9  ;;  %v5189_v11 = vpop.f32.mrb[26].mxu0  ;;  %5250 = vmatprep.mubr.msk.bf16.mxu1 %vm644_vm0, %v1104_v6 }
 0x12c   : > { %v1056_v12 = vmax.f32 %v880_v8, 0.0  ;;  %v883_v13 = vadd.f32 %v5189_v11, %v6242_v37  ;;  %v874_v14 = vpop.f32.mrb[27].mxu0  ;;  %5251 = vmatmul.mubr.msk.bf16.gmra.mrb[20].mxu1 %vm644_vm0, %v1105_v5 }
 0x12d   : > { %v1054_v15 = vmax.f32 %v872_v10, 0.0  ;;  %v875_v16 = vadd.f32 %v6242_v37, %v874_v14 }
 0x12e   : > { %v1057_v17 = vmax.f32 %v883_v13, 0.0 }
 0x12f   : > { %v1055_v18 = vmax.f32 %v875_v16, 0.0 }
 0x130   : > { %v1107_v19 = vpack.c.bf16 %v1057_v17, %v1056_v12 }
 0x131   : > { %v1106_v20 = vpack.c.bf16 %v1055_v18, %v1054_v15  ;;  %v5192_v21 = vpop.f32.mrb[28].mxu0 }
 0x132   : > { %v896_v22 = vadd.f32 %v5192_v21, %v6242_v37  ;;  %v887_v23 = vpop.f32.mrb[29].mxu0 }
 0x133   : > { %v888_v24 = vadd.f32 %v6242_v37, %v887_v23  ;;  %v5193_v25 = vpop.f32.mrb[30].mxu0  ;;  %5254 = vmatprep.mubr.msk.bf16.mxu1 %vm644_vm0, %v1106_v20 }
 0x134   : > { %v1060_v26 = vmax.f32 %v896_v22, 0.0  ;;  %v899_v27 = vadd.f32 %v5193_v25, %v6242_v37  ;;  %v890_v28 = vpop.f32.mrb[31].mxu0  ;;  %5255 = vmatmul.mubr.msk.bf16.gmra.mrb[24].mxu1 %vm644_vm0, %v1107_v19 }
 0x135   : > { %v1058_v29 = vmax.f32 %v888_v24, 0.0  ;;  %v891_v30 = vadd.f32 %v6242_v37, %v890_v28 }
 0x136   : > { %v1061_v31 = vmax.f32 %v899_v27, 0.0 }
 0x137   : > { %v1059_v32 = vmax.f32 %v891_v30, 0.0 }
 0x138   : > { %v1109_v33 = vpack.c.bf16 %v1061_v31, %v1060_v26  ;;  %v3717_v26 = vld [vmem:[%s6255_s24 + $0xd8] sm:$0xff] }
 0x139   : > { %v1108_v34 = vpack.c.bf16 %v1059_v32, %v1058_v29  ;;  %v5196_v35 = vpop.f32.mrb[32].mxu0  ;;  %3836 = vperm.xlu0 %5504, %v3717_v26  }
 0x13a   : > { %v912_v36 = vadd.f32 %v5196_v35, %v6242_v37  ;;  %v903_v38 = vpop.f32.mrb[33].mxu0 }
 0x13b   : > { %v904_v39 = vadd.f32 %v6242_v37, %v903_v38  ;;  %v5197_v40 = vpop.f32.mrb[34].mxu0  ;;  %5258 = vmatprep.mubr.msk.bf16.mxu1 %vm644_vm0, %v1108_v34  ;;  %v3719_v34 = vld [vmem:[%s6255_s24 + $0xe8] sm:$0xff] }
 0x13c   : > { %v1064_v41 = vmax.f32 %v912_v36, 0.0  ;;  %v915_v42 = vadd.f32 %v5197_v40, %v6242_v37  ;;  %v906_v43 = vpop.f32.mrb[35].mxu0  ;;  %5259 = vmatmul.mubr.msk.bf16.gmra.mrb[28].mxu1 %vm644_vm0, %v1109_v33 }
 0x13d   : > { %v1062_v44 = vmax.f32 %v904_v39, 0.0  ;;  %v907_v45 = vadd.f32 %v6242_v37, %v906_v43  ;;  %3842 = vperm.xlu0 %5504, %v3719_v34   ;;  %v3721_v43 = vld [vmem:[%s6255_s24 + $0xf8] sm:$0xff]  ;;  %v3739_v34 = vld [vmem:[%s6255_s24 + $0x188] sm:$0xff] }
 0x13e   : > { %v1065_v46 = vmax.f32 %v915_v42, 0.0 }
 0x13f   : > { %v1063_v47 = vmax.f32 %v907_v45, 0.0 }
 0x140   : > { %v1111_v48 = vpack.c.bf16 %v1065_v46, %v1064_v41 }
 0x141   : > { %v1110_v49 = vpack.c.bf16 %v1063_v47, %v1062_v44  ;;  %v5200_v50 = vpop.f32.mrb[36].mxu0  ;;  %3848 = vperm.xlu0 %5504, %v3721_v43   ;;  %v3743_v43 = vld [vmem:[%s6255_s24 + $0x1a8] sm:$0xff] }
 0x142   : > { %v928_v51 = vadd.f32 %v5200_v50, %v6242_v37  ;;  %v919_v52 = vpop.f32.mrb[37].mxu0 }
 0x143   : > { %v920_v53 = vadd.f32 %v6242_v37, %v919_v52  ;;  %v5201_v54 = vpop.f32.mrb[38].mxu0  ;;  %5262 = vmatprep.mubr.msk.bf16.mxu1 %vm644_vm0, %v1110_v49 }
 0x144   : > { %v1068_v55 = vmax.f32 %v928_v51, 0.0  ;;  %v931_v56 = vadd.f32 %v5201_v54, %v6242_v37  ;;  %v922_v57 = vpop.f32.mrb[39].mxu0  ;;  %5263 = vmatmul.mubr.msk.bf16.gmra.mrb[32].mxu1 %vm644_vm0, %v1111_v48  ;;  %v3723_v51 = vld [vmem:[%s6255_s24 + $0x108] sm:$0xff] }
 0x145   : > { %v1066_v58 = vmax.f32 %v920_v53, 0.0  ;;  %v923_v59 = vadd.f32 %v6242_v37, %v922_v57  ;;  %3854 = vperm.xlu0 %5504, %v3723_v51   ;;  %v3747_v51 = vld [vmem:[%s6255_s24 + $0x1c8] sm:$0xff] }
 0x146   : > { %v1069_v60 = vmax.f32 %v931_v56, 0.0 }
 0x147   : > { %v1067_v61 = vmax.f32 %v923_v59, 0.0  ;;  %v3725_v59 = vld [vmem:[%s6255_s24 + $0x118] sm:$0xff] }
 0x148   : > { %v1113_v62 = vpack.c.bf16 %v1069_v60, %v1068_v55 }
 0x149   : > { %v1112_v63 = vpack.c.bf16 %v1067_v61, %v1066_v58  ;;  %v5204_v0 = vpop.f32.mrb[40].mxu0  ;;  %3860 = vperm.xlu0 %5504, %v3725_v59   ;;  %v5544_v59 = vld [vmem:[%s8576_s8] sm:$0xff]  }
 0x14a   : > { %v944_v1 = vadd.f32 %v5204_v0, %v6242_v37  ;;  %v935_v2 = vpop.f32.mrb[41].mxu0  ;;  %5362 = vmatprep.subr.bf16.mxu1 %v5544_v59 }
 0x14b   : > { %v936_v3 = vadd.f32 %v6242_v37, %v935_v2  ;;  %v5205_v4 = vpop.f32.mrb[42].mxu0  ;;  %5266 = vmatprep.mubr.msk.bf16.mxu1 %vm644_vm0, %v1112_v63  ;;  %5363 = vmatpush3.bf16.msra.mxu1 %v5544_v59 }
 0x14c   : > { %v1072_v5 = vmax.f32 %v944_v1, 0.0  ;;  %v947_v6 = vadd.f32 %v5205_v4, %v6242_v37  ;;  %v938_v7 = vpop.f32.mrb[43].mxu0  ;;  %5267 = vmatmul.mubr.msk.bf16.gmra.mrb[36].mxu1 %vm644_vm0, %v1113_v62 }
 0x14d   : > { %v1070_v8 = vmax.f32 %v936_v3, 0.0  ;;  %v939_v9 = vadd.f32 %v6242_v37, %v938_v7  ;;  %v3726_v3 = vld [vmem:[%s6255_s24 + $0x120] sm:$0xff] }
 0x14e   : > { %v1073_v10 = vmax.f32 %v947_v6, 0.0  ;;  %3863 = vperm.xlu0 %5504, %v3726_v3   ;;  %v3716_v3 = vld [vmem:[%s6255_s24 + $0xd0] sm:$0xff] }
 0x14f   : > { %v1071_v11 = vmax.f32 %v939_v9, 0.0 }
 0x150   : > { %v1115_v12 = vpack.c.bf16 %v1073_v10, %v1072_v5 }
 0x151   : > { %v1114_v13 = vpack.c.bf16 %v1071_v11, %v1070_v8  ;;  %v5208_v14 = vpop.f32.mrb[44].mxu0  ;;  %v3729_v11 = vld [vmem:[%s6255_s24 + $0x138] sm:$0xff] }
 0x152   : > { %v960_v15 = vadd.f32 %v5208_v14, %v6242_v37  ;;  %v951_v16 = vpop.f32.mrb[45].mxu0  ;;  %3872 = vperm.xlu0 %5504, %v3729_v11  }
 0x153   : > { %v952_v17 = vadd.f32 %v6242_v37, %v951_v16  ;;  %v5209_v18 = vpop.f32.mrb[46].mxu0  ;;  %5270 = vmatprep.mubr.msk.bf16.mxu1 %vm644_vm0, %v1114_v13 }
 0x154   : > { %v1076_v19 = vmax.f32 %v960_v15, 0.0  ;;  %v963_v20 = vadd.f32 %v5209_v18, %v6242_v37  ;;  %v954_v21 = vpop.f32.mrb[47].mxu0  ;;  %5271 = vmatmul.mubr.msk.bf16.gmra.mrb[40].mxu1 %vm644_vm0, %v1115_v12 }
 0x155   : > { %v1074_v22 = vmax.f32 %v952_v17, 0.0  ;;  %v955_v23 = vadd.f32 %v6242_v37, %v954_v21 }
 0x156   : > { %v1077_v24 = vmax.f32 %v963_v20, 0.0 }
 0x157   : > { %v1075_v25 = vmax.f32 %v955_v23, 0.0 }
 0x158   : > { %v1117_v27 = vpack.c.bf16 %v1077_v24, %v1076_v19  ;;  %v3732_v19 = vld [vmem:[%s6255_s24 + $0x150] sm:$0xff] }
 0x159   : > { %v1116_v28 = vpack.c.bf16 %v1075_v25, %v1074_v22  ;;  %v5212_v29 = vpop.f32.mrb[48].mxu0  ;;  %3881 = vperm.xlu0 %5504, %v3732_v19  }
 0x15a   : > { %v976_v30 = vadd.f32 %v5212_v29, %v6242_v37  ;;  %v967_v31 = vpop.f32.mrb[49].mxu0 }
 0x15b   : > { %v968_v32 = vadd.f32 %v6242_v37, %v967_v31  ;;  %v5213_v33 = vpop.f32.mrb[50].mxu0  ;;  %5274 = vmatprep.mubr.msk.bf16.mxu1 %vm644_vm0, %v1116_v28  ;;  %v3735_v31 = vld [vmem:[%s6255_s24 + $0x168] sm:$0xff] }
 0x15c   : > { %v1080_v35 = vmax.f32 %v976_v30, 0.0  ;;  %v979_v36 = vadd.f32 %v5213_v33, %v6242_v37  ;;  %v970_v38 = vpop.f32.mrb[51].mxu0  ;;  %5275 = vmatmul.mubr.msk.bf16.gmra.mrb[44].mxu1 %vm644_vm0, %v1117_v27  ;;  %v3733_v27 = vld [vmem:[%s6255_s24 + $0x158] sm:$0xff]  ;;  %v3734_v30 = vld [vmem:[%s6255_s24 + $0x160] sm:$0xff] }
 0x15d   : > { %v1078_v39 = vmax.f32 %v968_v32, 0.0  ;;  %v971_v40 = vadd.f32 %v6242_v37, %v970_v38  ;;  %3884 = vperm.xlu0 %5504, %v3733_v27   ;;  %v3737_v32 = vld [vmem:[%s6255_s24 + $0x178] sm:$0xff]  ;;  %v3738_v33 = vld [vmem:[%s6255_s24 + $0x180] sm:$0xff]  ;;  %v3692_v38 = vld [vmem:[%s6255_s24 + $0x10] sm:$0xff] }
 0x15e   : > { %v1081_v41 = vmax.f32 %v979_v36, 0.0  ;;  %v3740_v36 = vld [vmem:[%s6255_s24 + $0x190] sm:$0xff] }
 0x15f   : > { %v1079_v42 = vmax.f32 %v971_v40, 0.0  ;;  %v3693_v40 = vld [vmem:[%s6255_s24 + $0x18] sm:$0xff] }
 0x160   : > { %v1119_v44 = vpack.c.bf16 %v1081_v41, %v1080_v35  ;;  %v3691_v35 = vld [vmem:[%s6255_s24 + $0x8] sm:$0xff]  ;;  %v3742_v41 = vld [vmem:[%s6255_s24 + $0x1a0] sm:$0xff] }
 0x161   : > { %v1118_v45 = vpack.c.bf16 %v1079_v42, %v1078_v39  ;;  %v5216_v46 = vpop.f32.mrb[52].mxu0  ;;  %3887 = vperm.xlu0 %5504, %v3734_v30   ;;  %3758 = vperm.xlu1 %5505, %v3691_v35   ;;  %v3741_v39 = vld [vmem:[%s6255_s24 + $0x198] sm:$0xff]  ;;  %v3694_v42 = vld [vmem:[%s6255_s24 + $0x20] sm:$0xff] }
 0x162   : > { %v992_v47 = vadd.f32 %v5216_v46, %v6242_v37  ;;  %v983_v48 = vpop.f32.mrb[53].mxu0  ;;  %v3696_v46 = vld [vmem:[%s6255_s24 + $0x30] sm:$0xff] }
 0x163   : > { %v984_v49 = vadd.f32 %v6242_v37, %v983_v48  ;;  %v5217_v50 = vpop.f32.mrb[54].mxu0  ;;  %5278 = vmatprep.mubr.msk.bf16.mxu1 %vm644_vm0, %v1118_v45  ;;  %v3744_v45 = vld [vmem:[%s6255_s24 + $0x1b0] sm:$0xff]  ;;  %v3697_v48 = vld [vmem:[%s6255_s24 + $0x38] sm:$0xff] }
 0x164   : > { %v1084_v52 = vmax.f32 %v992_v47, 0.0  ;;  %v995_v53 = vadd.f32 %v5217_v50, %v6242_v37  ;;  %v986_v54 = vpop.f32.mrb[55].mxu0  ;;  %5279 = vmatmul.mubr.msk.bf16.gmra.mrb[48].mxu1 %vm644_vm0, %v1119_v44  ;;  %v3695_v44 = vld [vmem:[%s6255_s24 + $0x28] sm:$0xff]  ;;  %v3745_v47 = vld [vmem:[%s6255_s24 + $0x1b8] sm:$0xff]  ;;  %v3698_v50 = vld [vmem:[%s6255_s24 + $0x40] sm:$0xff] }
 0x165   : > { %v1082_v55 = vmax.f32 %v984_v49, 0.0  ;;  %v987_v56 = vadd.f32 %v6242_v37, %v986_v54  ;;  %3890 = vperm.xlu0 %5504, %v3735_v31   ;;  %3761 = vperm.xlu1 %5505, %v3692_v38   ;;  %v3746_v49 = vld [vmem:[%s6255_s24 + $0x1c0] sm:$0xff] }
 0x166   : > { %v1085_v57 = vmax.f32 %v995_v53, 0.0  ;;  %v3748_v53 = vld [vmem:[%s6255_s24 + $0x1d0] sm:$0xff]  ;;  %v3702_v54 = vld [vmem:[%s6255_s24 + $0x60] sm:$0xff] }
 0x167   : > { %v1083_v58 = vmax.f32 %v987_v56, 0.0  ;;  %v3704_v56 = vld [vmem:[%s6255_s24 + $0x70] sm:$0xff] }
 0x168   : > { %v1121_v60 = vpack.c.bf16 %v1085_v57, %v1084_v52  ;;  %v3700_v52 = vld [vmem:[%s6255_s24 + $0x50] sm:$0xff]  ;;  %v3750_v57 = vld [vmem:[%s6255_s24 + $0x1e0] sm:$0xff] }
 0x169   : > { %v1120_v61 = vpack.c.bf16 %v1083_v58, %v1082_v55  ;;  %v5220_v62 = vpop.f32.mrb[56].mxu0  ;;  %3764 = vperm.xlu1 %5505, %v3693_v40   ;;  %v3749_v55 = vld [vmem:[%s6255_s24 + $0x1d8] sm:$0xff]  ;;  %v3706_v58 = vld [vmem:[%s6255_s24 + $0x80] sm:$0xff] }
 0x16a   : > { %v1008_v63 = vadd.f32 %v5220_v62, %v6242_v37  ;;  %v999_v0 = vpop.f32.mrb[57].mxu0  ;;  %v3752_v62 = vld [vmem:[%s6255_s24 + $0x1f0] sm:$0xff] }
 0x16b   : > { %v1000_v1 = vadd.f32 %v6242_v37, %v999_v0  ;;  %v5221_v2 = vpop.f32.mrb[58].mxu0  ;;  %5282 = vmatprep.mubr.msk.bf16.mxu1 %vm644_vm0, %v1120_v61  ;;  %v3708_v61 = vld [vmem:[%s6255_s24 + $0x90] sm:$0xff]  ;;  %v3753_v0 = vld [vmem:[%s6255_s24 + $0x1f8] sm:$0xff] }
 0x16c   : > { %v1088_v4 = vmax.f32 %v1008_v63, 0.0  ;;  %v1011_v5 = vadd.f32 %v5221_v2, %v6242_v37  ;;  %v1002_v6 = vpop.f32.mrb[59].mxu0  ;;  %5283 = vmatmul.mubr.msk.bf16.gmra.mrb[52].mxu1 %vm644_vm0, %v1121_v60  ;;  %v3751_v60 = vld [vmem:[%s6255_s24 + $0x1e8] sm:$0xff]  ;;  %v3710_v63 = vld [vmem:[%s6255_s24 + $0xa0] sm:$0xff] }
 0x16d   : > { %v1086_v7 = vmax.f32 %v1000_v1, 0.0  ;;  %v1003_v8 = vadd.f32 %v6242_v37, %v1002_v6  ;;  %3767 = vperm.xlu1 %5505, %v3694_v42   ;;  %v3712_v1 = vld [vmem:[%s6255_s24 + $0xb0] sm:$0xff]  ;;  %v3714_v2 = vld [vmem:[%s6255_s24 + $0xc0] sm:$0xff] }
 0x16e   : > { %v1089_v9 = vmax.f32 %v1011_v5, 0.0  ;;  %v3718_v5 = vld [vmem:[%s6255_s24 + $0xe0] sm:$0xff]  ;;  %v3728_v42 = vld [vmem:[%s6255_s24 + $0x130] sm:$0xff] }
 0x16f   : > { %v1087_v10 = vmax.f32 %v1003_v8, 0.0 }
 0x170   : > { %v1123_v12 = vpack.c.bf16 %v1089_v9, %v1088_v4  ;;  %v6411_v4 = vld [vmem:[%s8573_s5] ss:$0 sm:$0xff] }
 0x171   : > { %v1122_v13 = vpack.c.bf16 %v1087_v10, %v1086_v7  ;;  %v5224_v14 = vpop.f32.mrb[60].mxu0  ;;  %3770 = vperm.xlu1 %5505, %v3695_v44  }
 0x172   : > { %v1024_v15 = vadd.f32 %v5224_v14, %v6242_v37  ;;  %v1015_v16 = vpop.f32.mrb[61].mxu0 }
 0x173   : > { %v1016_v17 = vadd.f32 %v6242_v37, %v1015_v16  ;;  %v5225_v18 = vpop.f32.mrb[62].mxu0  ;;  %5286 = vmatprep.mubr.msk.bf16.mxu1 %vm644_vm0, %v1122_v13  ;;  %v3720_v13 = vld [vmem:[%s6255_s24 + $0xf0] sm:$0xff] }
 0x174   : > { %v1092_v20 = vmax.f32 %v1024_v15, 0.0  ;;  %v1027_v21 = vadd.f32 %v5225_v18, %v6242_v37  ;;  %v1018_v22 = vpop.f32.mrb[63].mxu0  ;;  %5287 = vmatmul.mubr.msk.bf16.gmra.mrb[56].mxu1 %vm644_vm0, %v1123_v12  ;;  %v5545_v18 = vld [vmem:[%s8576_s8 + $0x8] sm:$0xff]  }
 0x175   : > { %v1090_v23 = vmax.f32 %v1016_v17, 0.0  ;;  %v1019_v24 = vadd.f32 %v6242_v37, %v1018_v22  ;;  %v3736_v37 = vld [vmem:[%s6255_s24 + $0x170] sm:$0xff]  ;;  %3773 = vperm.xlu1 %5505, %v3696_v46   ;;  %v3722_v17 = vld [vmem:[%s6255_s24 + $0x100] sm:$0xff]  ;;  %5364 = vmatprep.subr.bf16.mxu1 %v5545_v18 }
 0x176   : > { %v1093_v25 = vmax.f32 %v1027_v21, 0.0  ;;  %3893 = vperm.xlu0 %5504, %v3736_v37   ;;  %5365 = vmatpush3.bf16.msra.mxu1 %v5545_v18 }
 0x177   : > { %v1091_v26 = vmax.f32 %v1019_v24, 0.0 }
 0x178   : > { %v1125_v28 = vpack.c.bf16 %v1093_v25, %v1092_v20 }
 0x179   : > { %v1124_v29 = vpack.c.bf16 %v1091_v26, %v1090_v23  ;;  %3776 = vperm.xlu1 %5505, %v3697_v48   ;;  %v3724_v26 = vld [vmem:[%s6255_s24 + $0x110] sm:$0xff] }
 0x17a   : > { %3896 = vperm.xlu0 %5504, %v3737_v32  }
 0x17b   : > { %5290 = vmatprep.mubr.msk.bf16.mxu1 %vm644_vm0, %v1124_v29 }
 0x17c   : > { %5291 = vmatmul.mubr.msk.bf16.gmra.mrb[60].mxu1 %vm644_vm0, %v1125_v28 }
 0x17d   : > { %3779 = vperm.xlu1 %5505, %v3698_v50  }
 0x17e   : > { %3899 = vperm.xlu0 %5504, %v3738_v33  }
 0x181   : > { %3785 = vperm.xlu1 %5505, %v3700_v52  }
 0x182   : > { %3902 = vperm.xlu0 %5504, %v3739_v34   ;;  %v3727_v34 = vld [vmem:[%s6255_s24 + $0x128] sm:$0xff] }
 0x185   : > { %3791 = vperm.xlu1 %5505, %v3702_v54  }
 0x186   : > { %3905 = vperm.xlu0 %5504, %v3740_v36  }
 0x189   : > { %3797 = vperm.xlu1 %5505, %v3704_v56  }
 0x18a   : > { %3908 = vperm.xlu0 %5504, %v3741_v39  }
 0x18d   : > { %3803 = vperm.xlu1 %5505, %v3706_v58   ;;  %v3731_v58 = vld [vmem:[%s6255_s24 + $0x148] sm:$0xff] }
 0x18e   : > { %3911 = vperm.xlu0 %5504, %v3742_v41  }
 0x191   : > { %3809 = vperm.xlu1 %5505, %v3708_v61  }
 0x192   : > { %3914 = vperm.xlu0 %5504, %v3743_v43  }
 0x195   : > { %3815 = vperm.xlu1 %5505, %v3710_v63  }
 0x196   : > { %3917 = vperm.xlu0 %5504, %v3744_v45  }
 0x199   : > { %3821 = vperm.xlu1 %5505, %v3712_v1  }
 0x19a   : > { %3920 = vperm.xlu0 %5504, %v3745_v47  }
 0x19d   : > { %3827 = vperm.xlu1 %5505, %v3714_v2  }
 0x19e   : > { %3923 = vperm.xlu0 %5504, %v3746_v49  }
 0x1a1   : > { %3833 = vperm.xlu1 %5505, %v3716_v3  }
 0x1a2   : > { %3926 = vperm.xlu0 %5504, %v3747_v51   ;;  %v3730_v51 = vld [vmem:[%s6255_s24 + $0x140] sm:$0xff]  ;;  %s374_s24 = sand.u32 1, %s6000_s10  }
 0x1a3   : > { %s375_s28 = scalar_lea.vmem [#allocation2], %s374_s24  ;;  %s4729_s0 = scalar_lea.sflag [#allocation3], %s374_s24 }
 0x1a4   : > { %s4743_s29 = sshll.u32 %s375_s28, 4  ;;  %s8512_s29 = int_to_ptr.vmem [resolvable:$true] %s4743_s29 }
 0x1a5   : > { %3839 = vperm.xlu1 %5505, %v3718_v5   ;;  %s5930_s1 = scalar_lea.vmem %s8512_s29, 16  ;;  %p5937_p4 = scmp.lt.s32.totalorder %s8512_s29, %s5935_s13 }
 0x1a6   : > { %3929 = vperm.xlu0 %5504, %v3748_v53   ;;  %p5931_p0 = scmp.ne.s32.totalorder %s8512_s29, %s5930_s1  ;;  %p5938_p5 = scmp.lt.s32.totalorder %s5936_s25, %s5930_s1 }
 0x1a8   : > { %p5932_p1 = pnand %p5931_p0, %p6129_p3  ;;  %p5939_p6 = por %p5938_p5, %p5937_p4 }
 0x1a9   : > { %3845 = vperm.xlu1 %5505, %v3720_v13  }
 0x1aa   : > { %3932 = vperm.xlu0 %5504, %v3749_v55   ;;  %p5933_p2 = pneg %p5932_p1 }
 0x1ac   : > { %p5940_p7 = pnand %p5939_p6, %p5933_p2 }
 0x1ad   : > { %3851 = vperm.xlu1 %5505, %v3722_v17  }
 0x1ae   : > { %3935 = vperm.xlu0 %5504, %v3750_v57  }
 0x1b1   : > { %3857 = vperm.xlu1 %5505, %v3724_v26  }
 0x1b2   : > { %3938 = vperm.xlu0 %5504, %v3751_v60  }
 0x1b5   : > { %3866 = vperm.xlu1 %5505, %v3727_v34  }
 0x1b6   : > { %3941 = vperm.xlu0 %5504, %v3752_v62  }
 0x1b9   : > { %3869 = vperm.xlu1 %5505, %v3728_v42  }
 0x1ba   : > { %3944 = vperm.xlu0 %5504, %v3753_v0  }
 0x1bd   : > { %3875 = vperm.xlu1 %5505, %v3730_v51  }
 0x1c1   : > { %3878 = vperm.xlu1 %5505, %v3731_v58  }
 0x1d7   : > { %v5232_v6 = vpop.f32.mrb[0].mxu1 }
 0x1d8   : > { %v1288_v7 = vadd.f32 %v5232_v6, %v6411_v4  ;;  %v1279_v8 = vpop.f32.mrb[1].mxu1 }
 0x1d9   : > { %v1280_v9 = vadd.f32 %v6411_v4, %v1279_v8  ;;  %v5233_v10 = vpop.f32.mrb[2].mxu1 }
 0x1da   : > { %v1291_v11 = vadd.f32 %v5233_v10, %v6411_v4  ;;  %v1282_v12 = vpop.f32.mrb[3].mxu1  ;;  %v1536_v15 = vmax.f32 %v1288_v7, 0.0 }
 0x1db   : > { %v1283_v14 = vadd.f32 %v6411_v4, %v1282_v12  ;;  %v1534_v19 = vmax.f32 %v1280_v9, 0.0 }
 0x1dc   : > { %v1537_v16 = vmax.f32 %v1291_v11, 0.0 }
 0x1dd   : > { %v1535_v20 = vmax.f32 %v1283_v14, 0.0 }
 0x1de   : > { %v1599_v21 = vpack.c.bf16 %v1537_v16, %v1536_v15 }
 0x1df   : > { %v1598_v22 = vpack.c.bf16 %v1535_v20, %v1534_v19  ;;  %v5236_v23 = vpop.f32.mrb[4].mxu1 }
 0x1e0   : > { %v1304_v24 = vadd.f32 %v5236_v23, %v6411_v4  ;;  %v1295_v25 = vpop.f32.mrb[5].mxu1 }
 0x1e1   : > { %v1296_v27 = vadd.f32 %v6411_v4, %v1295_v25  ;;  %v5237_v28 = vpop.f32.mrb[6].mxu1  ;;  %5298 = vmatprep.mubr.msk.bf16.mxu0 %vm644_vm0, %v1598_v22 }
 0x1e2   : > { %v1540_v29 = vmax.f32 %v1304_v24, 0.0  ;;  %v1307_v30 = vadd.f32 %v5237_v28, %v6411_v4  ;;  %v1298_v31 = vpop.f32.mrb[7].mxu1  ;;  %5299 = vmatmul.mubr.msk.bf16.vlgmr.msra.gmra.mrb[64].mxu0 %vm644_vm0, %v1599_v21 }
 0x1e3   : > { %v1538_v37 = vmax.f32 %v1296_v27, 0.0  ;;  %v1299_v32 = vadd.f32 %v6411_v4, %v1298_v31 }
 0x1e4   : > { %v1541_v33 = vmax.f32 %v1307_v30, 0.0 }
 0x1e5   : > { %v1539_v35 = vmax.f32 %v1299_v32, 0.0 }
 0x1e6   : > { %v1601_v36 = vpack.c.bf16 %v1541_v33, %v1540_v29 }
 0x1e7   : > { %v1600_v38 = vpack.c.bf16 %v1539_v35, %v1538_v37  ;;  %v5240_v39 = vpop.f32.mrb[8].mxu1 }
 0x1e8   : > { %v1320_v40 = vadd.f32 %v5240_v39, %v6411_v4  ;;  %v1311_v41 = vpop.f32.mrb[9].mxu1 }
 0x1e9   : > { %v1312_v43 = vadd.f32 %v6411_v4, %v1311_v41  ;;  %v5241_v44 = vpop.f32.mrb[10].mxu1  ;;  %5302 = vmatprep.mubr.msk.bf16.mxu0 %vm644_vm0, %v1600_v38 }
 0x1ea   : > { %v1544_v45 = vmax.f32 %v1320_v40, 0.0  ;;  %v1323_v46 = vadd.f32 %v5241_v44, %v6411_v4  ;;  %v1314_v47 = vpop.f32.mrb[11].mxu1  ;;  %5303 = vmatmul.mubr.msk.bf16.gmra.mrb[68].mxu0 %vm644_vm0, %v1601_v36 }
 0x1eb   : > { %v1542_v48 = vmax.f32 %v1312_v43, 0.0  ;;  %v1315_v49 = vadd.f32 %v6411_v4, %v1314_v47 }
 0x1ec   : > { %v1545_v50 = vmax.f32 %v1323_v46, 0.0 }
 0x1ed   : > { %v1543_v52 = vmax.f32 %v1315_v49, 0.0 }
 0x1ee   : > { %v1603_v53 = vpack.c.bf16 %v1545_v50, %v1544_v45 }
 0x1ef   : > { %v1602_v54 = vpack.c.bf16 %v1543_v52, %v1542_v48  ;;  %v5244_v55 = vpop.f32.mrb[12].mxu1 }
 0x1f0   : > { %v1336_v56 = vadd.f32 %v5244_v55, %v6411_v4  ;;  %v1327_v57 = vpop.f32.mrb[13].mxu1 }
 0x1f1   : > { %v1328_v59 = vadd.f32 %v6411_v4, %v1327_v57  ;;  %v5245_v60 = vpop.f32.mrb[14].mxu1  ;;  %5306 = vmatprep.mubr.msk.bf16.mxu0 %vm644_vm0, %v1602_v54 }
 0x1f2   : > { %v1548_v61 = vmax.f32 %v1336_v56, 0.0  ;;  %v1339_v62 = vadd.f32 %v5245_v60, %v6411_v4  ;;  %v1330_v63 = vpop.f32.mrb[15].mxu1  ;;  %5307 = vmatmul.mubr.msk.bf16.gmra.mrb[72].mxu0 %vm644_vm0, %v1603_v53 }
 0x1f3   : > { %v1546_v0 = vmax.f32 %v1328_v59, 0.0  ;;  %v1331_v1 = vadd.f32 %v6411_v4, %v1330_v63 }
 0x1f4   : > { %v1549_v2 = vmax.f32 %v1339_v62, 0.0 }
 0x1f5   : > { %v1547_v3 = vmax.f32 %v1331_v1, 0.0 }
 0x1f6   : > { %v1605_v5 = vpack.c.bf16 %v1549_v2, %v1548_v61 }
 0x1f7   : > { %v1604_v6 = vpack.c.bf16 %v1547_v3, %v1546_v0  ;;  %v5248_v7 = vpop.f32.mrb[16].mxu1 }
 0x1f8   : > { %v1352_v8 = vadd.f32 %v5248_v7, %v6411_v4  ;;  %v1343_v9 = vpop.f32.mrb[17].mxu1 }
 0x1f9   : > { %v1344_v10 = vadd.f32 %v6411_v4, %v1343_v9  ;;  %v5249_v11 = vpop.f32.mrb[18].mxu1  ;;  %5310 = vmatprep.mubr.msk.bf16.mxu0 %vm644_vm0, %v1604_v6 }
 0x1fa   : > { %v1552_v12 = vmax.f32 %v1352_v8, 0.0  ;;  %v1355_v13 = vadd.f32 %v5249_v11, %v6411_v4  ;;  %v1346_v14 = vpop.f32.mrb[19].mxu1  ;;  %5311 = vmatmul.mubr.msk.bf16.gmra.mrb[76].mxu0 %vm644_vm0, %v1605_v5 }
 0x1fb   : > { %v1550_v15 = vmax.f32 %v1344_v10, 0.0  ;;  %v1347_v16 = vadd.f32 %v6411_v4, %v1346_v14 }
 0x1fc   : > { %v1553_v17 = vmax.f32 %v1355_v13, 0.0 }
 0x1fd   : > { %v1551_v18 = vmax.f32 %v1347_v16, 0.0 }
 0x1fe   : > { %v1607_v19 = vpack.c.bf16 %v1553_v17, %v1552_v12 }
 0x1ff   : > { %v1606_v20 = vpack.c.bf16 %v1551_v18, %v1550_v15  ;;  %v5252_v21 = vpop.f32.mrb[20].mxu1 }
 0x200   : > { %v1368_v22 = vadd.f32 %v5252_v21, %v6411_v4  ;;  %v1359_v23 = vpop.f32.mrb[21].mxu1 }
 0x201   : > { %v1360_v24 = vadd.f32 %v6411_v4, %v1359_v23  ;;  %v5253_v25 = vpop.f32.mrb[22].mxu1  ;;  %5314 = vmatprep.mubr.msk.bf16.mxu0 %vm644_vm0, %v1606_v20 }
 0x202   : > { %v1556_v26 = vmax.f32 %v1368_v22, 0.0  ;;  %v1371_v27 = vadd.f32 %v5253_v25, %v6411_v4  ;;  %v1362_v28 = vpop.f32.mrb[23].mxu1  ;;  %5315 = vmatmul.mubr.msk.bf16.gmra.mrb[80].mxu0 %vm644_vm0, %v1607_v19 }
 0x203   : > { %v1554_v29 = vmax.f32 %v1360_v24, 0.0  ;;  %v1363_v30 = vadd.f32 %v6411_v4, %v1362_v28 }
 0x204   : > { %v1557_v31 = vmax.f32 %v1371_v27, 0.0 }
 0x205   : > { %v1555_v37 = vmax.f32 %v1363_v30, 0.0 }
 0x206   : > { %v1609_v32 = vpack.c.bf16 %v1557_v31, %v1556_v26 }
 0x207   : > { %v1608_v33 = vpack.c.bf16 %v1555_v37, %v1554_v29  ;;  %v5256_v34 = vpop.f32.mrb[24].mxu1 }
 0x208   : > { %v1384_v35 = vadd.f32 %v5256_v34, %v6411_v4  ;;  %v1375_v36 = vpop.f32.mrb[25].mxu1 }
 0x209   : > { %v1376_v38 = vadd.f32 %v6411_v4, %v1375_v36  ;;  %v5257_v39 = vpop.f32.mrb[26].mxu1  ;;  %5318 = vmatprep.mubr.msk.bf16.mxu0 %vm644_vm0, %v1608_v33 }
 0x20a   : > { %v1560_v40 = vmax.f32 %v1384_v35, 0.0  ;;  %v1387_v41 = vadd.f32 %v5257_v39, %v6411_v4  ;;  %v1378_v42 = vpop.f32.mrb[27].mxu1  ;;  %5319 = vmatmul.mubr.msk.bf16.gmra.mrb[84].mxu0 %vm644_vm0, %v1609_v32 }
 0x20b   : > { %v1558_v43 = vmax.f32 %v1376_v38, 0.0  ;;  %v1379_v44 = vadd.f32 %v6411_v4, %v1378_v42 }
 0x20c   : > { %v1561_v45 = vmax.f32 %v1387_v41, 0.0 }
 0x20d   : > { %v1559_v46 = vmax.f32 %v1379_v44, 0.0 }
 0x20e   : > { %v1611_v47 = vpack.c.bf16 %v1561_v45, %v1560_v40 }
 0x20f   : > { %v1610_v48 = vpack.c.bf16 %v1559_v46, %v1558_v43  ;;  %v5260_v49 = vpop.f32.mrb[28].mxu1 }
 0x210   : > { %v1400_v50 = vadd.f32 %v5260_v49, %v6411_v4  ;;  %v1391_v51 = vpop.f32.mrb[29].mxu1 }
 0x211   : > { %v1392_v52 = vadd.f32 %v6411_v4, %v1391_v51  ;;  %v5261_v53 = vpop.f32.mrb[30].mxu1  ;;  %5322 = vmatprep.mubr.msk.bf16.mxu0 %vm644_vm0, %v1610_v48 }
 0x212   : > { %v1564_v54 = vmax.f32 %v1400_v50, 0.0  ;;  %v1403_v55 = vadd.f32 %v5261_v53, %v6411_v4  ;;  %v1394_v56 = vpop.f32.mrb[31].mxu1  ;;  %5323 = vmatmul.mubr.msk.bf16.gmra.mrb[88].mxu0 %vm644_vm0, %v1611_v47 }
 0x213   : > { %v1562_v57 = vmax.f32 %v1392_v52, 0.0  ;;  %v1395_v58 = vadd.f32 %v6411_v4, %v1394_v56 }
 0x214   : > { %v1565_v59 = vmax.f32 %v1403_v55, 0.0 }
 0x215   : > { %v1563_v60 = vmax.f32 %v1395_v58, 0.0 }
 0x216   : > { %v1613_v61 = vpack.c.bf16 %v1565_v59, %v1564_v54 }
 0x217   : > { %v1612_v62 = vpack.c.bf16 %v1563_v60, %v1562_v57  ;;  %v5264_v63 = vpop.f32.mrb[32].mxu1 }
 0x218   : > { %v1416_v0 = vadd.f32 %v5264_v63, %v6411_v4  ;;  %v1407_v1 = vpop.f32.mrb[33].mxu1 }
 0x219   : > { %v1408_v2 = vadd.f32 %v6411_v4, %v1407_v1  ;;  %v5265_v3 = vpop.f32.mrb[34].mxu1  ;;  %5326 = vmatprep.mubr.msk.bf16.mxu0 %vm644_vm0, %v1612_v62 }
 0x21a   : > { %v1568_v5 = vmax.f32 %v1416_v0, 0.0  ;;  %v1419_v6 = vadd.f32 %v5265_v3, %v6411_v4  ;;  %v1410_v7 = vpop.f32.mrb[35].mxu1  ;;  %5327 = vmatmul.mubr.msk.bf16.gmra.mrb[92].mxu0 %vm644_vm0, %v1613_v61 }
 0x21b   : > { %v1566_v8 = vmax.f32 %v1408_v2, 0.0  ;;  %v1411_v9 = vadd.f32 %v6411_v4, %v1410_v7 }
 0x21c   : > { %v1569_v10 = vmax.f32 %v1419_v6, 0.0 }
 0x21d   : > { %v1567_v11 = vmax.f32 %v1411_v9, 0.0 }
 0x21e   : > { %v1615_v12 = vpack.c.bf16 %v1569_v10, %v1568_v5 }
 0x21f   : > { %v1614_v13 = vpack.c.bf16 %v1567_v11, %v1566_v8  ;;  %v5268_v14 = vpop.f32.mrb[36].mxu1 }
 0x220   : > { %v1432_v15 = vadd.f32 %v5268_v14, %v6411_v4  ;;  %v1423_v16 = vpop.f32.mrb[37].mxu1 }
 0x221   : > { %v1424_v17 = vadd.f32 %v6411_v4, %v1423_v16  ;;  %v5269_v18 = vpop.f32.mrb[38].mxu1  ;;  %5330 = vmatprep.mubr.msk.bf16.mxu0 %vm644_vm0, %v1614_v13 }
 0x222   : > { %v1572_v19 = vmax.f32 %v1432_v15, 0.0  ;;  %v1435_v20 = vadd.f32 %v5269_v18, %v6411_v4  ;;  %v1426_v21 = vpop.f32.mrb[39].mxu1  ;;  %5331 = vmatmul.mubr.msk.bf16.gmra.mrb[96].mxu0 %vm644_vm0, %v1615_v12 }
 0x223   : > { %v1570_v22 = vmax.f32 %v1424_v17, 0.0  ;;  %v1427_v23 = vadd.f32 %v6411_v4, %v1426_v21 }
 0x224   : > { %v1573_v24 = vmax.f32 %v1435_v20, 0.0 }
 0x225   : > { %v1571_v25 = vmax.f32 %v1427_v23, 0.0 }
 0x226   : > { %v1617_v26 = vpack.c.bf16 %v1573_v24, %v1572_v19 }
 0x227   : > { %v1616_v27 = vpack.c.bf16 %v1571_v25, %v1570_v22  ;;  %v5272_v28 = vpop.f32.mrb[40].mxu1 }
 0x228   : > { %v1448_v29 = vadd.f32 %v5272_v28, %v6411_v4  ;;  %v1439_v30 = vpop.f32.mrb[41].mxu1 }
 0x229   : > { %v1440_v31 = vadd.f32 %v6411_v4, %v1439_v30  ;;  %v5273_v37 = vpop.f32.mrb[42].mxu1  ;;  %5334 = vmatprep.mubr.msk.bf16.mxu0 %vm644_vm0, %v1616_v27 }
 0x22a   : > { %v1576_v32 = vmax.f32 %v1448_v29, 0.0  ;;  %v1451_v33 = vadd.f32 %v5273_v37, %v6411_v4  ;;  %v1442_v34 = vpop.f32.mrb[43].mxu1  ;;  %5335 = vmatmul.mubr.msk.bf16.gmra.mrb[100].mxu0 %vm644_vm0, %v1617_v26 }
 0x22b   : > { %v1574_v35 = vmax.f32 %v1440_v31, 0.0  ;;  %v1443_v36 = vadd.f32 %v6411_v4, %v1442_v34 }
 0x22c   : > { %v1577_v38 = vmax.f32 %v1451_v33, 0.0 }
 0x22d   : > { %v1575_v39 = vmax.f32 %v1443_v36, 0.0 }
 0x22e   : > { %v1619_v40 = vpack.c.bf16 %v1577_v38, %v1576_v32 }
 0x22f   : > { %v1618_v41 = vpack.c.bf16 %v1575_v39, %v1574_v35  ;;  %v5276_v42 = vpop.f32.mrb[44].mxu1 }
 0x230   : > { %v1464_v43 = vadd.f32 %v5276_v42, %v6411_v4  ;;  %v1455_v44 = vpop.f32.mrb[45].mxu1 }
 0x231   : > { %v1456_v45 = vadd.f32 %v6411_v4, %v1455_v44  ;;  %v5277_v46 = vpop.f32.mrb[46].mxu1  ;;  %5338 = vmatprep.mubr.msk.bf16.mxu0 %vm644_vm0, %v1618_v41 }
 0x232   : > { %v1580_v47 = vmax.f32 %v1464_v43, 0.0  ;;  %v1467_v48 = vadd.f32 %v5277_v46, %v6411_v4  ;;  %v1458_v49 = vpop.f32.mrb[47].mxu1  ;;  %5339 = vmatmul.mubr.msk.bf16.gmra.mrb[104].mxu0 %vm644_vm0, %v1619_v40 }
 0x233   : > { %v1578_v50 = vmax.f32 %v1456_v45, 0.0  ;;  %v1459_v51 = vadd.f32 %v6411_v4, %v1458_v49  ;;  %v6520_v49 = vpop.permute.xlu0 %3755 }
 0x234   : > { %v1581_v52 = vmax.f32 %v1467_v48, 0.0 }
 0x235   : > { %v1579_v53 = vmax.f32 %v1459_v51, 0.0 }
 0x236   : > { %v1621_v54 = vpack.c.bf16 %v1581_v52, %v1580_v47 }
 0x237   : > { %v1620_v55 = vpack.c.bf16 %v1579_v53, %v1578_v50  ;;  %v5280_v56 = vpop.f32.mrb[48].mxu1  ;;  %v6522_v50 = vpop.permute.xlu0 %3782 }
 0x238   : > { %v1480_v57 = vadd.f32 %v5280_v56, %v6411_v4  ;;  %v1471_v58 = vpop.f32.mrb[49].mxu1  ;;  %v6539_v56 = vld [vmem:[%s8575_s7] ss:$0 sm:$0xff] }
 0x239   : > { %v1472_v59 = vadd.f32 %v6411_v4, %v1471_v58  ;;  %v5281_v60 = vpop.f32.mrb[50].mxu1  ;;  %5342 = vmatprep.mubr.msk.bf16.mxu0 %vm644_vm0, %v1620_v55 }
 0x23a   : > { %v1584_v61 = vmax.f32 %v1480_v57, 0.0  ;;  %v1483_v62 = vadd.f32 %v5281_v60, %v6411_v4  ;;  %v1474_v63 = vpop.f32.mrb[51].mxu1  ;;  %5343 = vmatmul.mubr.msk.bf16.gmra.mrb[108].mxu0 %vm644_vm0, %v1621_v54 }
 0x23b   : > { %v1582_v0 = vmax.f32 %v1472_v59, 0.0  ;;  %v1475_v1 = vadd.f32 %v6411_v4, %v1474_v63  ;;  %v6524_v51 = vpop.permute.xlu0 %3788 }
 0x23c   : > { %v1585_v2 = vmax.f32 %v1483_v62, 0.0 }
 0x23d   : > { %v1583_v3 = vmax.f32 %v1475_v1, 0.0 }
 0x23e   : > { %v1623_v5 = vpack.c.bf16 %v1585_v2, %v1584_v61 }
 0x23f   : > { %v1622_v6 = vpack.c.bf16 %v1583_v3, %v1582_v0  ;;  %v5284_v7 = vpop.f32.mrb[52].mxu1  ;;  %v6526_v52 = vpop.permute.xlu0 %3794 }
 0x240   : > { %v1496_v8 = vadd.f32 %v5284_v7, %v6411_v4  ;;  %v1487_v9 = vpop.f32.mrb[53].mxu1 }
 0x241   : > { %v1488_v10 = vadd.f32 %v6411_v4, %v1487_v9  ;;  %v5285_v11 = vpop.f32.mrb[54].mxu1  ;;  %5346 = vmatprep.mubr.msk.bf16.mxu0 %vm644_vm0, %v1622_v6 }
 0x242   : > { %v1588_v12 = vmax.f32 %v1496_v8, 0.0  ;;  %v1499_v13 = vadd.f32 %v5285_v11, %v6411_v4  ;;  %v1490_v14 = vpop.f32.mrb[55].mxu1  ;;  %5347 = vmatmul.mubr.msk.bf16.gmra.mrb[112].mxu0 %vm644_vm0, %v1623_v5 }
 0x243   : > { %v1586_v15 = vmax.f32 %v1488_v10, 0.0  ;;  %v1491_v16 = vadd.f32 %v6411_v4, %v1490_v14  ;;  %v6528_v53 = vpop.permute.xlu0 %3800 }
 0x244   : > { %v1589_v17 = vmax.f32 %v1499_v13, 0.0 }
 0x245   : > { %v1587_v18 = vmax.f32 %v1491_v16, 0.0 }
 0x246   : > { %v1625_v19 = vpack.c.bf16 %v1589_v17, %v1588_v12 }
 0x247   : > { %v1624_v20 = vpack.c.bf16 %v1587_v18, %v1586_v15  ;;  %v5288_v21 = vpop.f32.mrb[56].mxu1  ;;  %v6530_v54 = vpop.permute.xlu0 %3806 }
 0x248   : > { %v1512_v22 = vadd.f32 %v5288_v21, %v6411_v4  ;;  %v1503_v23 = vpop.f32.mrb[57].mxu1 }
 0x249   : > { %v1504_v24 = vadd.f32 %v6411_v4, %v1503_v23  ;;  %v5289_v25 = vpop.f32.mrb[58].mxu1  ;;  %5350 = vmatprep.mubr.msk.bf16.mxu0 %vm644_vm0, %v1624_v20 }
 0x24a   : > { %v1592_v26 = vmax.f32 %v1512_v22, 0.0  ;;  %v1515_v27 = vadd.f32 %v5289_v25, %v6411_v4  ;;  %v1506_v28 = vpop.f32.mrb[59].mxu1  ;;  %5351 = vmatmul.mubr.msk.bf16.gmra.mrb[116].mxu0 %vm644_vm0, %v1625_v19 }
 0x24b   : > { %v1590_v29 = vmax.f32 %v1504_v24, 0.0  ;;  %v1507_v30 = vadd.f32 %v6411_v4, %v1506_v28 }
 0x24c   : > { %v1593_v31 = vmax.f32 %v1515_v27, 0.0 }
 0x24d   : > { %v1591_v37 = vmax.f32 %v1507_v30, 0.0 }
 0x24e   : > { %v1627_v32 = vpack.c.bf16 %v1593_v31, %v1592_v26 }
 0x24f   : > { %v1626_v33 = vpack.c.bf16 %v1591_v37, %v1590_v29  ;;  %v5292_v34 = vpop.f32.mrb[60].mxu1 }
 0x250   : > { %v1528_v35 = vadd.f32 %v5292_v34, %v6411_v4  ;;  %v1519_v36 = vpop.f32.mrb[61].mxu1 }
 0x251   : > { %v1520_v38 = vadd.f32 %v6411_v4, %v1519_v36  ;;  %v5293_v39 = vpop.f32.mrb[62].mxu1  ;;  %5354 = vmatprep.mubr.msk.bf16.mxu0 %vm644_vm0, %v1626_v33 }
 0x252   : > { %v1596_v40 = vmax.f32 %v1528_v35, 0.0  ;;  %v1531_v41 = vadd.f32 %v5293_v39, %v6411_v4  ;;  %v1522_v42 = vpop.f32.mrb[63].mxu1  ;;  %5355 = vmatmul.mubr.msk.bf16.gmra.mrb[120].mxu0 %vm644_vm0, %v1627_v32 }
 0x253   : > { %v1594_v43 = vmax.f32 %v1520_v38, 0.0  ;;  %v1523_v44 = vadd.f32 %v6411_v4, %v1522_v42  ;;  %v6532_v4 = vpop.permute.xlu0 %3812 }
 0x254   : > { %v1597_v45 = vmax.f32 %v1531_v41, 0.0 }
 0x255   : > { %v1595_v46 = vmax.f32 %v1523_v44, 0.0 }
 0x256   : > { %v1629_v47 = vpack.c.bf16 %v1597_v45, %v1596_v40 }
 0x257   : > { %v1628_v48 = vpack.c.bf16 %v1595_v46, %v1594_v43  ;;  %v6534_v55 = vpop.permute.xlu0 %3818 }
 0x259   : > { %5358 = vmatprep.mubr.msk.bf16.mxu0 %vm644_vm0, %v1628_v48 }
 0x25a   : > { %5359 = vmatmul.mubr.msk.bf16.gmra.mrb[124].mxu0 %vm644_vm0, %v1629_v47 }
 0x25b   : > { %v6541_v57 = vpop.permute.xlu0 %3824 }
 0x25f   : > { %v6547_v5 = vpop.permute.xlu0 %3830 }
 0x260   : > { %8672 = vst [vmem:[#allocation7_spill] sm:$0xff] %v6547_v5 }
 0x263   : > { %v6557_v19 = vpop.permute.xlu0 %3836 }
 0x264   : > { %8673 = vst [vmem:[#allocation8_spill] sm:$0xff] %v6557_v19 }
 0x267   : > { %v6564_v37 = vpop.permute.xlu0 %3842 }
 0x268   : > { %8674 = vst [vmem:[#allocation9_spill] sm:$0xff] %v6564_v37 }
 0x2b5   : > { %v5300_v58 = vpop.f32.mrb[64].mxu0 }
 0x2b6   : > { %v1792_v59 = vadd.f32 %v5300_v58, %v6539_v56  ;;  %v1783_v60 = vpop.f32.mrb[65].mxu0  ;;  %v6574_v58 = vpop.permute.xlu0 %3848 }
 0x2b7   : > { %v1784_v61 = vadd.f32 %v6539_v56, %v1783_v60  ;;  %v5301_v62 = vpop.f32.mrb[66].mxu0  ;;  %8675 = vst [vmem:[#allocation10_spill] sm:$0xff] %v6574_v58 }
 0x2b8   : > { %v1795_v63 = vadd.f32 %v5301_v62, %v6539_v56  ;;  %v1786_v0 = vpop.f32.mrb[67].mxu0  ;;  %v2040_v1 = vmul.f32 %v1792_v59, %v1792_v59 }
 0x2b9   : > { %v1787_v2 = vadd.f32 %v6539_v56, %v1786_v0  ;;  %v2038_v3 = vmul.f32 %v1784_v61, %v1784_v61 }
 0x2ba   : > { %v2423_v6 = vpack.c.bf16 %v1795_v63, %v1792_v59  ;;  %v2108_v7 = vsel %vm644_vm0, %v2040_v1, 0.0  ;;  %v2041_v8 = vmul.f32 %v1795_v63, %v1795_v63 }
 0x2bb   : > { %v2422_v9 = vpack.c.bf16 %v1787_v2, %v1784_v61  ;;  %2109 = vadd.xlane.f32.xlu1 %v2108_v7  ;;  %v2102_v10 = vsel %vm644_vm0, %v2038_v3, 0.0  ;;  %v2039_v11 = vmul.f32 %v1787_v2, %v1787_v2 }
 0x2bc   : > { %2103 = vadd.xlane.f32.xlu0 %v2102_v10  ;;  %v2111_v15 = vsel %vm644_vm0, %v2041_v8, 0.0  ;;  %v6585_v10 = vpop.permute.xlu0 %3854 }
 0x2bd   : > { %v5304_v12 = vpop.f32.mrb[68].mxu0  ;;  %5366 = vmatprep.mubr.msk.bf16.mxu1 %vm644_vm0, %v2422_v9  ;;  %v2105_v18 = vsel %vm644_vm0, %v2039_v11, 0.0  ;;  %8676 = vst [vmem:[#allocation11_spill] sm:$0xff] %v6585_v10 }
 0x2be   : > { %v1808_v13 = vadd.f32 %v5304_v12, %v6539_v56  ;;  %v1799_v14 = vpop.f32.mrb[69].mxu0  ;;  %5367 = vmatmul.mubr.msk.bf16.vlgmr.msra.gmra.mrb[64].mxu1 %vm644_vm0, %v2423_v6 }
 0x2bf   : > { %v1800_v16 = vadd.f32 %v6539_v56, %v1799_v14  ;;  %2112 = vadd.xlane.f32.xlu1 %v2111_v15  ;;  %v5305_v17 = vpop.f32.mrb[70].mxu0 }
 0x2c0   : > { %v1811_v20 = vadd.f32 %v5305_v17, %v6539_v56  ;;  %v1802_v21 = vpop.f32.mrb[71].mxu0  ;;  %2106 = vadd.xlane.f32.xlu0 %v2105_v18  ;;  %v2044_v22 = vmul.f32 %v1808_v13, %v1808_v13 }
 0x2c1   : > { %v1803_v23 = vadd.f32 %v6539_v56, %v1802_v21  ;;  %v2042_v28 = vmul.f32 %v1800_v16, %v1800_v16 }
 0x2c2   : > { %v2425_v24 = vpack.c.bf16 %v1811_v20, %v1808_v13  ;;  %v2120_v25 = vsel %vm644_vm0, %v2044_v22, 0.0  ;;  %v2045_v26 = vmul.f32 %v1811_v20, %v1811_v20 }
 0x2c3   : > { %v2424_v27 = vpack.c.bf16 %v1803_v23, %v1800_v16  ;;  %v2043_v30 = vmul.f32 %v1803_v23, %v1803_v23  ;;  %v2114_v36 = vsel %vm644_vm0, %v2042_v28, 0.0 }
 0x2c4   : > { %2121 = vadd.xlane.f32.xlu0 %v2120_v25  ;;  %v2123_v29 = vsel %vm644_vm0, %v2045_v26, 0.0  ;;  %v6595_v25 = vpop.permute.xlu0 %3860 }
 0x2c5   : > { %2124 = vadd.xlane.f32.xlu1 %v2123_v29  ;;  %v5308_v31 = vpop.f32.mrb[72].mxu0  ;;  %5370 = vmatprep.mubr.msk.bf16.mxu1 %vm644_vm0, %v2424_v27  ;;  %v2117_v40 = vsel %vm644_vm0, %v2043_v30, 0.0  ;;  %8677 = vst [vmem:[#allocation12_spill] sm:$0xff] %v6595_v25 }
 0x2c6   : > { %v1824_v32 = vadd.f32 %v5308_v31, %v6539_v56  ;;  %v1815_v33 = vpop.f32.mrb[73].mxu0  ;;  %5371 = vmatmul.mubr.msk.bf16.gmra.mrb[68].mxu1 %vm644_vm0, %v2425_v24 }
 0x2c7   : > { %v1816_v34 = vadd.f32 %v6539_v56, %v1815_v33  ;;  %v5309_v35 = vpop.f32.mrb[74].mxu0 }
 0x2c8   : > { %v1827_v38 = vadd.f32 %v5309_v35, %v6539_v56  ;;  %v1818_v39 = vpop.f32.mrb[75].mxu0  ;;  %2115 = vadd.xlane.f32.xlu0 %v2114_v36  ;;  %v2048_v41 = vmul.f32 %v1824_v32, %v1824_v32 }
 0x2c9   : > { %v1819_v42 = vadd.f32 %v6539_v56, %v1818_v39  ;;  %2118 = vadd.xlane.f32.xlu1 %v2117_v40  ;;  %v2046_v43 = vmul.f32 %v1816_v34, %v1816_v34 }
 0x2ca   : > { %v2427_v44 = vpack.c.bf16 %v1827_v38, %v1824_v32  ;;  %v2049_v45 = vmul.f32 %v1827_v38, %v1827_v38  ;;  %v2132_v46 = vsel %vm644_vm0, %v2048_v41, 0.0  ;;  %v6601_v38 = vpop.permute.xlu1 %3758  ;;  %v6605_v41 = vpop.permute.xlu0 %3863 }
 0x2cb   : > { %v2426_v47 = vpack.c.bf16 %v1819_v42, %v1816_v34  ;;  %v2047_v48 = vmul.f32 %v1819_v42, %v1819_v42  ;;  %v2126_v61 = vsel %vm644_vm0, %v2046_v43, 0.0  ;;  %8678 = vst [vmem:[#allocation13_spill] sm:$0xff] %v6605_v41 }
 0x2cc   : > { %v2135_v59 = vsel %vm644_vm0, %v2049_v45, 0.0  ;;  %2133 = vadd.xlane.f32.xlu0 %v2132_v46 }
 0x2cd   : > { %v5312_v60 = vpop.f32.mrb[76].mxu0  ;;  %5374 = vmatprep.mubr.msk.bf16.mxu1 %vm644_vm0, %v2426_v47  ;;  %2136 = vadd.xlane.f32.xlu1 %v2135_v59  ;;  %v2129_v0 = vsel %vm644_vm0, %v2047_v48, 0.0 }
 0x2ce   : > { %v1840_v62 = vadd.f32 %v5312_v60, %v6539_v56  ;;  %v1831_v63 = vpop.f32.mrb[77].mxu0  ;;  %5375 = vmatmul.mubr.msk.bf16.gmra.mrb[72].mxu1 %vm644_vm0, %v2427_v44 }
 0x2cf   : > { %v1832_v1 = vadd.f32 %v6539_v56, %v1831_v63  ;;  %v5313_v2 = vpop.f32.mrb[78].mxu0 }
 0x2d0   : > { %v1843_v3 = vadd.f32 %v5313_v2, %v6539_v56  ;;  %v1834_v6 = vpop.f32.mrb[79].mxu0  ;;  %2127 = vadd.xlane.f32.xlu0 %v2126_v61  ;;  %v2052_v7 = vmul.f32 %v1840_v62, %v1840_v62 }
 0x2d1   : > { %v1835_v8 = vadd.f32 %v6539_v56, %v1834_v6  ;;  %2130 = vadd.xlane.f32.xlu1 %v2129_v0  ;;  %v2050_v9 = vmul.f32 %v1832_v1, %v1832_v1  ;;  %v6616_v6 = vpop.permute.xlu0 %3872 }
 0x2d2   : > { %v2429_v11 = vpack.c.bf16 %v1843_v3, %v1840_v62  ;;  %v2053_v12 = vmul.f32 %v1843_v3, %v1843_v3  ;;  %v2144_v13 = vsel %vm644_vm0, %v2052_v7, 0.0 }
 0x2d3   : > { %v2428_v14 = vpack.c.bf16 %v1835_v8, %v1832_v1  ;;  %v2051_v15 = vmul.f32 %v1835_v8, %v1835_v8  ;;  %v2138_v18 = vsel %vm644_vm0, %v2050_v9, 0.0  ;;  %v6614_v1 = vpop.permute.xlu1 %3761 }
 0x2d4   : > { %v2147_v16 = vsel %vm644_vm0, %v2053_v12, 0.0  ;;  %2145 = vadd.xlane.f32.xlu0 %v2144_v13 }
 0x2d5   : > { %v5316_v17 = vpop.f32.mrb[80].mxu0  ;;  %5378 = vmatprep.mubr.msk.bf16.mxu1 %vm644_vm0, %v2428_v14  ;;  %2148 = vadd.xlane.f32.xlu1 %v2147_v16  ;;  %v2141_v22 = vsel %vm644_vm0, %v2051_v15, 0.0 }
 0x2d6   : > { %v1856_v20 = vadd.f32 %v5316_v17, %v6539_v56  ;;  %v1847_v21 = vpop.f32.mrb[81].mxu0  ;;  %5379 = vmatmul.mubr.msk.bf16.gmra.mrb[76].mxu1 %vm644_vm0, %v2429_v11 }
 0x2d7   : > { %v1848_v23 = vadd.f32 %v6539_v56, %v1847_v21  ;;  %v5317_v24 = vpop.f32.mrb[82].mxu0 }
 0x2d8   : > { %v1859_v26 = vadd.f32 %v5317_v24, %v6539_v56  ;;  %v1850_v27 = vpop.f32.mrb[83].mxu0  ;;  %2139 = vadd.xlane.f32.xlu0 %v2138_v18  ;;  %v2056_v28 = vmul.f32 %v1856_v20, %v1856_v20 }
 0x2d9   : > { %v1851_v29 = vadd.f32 %v6539_v56, %v1850_v27  ;;  %2142 = vadd.xlane.f32.xlu1 %v2141_v22  ;;  %v2054_v30 = vmul.f32 %v1848_v23, %v1848_v23 }
 0x2da   : > { %v2431_v31 = vpack.c.bf16 %v1859_v26, %v1856_v20  ;;  %v2057_v32 = vmul.f32 %v1859_v26, %v1859_v26  ;;  %v2156_v33 = vsel %vm644_vm0, %v2056_v28, 0.0  ;;  %v6626_v20 = vpop.permute.xlu1 %3764 }
 0x2db   : > { %v2430_v34 = vpack.c.bf16 %v1851_v29, %v1848_v23  ;;  %v2055_v35 = vmul.f32 %v1851_v29, %v1851_v29  ;;  %v2150_v40 = vsel %vm644_vm0, %v2054_v30, 0.0  ;;  %v6629_v23 = vpop.permute.xlu0 %3881 }
 0x2dc   : > { %v2159_v36 = vsel %vm644_vm0, %v2057_v32, 0.0  ;;  %2157 = vadd.xlane.f32.xlu0 %v2156_v33  ;;  %8679 = vst [vmem:[#allocation14_spill] sm:$0xff] %v6629_v23  ;;  %v8583_v23 = vlaneseq }
 0x2dd   : > { %v5320_v39 = vpop.f32.mrb[84].mxu0  ;;  %5382 = vmatprep.mubr.msk.bf16.mxu1 %vm644_vm0, %v2430_v34  ;;  %2160 = vadd.xlane.f32.xlu1 %v2159_v36  ;;  %v2153_v44 = vsel %vm644_vm0, %v2055_v35, 0.0 }
 0x2de   : > { %v1872_v42 = vadd.f32 %v5320_v39, %v6539_v56  ;;  %v1863_v43 = vpop.f32.mrb[85].mxu0  ;;  %5383 = vmatmul.mubr.msk.bf16.gmra.mrb[80].mxu1 %vm644_vm0, %v2431_v31  ;;  %v6638_v36 = vpop.permute.xlu1 %3767 }
 0x2df   : > { %v1864_v45 = vadd.f32 %v6539_v56, %v1863_v43  ;;  %v5321_v46 = vpop.f32.mrb[86].mxu0 }
 0x2e0   : > { %v2060_v47 = vmul.f32 %v1872_v42, %v1872_v42  ;;  %v1875_v48 = vadd.f32 %v5321_v46, %v6539_v56  ;;  %v1866_v59 = vpop.f32.mrb[87].mxu0  ;;  %2151 = vadd.xlane.f32.xlu0 %v2150_v40 }
 0x2e1   : > { %v2058_v60 = vmul.f32 %v1864_v45, %v1864_v45  ;;  %v1867_v61 = vadd.f32 %v6539_v56, %v1866_v59  ;;  %2154 = vadd.xlane.f32.xlu1 %v2153_v44 }
 0x2e2   : > { %v2433_v62 = vpack.c.bf16 %v1875_v48, %v1872_v42  ;;  %v2061_v63 = vmul.f32 %v1875_v48, %v1875_v48  ;;  %v2168_v0 = vsel %vm644_vm0, %v2060_v47, 0.0  ;;  %v6641_v42 = vpop.permute.xlu0 %3884 }
 0x2e3   : > { %v2432_v2 = vpack.c.bf16 %v1867_v61, %v1864_v45  ;;  %v2059_v3 = vmul.f32 %v1867_v61, %v1867_v61  ;;  %v2162_v9 = vsel %vm644_vm0, %v2058_v60, 0.0 }
 0x2e4   : > { %v2171_v7 = vsel %vm644_vm0, %v2061_v63, 0.0  ;;  %2169 = vadd.xlane.f32.xlu0 %v2168_v0  ;;  %v6647_v0 = vpop.permute.xlu1 %3770 }
 0x2e5   : > { %v5324_v8 = vpop.f32.mrb[88].mxu0  ;;  %5386 = vmatprep.mubr.msk.bf16.mxu1 %vm644_vm0, %v2432_v2  ;;  %2172 = vadd.xlane.f32.xlu1 %v2171_v7  ;;  %v2165_v13 = vsel %vm644_vm0, %v2059_v3, 0.0 }
 0x2e6   : > { %v1888_v11 = vadd.f32 %v5324_v8, %v6539_v56  ;;  %v1879_v12 = vpop.f32.mrb[89].mxu0  ;;  %5387 = vmatmul.mubr.msk.bf16.gmra.mrb[84].mxu1 %vm644_vm0, %v2433_v62  ;;  %v6651_v7 = vpop.permute.xlu0 %3887 }
 0x2e7   : > { %v1880_v14 = vadd.f32 %v6539_v56, %v1879_v12  ;;  %v5325_v15 = vpop.f32.mrb[90].mxu0  ;;  %8680 = vst [vmem:[#allocation15_spill] sm:$0xff] %v6651_v7 }
 0x2e8   : > { %v2064_v16 = vmul.f32 %v1888_v11, %v1888_v11  ;;  %v1891_v17 = vadd.f32 %v5325_v15, %v6539_v56  ;;  %v1882_v18 = vpop.f32.mrb[91].mxu0  ;;  %2163 = vadd.xlane.f32.xlu0 %v2162_v9 }
 0x2e9   : > { %v2062_v21 = vmul.f32 %v1880_v14, %v1880_v14  ;;  %v1883_v22 = vadd.f32 %v6539_v56, %v1882_v18  ;;  %2166 = vadd.xlane.f32.xlu1 %v2165_v13 }
 0x2ea   : > { %v2435_v24 = vpack.c.bf16 %v1891_v17, %v1888_v11  ;;  %v2180_v26 = vsel %vm644_vm0, %v2064_v16, 0.0  ;;  %v2065_v27 = vmul.f32 %v1891_v17, %v1891_v17 }
 0x2eb   : > { %v2434_v28 = vpack.c.bf16 %v1883_v22, %v1880_v14  ;;  %v2063_v29 = vmul.f32 %v1883_v22, %v1883_v22  ;;  %v2174_v32 = vsel %vm644_vm0, %v2062_v21, 0.0 }
 0x2ec   : > { %2181 = vadd.xlane.f32.xlu0 %v2180_v26  ;;  %v2183_v30 = vsel %vm644_vm0, %v2065_v27, 0.0  ;;  %v6660_v26 = vpop.permute.xlu1 %3773 }
 0x2ed   : > { %v5328_v31 = vpop.f32.mrb[92].mxu0  ;;  %5390 = vmatprep.mubr.msk.bf16.mxu1 %vm644_vm0, %v2434_v28  ;;  %2184 = vadd.xlane.f32.xlu1 %v2183_v30  ;;  %v2177_v35 = vsel %vm644_vm0, %v2063_v29, 0.0  ;;  %v6662_v29 = vpop.permute.xlu0 %3890 }
 0x2ee   : > { %v1904_v33 = vadd.f32 %v5328_v31, %v6539_v56  ;;  %v1895_v34 = vpop.f32.mrb[93].mxu0  ;;  %5391 = vmatmul.mubr.msk.bf16.gmra.mrb[88].mxu1 %vm644_vm0, %v2435_v24 }
 0x2ef   : > { %v1896_v39 = vadd.f32 %v6539_v56, %v1895_v34  ;;  %v5329_v40 = vpop.f32.mrb[94].mxu0 }
 0x2f0   : > { %v2068_v43 = vmul.f32 %v1904_v33, %v1904_v33  ;;  %v1907_v44 = vadd.f32 %v5329_v40, %v6539_v56  ;;  %v1898_v45 = vpop.f32.mrb[95].mxu0  ;;  %2175 = vadd.xlane.f32.xlu0 %v2174_v32 }
 0x2f1   : > { %v2066_v46 = vmul.f32 %v1896_v39, %v1896_v39  ;;  %v1899_v47 = vadd.f32 %v6539_v56, %v1898_v45  ;;  %2178 = vadd.xlane.f32.xlu1 %v2177_v35 }
 0x2f2   : > { %v2437_v48 = vpack.c.bf16 %v1907_v44, %v1904_v33  ;;  %v2192_v59 = vsel %vm644_vm0, %v2068_v43, 0.0  ;;  %v2069_v60 = vmul.f32 %v1907_v44, %v1907_v44 }
 0x2f3   : > { %v2436_v61 = vpack.c.bf16 %v1899_v47, %v1896_v39  ;;  %v2067_v62 = vmul.f32 %v1899_v47, %v1899_v47  ;;  %v2186_v3 = vsel %vm644_vm0, %v2066_v46, 0.0  ;;  %v6672_v46 = vpop.permute.xlu1 %3776 }
 0x2f4   : > { %2193 = vadd.xlane.f32.xlu0 %v2192_v59  ;;  %v2195_v63 = vsel %vm644_vm0, %v2069_v60, 0.0  ;;  %v6675_v59 = vpop.permute.xlu0 %3893 }
 0x2f5   : > { %v5332_v2 = vpop.f32.mrb[96].mxu0  ;;  %5394 = vmatprep.mubr.msk.bf16.mxu1 %vm644_vm0, %v2436_v61  ;;  %2196 = vadd.xlane.f32.xlu1 %v2195_v63  ;;  %v2189_v11 = vsel %vm644_vm0, %v2067_v62, 0.0  ;;  %8681 = vst [vmem:[#allocation16_spill] sm:$0xff] %v6675_v59 }
 0x2f6   : > { %v1920_v8 = vadd.f32 %v5332_v2, %v6539_v56  ;;  %v1911_v9 = vpop.f32.mrb[97].mxu0  ;;  %5395 = vmatmul.mubr.msk.bf16.gmra.mrb[92].mxu1 %vm644_vm0, %v2437_v48 }
 0x2f7   : > { %v1912_v12 = vadd.f32 %v6539_v56, %v1911_v9  ;;  %v5333_v13 = vpop.f32.mrb[98].mxu0 }
 0x2f8   : > { %v2072_v14 = vmul.f32 %v1920_v8, %v1920_v8  ;;  %v1923_v15 = vadd.f32 %v5333_v13, %v6539_v56  ;;  %v1914_v16 = vpop.f32.mrb[99].mxu0  ;;  %2187 = vadd.xlane.f32.xlu0 %v2186_v3 }
 0x2f9   : > { %v2070_v17 = vmul.f32 %v1912_v12, %v1912_v12  ;;  %v1915_v18 = vadd.f32 %v6539_v56, %v1914_v16  ;;  %2190 = vadd.xlane.f32.xlu1 %v2189_v11 }
 0x2fa   : > { %v2439_v21 = vpack.c.bf16 %v1923_v15, %v1920_v8  ;;  %v2204_v22 = vsel %vm644_vm0, %v2072_v14, 0.0  ;;  %v2073_v24 = vmul.f32 %v1923_v15, %v1923_v15  ;;  %v6684_v14 = vpop.permute.xlu1 %3779 }
 0x2fb   : > { %v2438_v27 = vpack.c.bf16 %v1915_v18, %v1912_v12  ;;  %v2071_v28 = vmul.f32 %v1915_v18, %v1915_v18  ;;  %v2198_v32 = vsel %vm644_vm0, %v2070_v17, 0.0  ;;  %v6687_v17 = vpop.permute.xlu0 %3896 }
 0x2fc   : > { %2205 = vadd.xlane.f32.xlu0 %v2204_v22  ;;  %v2207_v30 = vsel %vm644_vm0, %v2073_v24, 0.0 }
 0x2fd   : > { %v5336_v31 = vpop.f32.mrb[100].mxu0  ;;  %5398 = vmatprep.mubr.msk.bf16.mxu1 %vm644_vm0, %v2438_v27  ;;  %2208 = vadd.xlane.f32.xlu1 %v2207_v30  ;;  %v2201_v35 = vsel %vm644_vm0, %v2071_v28, 0.0 }
 0x2fe   : > { %v1936_v33 = vadd.f32 %v5336_v31, %v6539_v56  ;;  %v1927_v34 = vpop.f32.mrb[101].mxu0  ;;  %5399 = vmatmul.mubr.msk.bf16.gmra.mrb[96].mxu1 %vm644_vm0, %v2439_v21 }
 0x2ff   : > { %v1928_v39 = vadd.f32 %v6539_v56, %v1927_v34  ;;  %v5337_v40 = vpop.f32.mrb[102].mxu0 }
 0x300   : > { %v2076_v43 = vmul.f32 %v1936_v33, %v1936_v33  ;;  %v1939_v44 = vadd.f32 %v5337_v40, %v6539_v56  ;;  %v1930_v45 = vpop.f32.mrb[103].mxu0  ;;  %2199 = vadd.xlane.f32.xlu0 %v2198_v32 }
 0x301   : > { %v2074_v47 = vmul.f32 %v1928_v39, %v1928_v39  ;;  %v1931_v48 = vadd.f32 %v6539_v56, %v1930_v45  ;;  %2202 = vadd.xlane.f32.xlu1 %v2201_v35  ;;  %v6693_v35 = vpop.permute.xlu1 %3785 }
 0x302   : > { %v2441_v60 = vpack.c.bf16 %v1939_v44, %v1936_v33  ;;  %v2216_v61 = vsel %vm644_vm0, %v2076_v43, 0.0  ;;  %v2077_v62 = vmul.f32 %v1939_v44, %v1939_v44  ;;  %v6697_v43 = vpop.permute.xlu0 %3899 }
 0x303   : > { %v2440_v63 = vpack.c.bf16 %v1931_v48, %v1928_v39  ;;  %v2075_v2 = vmul.f32 %v1931_v48, %v1931_v48  ;;  %v2210_v9 = vsel %vm644_vm0, %v2074_v47, 0.0  ;;  %8682 = vst [vmem:[#allocation17_spill] sm:$0xff] %v6697_v43 }
 0x304   : > { %2217 = vadd.xlane.f32.xlu0 %v2216_v61  ;;  %v2219_v3 = vsel %vm644_vm0, %v2077_v62, 0.0 }
 0x305   : > { %v5340_v8 = vpop.f32.mrb[104].mxu0  ;;  %5402 = vmatprep.mubr.msk.bf16.mxu1 %vm644_vm0, %v2440_v63  ;;  %2220 = vadd.xlane.f32.xlu1 %v2219_v3  ;;  %v2213_v13 = vsel %vm644_vm0, %v2075_v2, 0.0 }
 0x306   : > { %v1952_v11 = vadd.f32 %v5340_v8, %v6539_v56  ;;  %v1943_v12 = vpop.f32.mrb[105].mxu0  ;;  %5403 = vmatmul.mubr.msk.bf16.gmra.mrb[100].mxu1 %vm644_vm0, %v2441_v60 }
 0x307   : > { %v1944_v15 = vadd.f32 %v6539_v56, %v1943_v12  ;;  %v5341_v16 = vpop.f32.mrb[106].mxu0  ;;  %v6706_v12 = vpop.permute.xlu1 %3791 }
 0x308   : > { %v2080_v18 = vmul.f32 %v1952_v11, %v1952_v11  ;;  %v1955_v21 = vadd.f32 %v5341_v16, %v6539_v56  ;;  %v1946_v22 = vpop.f32.mrb[107].mxu0  ;;  %2211 = vadd.xlane.f32.xlu0 %v2210_v9  ;;  %v6708_v16 = vpop.permute.xlu0 %3902 }
 0x309   : > { %v2078_v24 = vmul.f32 %v1944_v15, %v1944_v15  ;;  %v1947_v27 = vadd.f32 %v6539_v56, %v1946_v22  ;;  %2214 = vadd.xlane.f32.xlu1 %v2213_v13  ;;  %8683 = vst [vmem:[#allocation18_spill] sm:$0xff] %v6708_v16 }
 0x30a   : > { %v2443_v28 = vpack.c.bf16 %v1955_v21, %v1952_v11  ;;  %v2228_v30 = vsel %vm644_vm0, %v2080_v18, 0.0  ;;  %v2081_v31 = vmul.f32 %v1955_v21, %v1955_v21 }
 0x30b   : > { %v2442_v32 = vpack.c.bf16 %v1947_v27, %v1944_v15  ;;  %v2079_v33 = vmul.f32 %v1947_v27, %v1947_v27  ;;  %v2222_v40 = vsel %vm644_vm0, %v2078_v24, 0.0 }
 0x30c   : > { %2229 = vadd.xlane.f32.xlu0 %v2228_v30  ;;  %v2231_v34 = vsel %vm644_vm0, %v2081_v31, 0.0 }
 0x30d   : > { %v5344_v39 = vpop.f32.mrb[108].mxu0  ;;  %5406 = vmatprep.mubr.msk.bf16.mxu1 %vm644_vm0, %v2442_v32  ;;  %2232 = vadd.xlane.f32.xlu1 %v2231_v34  ;;  %v2225_v47 = vsel %vm644_vm0, %v2079_v33, 0.0 }
 0x30e   : > { %v1968_v44 = vadd.f32 %v5344_v39, %v6539_v56  ;;  %v1959_v45 = vpop.f32.mrb[109].mxu0  ;;  %5407 = vmatmul.mubr.msk.bf16.gmra.mrb[104].mxu1 %vm644_vm0, %v2443_v28  ;;  %v6718_v39 = vpop.permute.xlu1 %3797 }
 0x30f   : > { %v1960_v48 = vadd.f32 %v6539_v56, %v1959_v45  ;;  %v5345_v60 = vpop.f32.mrb[110].mxu0  ;;  %v6721_v45 = vpop.permute.xlu0 %3905 }
 0x310   : > { %v2084_v61 = vmul.f32 %v1968_v44, %v1968_v44  ;;  %v1971_v62 = vadd.f32 %v5345_v60, %v6539_v56  ;;  %v1962_v63 = vpop.f32.mrb[111].mxu0  ;;  %2223 = vadd.xlane.f32.xlu0 %v2222_v40  ;;  %8684 = vst [vmem:[#allocation19_spill] sm:$0xff] %v6721_v45 }
 0x311   : > { %v2082_v2 = vmul.f32 %v1960_v48, %v1960_v48  ;;  %v1963_v3 = vadd.f32 %v6539_v56, %v1962_v63  ;;  %2226 = vadd.xlane.f32.xlu1 %v2225_v47 }
 0x312   : > { %v2445_v8 = vpack.c.bf16 %v1971_v62, %v1968_v44  ;;  %v2240_v9 = vsel %vm644_vm0, %v2084_v61, 0.0  ;;  %v2085_v11 = vmul.f32 %v1971_v62, %v1971_v62 }
 0x313   : > { %v2444_v13 = vpack.c.bf16 %v1963_v3, %v1960_v48  ;;  %v2083_v15 = vmul.f32 %v1963_v3, %v1963_v3  ;;  %v2234_v22 = vsel %vm644_vm0, %v2082_v2, 0.0 }
 0x314   : > { %2241 = vadd.xlane.f32.xlu0 %v2240_v9  ;;  %v2243_v18 = vsel %vm644_vm0, %v2085_v11, 0.0 }
 0x315   : > { %v5348_v21 = vpop.f32.mrb[112].mxu0  ;;  %5410 = vmatprep.mubr.msk.bf16.mxu1 %vm644_vm0, %v2444_v13  ;;  %2244 = vadd.xlane.f32.xlu1 %v2243_v18  ;;  %v2237_v28 = vsel %vm644_vm0, %v2083_v15, 0.0  ;;  %v6730_v13 = vpop.permute.xlu1 %3803 }
 0x316   : > { %v1984_v24 = vadd.f32 %v5348_v21, %v6539_v56  ;;  %v1975_v27 = vpop.f32.mrb[113].mxu0  ;;  %5411 = vmatmul.mubr.msk.bf16.gmra.mrb[108].mxu1 %vm644_vm0, %v2445_v8  ;;  %v6733_v21 = vpop.permute.xlu0 %3908 }
 0x317   : > { %v1976_v30 = vadd.f32 %v6539_v56, %v1975_v27  ;;  %v5349_v31 = vpop.f32.mrb[114].mxu0 }
 0x318   : > { %v2088_v32 = vmul.f32 %v1984_v24, %v1984_v24  ;;  %v1987_v33 = vadd.f32 %v5349_v31, %v6539_v56  ;;  %v1978_v34 = vpop.f32.mrb[115].mxu0  ;;  %2235 = vadd.xlane.f32.xlu0 %v2234_v22 }
 0x319   : > { %v2086_v40 = vmul.f32 %v1976_v30, %v1976_v30  ;;  %v1979_v44 = vadd.f32 %v6539_v56, %v1978_v34  ;;  %2238 = vadd.xlane.f32.xlu1 %v2237_v28 }
 0x31a   : > { %v2089_v47 = vmul.f32 %v1987_v33, %v1987_v33  ;;  %v2447_v48 = vpack.c.bf16 %v1987_v33, %v1984_v24  ;;  %v2252_v60 = vsel %vm644_vm0, %v2088_v32, 0.0 }
 0x31b   : > { %v2087_v61 = vmul.f32 %v1979_v44, %v1979_v44  ;;  %v2446_v62 = vpack.c.bf16 %v1979_v44, %v1976_v30  ;;  %v2246_v3 = vsel %vm644_vm0, %v2086_v40, 0.0 }
 0x31c   : > { %2253 = vadd.xlane.f32.xlu0 %v2252_v60  ;;  %v2255_v63 = vsel %vm644_vm0, %v2089_v47, 0.0  ;;  %v6739_v47 = vpop.permute.xlu1 %3809 }
 0x31d   : > { %v5352_v2 = vpop.f32.mrb[116].mxu0  ;;  %5414 = vmatprep.mubr.msk.bf16.mxu1 %vm644_vm0, %v2446_v62  ;;  %2256 = vadd.xlane.f32.xlu1 %v2255_v63  ;;  %v2249_v11 = vsel %vm644_vm0, %v2087_v61, 0.0  ;;  %v6743_v61 = vpop.permute.xlu0 %3911 }
 0x31e   : > { %v2000_v8 = vadd.f32 %v5352_v2, %v6539_v56  ;;  %v1991_v9 = vpop.f32.mrb[117].mxu0  ;;  %5415 = vmatmul.mubr.msk.bf16.gmra.mrb[112].mxu1 %vm644_vm0, %v2447_v48  ;;  %8685 = vst [vmem:[#allocation20_spill] sm:$0xff] %v6743_v61 }
 0x31f   : > { %v1992_v15 = vadd.f32 %v6539_v56, %v1991_v9  ;;  %v5353_v18 = vpop.f32.mrb[118].mxu0 }
 0x320   : > { %v2092_v22 = vmul.f32 %v2000_v8, %v2000_v8  ;;  %v2003_v24 = vadd.f32 %v5353_v18, %v6539_v56  ;;  %v1994_v27 = vpop.f32.mrb[119].mxu0  ;;  %2247 = vadd.xlane.f32.xlu0 %v2246_v3 }
 0x321   : > { %v2090_v28 = vmul.f32 %v1992_v15, %v1992_v15  ;;  %v1995_v30 = vadd.f32 %v6539_v56, %v1994_v27  ;;  %2250 = vadd.xlane.f32.xlu1 %v2249_v11 }
 0x322   : > { %v2093_v31 = vmul.f32 %v2003_v24, %v2003_v24  ;;  %v2449_v32 = vpack.c.bf16 %v2003_v24, %v2000_v8  ;;  %v2264_v33 = vsel %vm644_vm0, %v2092_v22, 0.0 }
 0x323   : > { %v2091_v34 = vmul.f32 %v1995_v30, %v1995_v30  ;;  %v2448_v40 = vpack.c.bf16 %v1995_v30, %v1992_v15  ;;  %v2258_v60 = vsel %vm644_vm0, %v2090_v28, 0.0  ;;  %v6752_v30 = vpop.permute.xlu1 %3815 }
 0x324   : > { %2265 = vadd.xlane.f32.xlu0 %v2264_v33  ;;  %v2267_v44 = vsel %vm644_vm0, %v2093_v31, 0.0  ;;  %v6754_v33 = vpop.permute.xlu0 %3914 }
 0x325   : > { %v5356_v48 = vpop.f32.mrb[120].mxu0  ;;  %5418 = vmatprep.mubr.msk.bf16.mxu1 %vm644_vm0, %v2448_v40  ;;  %2268 = vadd.xlane.f32.xlu1 %v2267_v44  ;;  %v2261_v2 = vsel %vm644_vm0, %v2091_v34, 0.0  ;;  %8686 = vst [vmem:[#allocation21_spill] sm:$0xff] %v6754_v33 }
 0x326   : > { %v2016_v62 = vadd.f32 %v5356_v48, %v6539_v56  ;;  %v2007_v63 = vpop.f32.mrb[121].mxu0  ;;  %5419 = vmatmul.mubr.msk.bf16.gmra.mrb[116].mxu1 %vm644_vm0, %v2449_v32 }
 0x327   : > { %v2008_v3 = vadd.f32 %v6539_v56, %v2007_v63  ;;  %v5357_v8 = vpop.f32.mrb[122].mxu0 }
 0x328   : > { %v2096_v9 = vmul.f32 %v2016_v62, %v2016_v62  ;;  %v2019_v11 = vadd.f32 %v5357_v8, %v6539_v56  ;;  %v2010_v15 = vpop.f32.mrb[123].mxu0  ;;  %2259 = vadd.xlane.f32.xlu0 %v2258_v60 }
 0x329   : > { %v2094_v18 = vmul.f32 %v2008_v3, %v2008_v3  ;;  %v2011_v22 = vadd.f32 %v6539_v56, %v2010_v15  ;;  %2262 = vadd.xlane.f32.xlu1 %v2261_v2 }
 0x32a   : > { %v2097_v24 = vmul.f32 %v2019_v11, %v2019_v11  ;;  %v2451_v27 = vpack.c.bf16 %v2019_v11, %v2016_v62  ;;  %v2276_v28 = vsel %vm644_vm0, %v2096_v9, 0.0  ;;  %v6764_v11 = vpop.permute.xlu1 %3821 }
 0x32b   : > { %v2095_v31 = vmul.f32 %v2011_v22, %v2011_v22  ;;  %v2450_v32 = vpack.c.bf16 %v2011_v22, %v2008_v3  ;;  %v2270_v44 = vsel %vm644_vm0, %v2094_v18, 0.0  ;;  %v6767_v22 = vpop.permute.xlu0 %3917 }
 0x32c   : > { %2277 = vadd.xlane.f32.xlu0 %v2276_v28  ;;  %v2279_v34 = vsel %vm644_vm0, %v2097_v24, 0.0  ;;  %8687 = vst [vmem:[#allocation22_spill] sm:$0xff] %v6767_v22 }
 0x32d   : > { %v5360_v40 = vpop.f32.mrb[124].mxu0  ;;  %5422 = vmatprep.mubr.msk.bf16.mxu1 %vm644_vm0, %v2450_v32  ;;  %2280 = vadd.xlane.f32.xlu1 %v2279_v34  ;;  %v2273_v62 = vsel %vm644_vm0, %v2095_v31, 0.0 }
 0x32e   : > { %v2032_v48 = vadd.f32 %v5360_v40, %v6539_v56  ;;  %v2023_v60 = vpop.f32.mrb[125].mxu0  ;;  %5423 = vmatmul.mubr.msk.bf16.gmra.mrb[120].mxu1 %vm644_vm0, %v2451_v27 }
 0x32f   : > { %v2024_v63 = vadd.f32 %v6539_v56, %v2023_v60  ;;  %v5361_v2 = vpop.f32.mrb[126].mxu0  ;;  %v6777_v60 = vpop.permute.xlu0 %3920 }
 0x330   : > { %v2100_v3 = vmul.f32 %v2032_v48, %v2032_v48  ;;  %v2035_v8 = vadd.f32 %v5361_v2, %v6539_v56  ;;  %v2026_v9 = vpop.f32.mrb[127].mxu0  ;;  %2271 = vadd.xlane.f32.xlu0 %v2270_v44  ;;  %v6775_v44 = vpop.permute.xlu1 %3827  ;;  %8688 = vst [vmem:[#allocation23_spill] sm:$0xff] %v6777_v60 }
 0x331   : > { %v2098_v15 = vmul.f32 %v2024_v63, %v2024_v63  ;;  %v2027_v18 = vadd.f32 %v6539_v56, %v2026_v9  ;;  %2274 = vadd.xlane.f32.xlu1 %v2273_v62 }
 0x332   : > { %v2101_v24 = vmul.f32 %v2035_v8, %v2035_v8  ;;  %v2453_v27 = vpack.c.bf16 %v2035_v8, %v2032_v48  ;;  %v2288_v28 = vsel %vm644_vm0, %v2100_v3, 0.0 }
 0x333   : > { %v2099_v31 = vmul.f32 %v2027_v18, %v2027_v18  ;;  %v2452_v32 = vpack.c.bf16 %v2027_v18, %v2024_v63  ;;  %v2282_v40 = vsel %vm644_vm0, %v2098_v15, 0.0  ;;  %v6781_v62 = vpop.permute.xlu0 %3923 }
 0x334   : > { %2289 = vadd.xlane.f32.xlu0 %v2288_v28  ;;  %v2291_v34 = vsel %vm644_vm0, %v2101_v24, 0.0  ;;  %v6779_v48 = vpop.permute.xlu1 %3833  ;;  %8689 = vst [vmem:[#allocation24_spill] sm:$0xff] %v6781_v62 }
 0x335   : > { %5426 = vmatprep.mubr.msk.bf16.mxu1 %vm644_vm0, %v2452_v32  ;;  %2292 = vadd.xlane.f32.xlu1 %v2291_v34  ;;  %v2285_v56 = vsel %vm644_vm0, %v2099_v31, 0.0 }
 0x336   : > { %5427 = vmatmul.mubr.msk.bf16.gmra.mrb[124].mxu1 %vm644_vm0, %v2453_v27 }
 0x337   : > { %v6785_v2 = vpop.permute.xlu0 %3926 }
 0x338   : > { %2283 = vadd.xlane.f32.xlu0 %v2282_v40  ;;  %v6783_v63 = vpop.permute.xlu1 %3839  ;;  %8691 = vst [vmem:[#allocation26_spill] sm:$0xff] %v6785_v2 }
 0x339   : > { %2286 = vadd.xlane.f32.xlu1 %v2285_v56  ;;  %8690 = vst [vmem:[#allocation25_spill] sm:$0xff] %v6783_v63 }
 0x33b   : > { %v6789_v8 = vpop.permute.xlu0 %3929 }
 0x33c   : > { %v6787_v3 = vpop.permute.xlu1 %3845  ;;  %8692 = vst [vmem:[#allocation27_spill] sm:$0xff] %v6789_v8 }
 0x33f   : > { %v6793_v15 = vpop.permute.xlu0 %3932 }
 0x340   : > { %v6791_v9 = vpop.permute.xlu1 %3851  ;;  %8694 = vst [vmem:[#allocation29_spill] sm:$0xff] %v6793_v15 }
 0x341   : > { %8693 = vst [vmem:[#allocation28_spill] sm:$0xff] %v6791_v9 }
 0x343   : > { %v6797_v24 = vpop.permute.xlu0 %3935 }
 0x344   : > { %v6795_v18 = vpop.permute.xlu1 %3857  ;;  %8696 = vst [vmem:[#allocation31_spill] sm:$0xff] %v6797_v24 }
 0x345   : > { %8695 = vst [vmem:[#allocation30_spill] sm:$0xff] %v6795_v18 }
 0x347   : > { %v6801_v28 = vpop.permute.xlu0 %3938 }
 0x348   : > { %v6799_v27 = vpop.permute.xlu1 %3866  ;;  %8698 = vst [vmem:[#allocation33_spill] sm:$0xff] %v6801_v28 }
 0x349   : > { %8697 = vst [vmem:[#allocation32_spill] sm:$0xff] %v6799_v27 }
 0x34b   : > { %v6805_v32 = vpop.permute.xlu0 %3941 }
 0x34c   : > { %v6803_v31 = vpop.permute.xlu1 %3869  ;;  %8700 = vst [vmem:[#allocation35_spill] sm:$0xff] %v6805_v32 }
 0x34d   : > { %8699 = vst [vmem:[#allocation34_spill] sm:$0xff] %v6803_v31 }
 0x34f   : > { %v6809_v40 = vpop.permute.xlu0 %3944 }
 0x350   : > { %v6807_v34 = vpop.permute.xlu1 %3875  ;;  %8702 = vst [vmem:[#allocation37_spill] sm:$0xff] %v6809_v40 }
 0x351   : > { %8701 = vst [vmem:[#allocation36_spill] sm:$0xff] %v6807_v34 }
 0x353   : > { %v2104_v56 = vpop.xlane.xlu0 %2103 }
 0x354   : > { %v6811_v8 = vpop.permute.xlu1 %3878  ;;  %v2294_v43 = vmax.f32 %v2104_v56, 1e-24 }
 0x357   : > { %v2107_v22 = vpop.xlane.xlu0 %2106 }
 0x358   : > { %v2110_v62 = vpop.xlane.xlu1 %2109  ;;  %v2295_v7 = vmax.f32 %v2107_v22, 1e-24 }
 0x359   : > { %v2296_v61 = vmax.f32 %v2110_v62, 1e-24  ;;  %v6828_v62 = vand.u32 127, %v8583_v23 }
 0x35b   : > { %v2122_v2 = vpop.xlane.xlu0 %2121  ;;  %5546 = vrsqrt.f32 %v2296_v61  ;;  %vm3948_vm2 = vcmp.eq.s32.totalorder %v6828_v62, %v6614_v1  ;;  %vm3949_vm3 = vcmp.eq.s32.totalorder %v6828_v62, %v6626_v20  ;;  %vm3946_vm4 = vcmp.eq.s32.totalorder %v6828_v62, %v6520_v49 }
 0x35c   : > { %v2113_v15 = vpop.xlane.xlu1 %2112  ;;  %5548 = vrsqrt.f32 %v2294_v43  ;;  %v2300_v56 = vmax.f32 %v2122_v2, 1e-24  ;;  %vm3947_vm5 = vcmp.eq.s32.totalorder %v6828_v62, %v6601_v38  ;;  %vm3950_vm6 = vcmp.eq.s32.totalorder %v6828_v62, %v6638_v36 }
 0x35d   : > { %v2297_v45 = vmax.f32 %v2113_v15, 1e-24  ;;  %vm3952_vm7 = vcmp.eq.s32.totalorder %v6828_v62, %v6660_v26  ;;  %vm3953_vm8 = vcmp.eq.s32.totalorder %v6828_v62, %v6672_v46  ;;  %vm3951_vm9 = vcmp.eq.s32.totalorder %v6828_v62, %v6647_v0 }
 0x35e   : > { %vm3956_vm10 = vcmp.eq.s32.totalorder %v6828_v62, %v6693_v35  ;;  %vm3954_vm11 = vcmp.eq.s32.totalorder %v6828_v62, %v6684_v14  ;;  %vm3957_vm12 = vcmp.eq.s32.totalorder %v6828_v62, %v6524_v51  ;;  %vm3955_vm13 = vcmp.eq.s32.totalorder %v6828_v62, %v6522_v50 }
 0x35f   : > { %v2116_v60 = vpop.xlane.xlu0 %2115  ;;  %5550 = vrsqrt.f32 %v2297_v45  ;;  %vm3960_vm14 = vcmp.eq.s32.totalorder %v6828_v62, %v6718_v39  ;;  %vm3958_vm15 = vcmp.eq.s32.totalorder %v6828_v62, %v6706_v12  ;;  %vm3976_vm0 = vcmp.eq.s32.totalorder %v6828_v62, %v6787_v3 }
 0x360   : > { %v2125_v24 = vpop.xlane.xlu1 %2124  ;;  %5552 = vrsqrt.f32 %v2295_v7  ;;  %v2298_v7 = vmax.f32 %v2116_v60, 1e-24 }
 0x361   : > { %v2301_v61 = vmax.f32 %v2125_v24, 1e-24  ;;  %5554 = vrsqrt.f32 %v2300_v56 }
 0x363   : > { %v6815_v28 = vpop.xlane.xlu0 %2133  ;;  %5556 = vrsqrt.f32 %v2301_v61 }
 0x364   : > { %v6813_v33 = vpop.xlane.xlu1 %2118  ;;  %5558 = vrsqrt.f32 %v2298_v7 }
 0x365   : > { %v5547_v41 = vpop.eup %5546  ;;  %v2299_v7 = vmax.f32 %v6813_v33, 1e-24 }
 0x366   : > { %v5549_v22 = vpop.eup %5548 }
 0x367   : > { %v6819_v40 = vpop.xlane.xlu0 %2127  ;;  %5560 = vrsqrt.f32 %v2299_v7 }
 0x368   : > { %v6817_v32 = vpop.xlane.xlu1 %2136 }
 0x369   : > { %v5551_v25 = vpop.eup %5550 }
 0x36a   : > { %v5553_v60 = vpop.eup %5552 }
 0x36b   : > { %v6823_v34 = vpop.xlane.xlu0 %2145 }
 0x36c   : > { %v6821_v59 = vpop.xlane.xlu1 %2130 }
 0x36f   : > { %v6830_v31 = vpop.xlane.xlu0 %2139 }
 0x370   : > { %v6825_v27 = vpop.xlane.xlu1 %2148  ;;  %v2306_v36 = vmax.f32 %v6830_v31, 1e-24 }
 0x373   : > { %v6846_v1 = vpop.xlane.xlu0 %2157 }
 0x374   : > { %v6841_v18 = vpop.xlane.xlu1 %2142 }
 0x377   : > { %v6865_v49 = vpop.xlane.xlu0 %2151 }
 0x37b   : > { %v6876_v63 = vpop.xlane.xlu0 %2169 }
 0x391   : > { %v5368_v15 = vpop.f32.mrb[64].mxu1 }
 0x392   : > { %v6832_v43 = vmul.f32 %v5547_v41, %v5368_v15  ;;  %v2600_v45 = vpop.f32.mrb[65].mxu1 }
 0x393   : > { %v5369_v10 = vpop.f32.mrb[66].mxu1  ;;  %v6836_v9 = vmul.f32 %v5549_v22, %v2600_v45 }
 0x394   : > { %8703 = vst [vmem:[#allocation38_spill] sm:$0xff] %v6832_v43  ;;  %v2603_v23 = vpop.f32.mrb[67].mxu1  ;;  %v2926_v2 = vsel %vm2919_vm1, %v6832_v43, -inf  ;;  %v4012_v24 = vsel %vm3948_vm2, %v6832_v43, 0.0  ;;  %v6843_v41 = vmul.f32 %v5551_v25, %v5369_v10  ;;  %v6854_v10 = vpop.xlane.xlu1 %2160  ;;  %vm3961_vm2 = vcmp.eq.s32.totalorder %v6828_v62, %v6528_v53 }
 0x395   : > { %8704 = vst [vmem:[#allocation39_spill] sm:$0xff] %v6836_v9  ;;  %2927 = vmax.xlane.f32.xlu0 %v2926_v2  ;;  %v4080_v15 = vsel %vm2919_vm1, %v4012_v24, 0.0  ;;  %v2920_v45 = vsel %vm2919_vm1, %v6836_v9, -inf  ;;  %v6856_v25 = vmul.f32 %v5553_v60, %v2603_v23  ;;  %v4010_v2 = vsel %vm3946_vm4, %v6836_v9, 0.0 }
 0x396   : > { %8705 = vst [vmem:[#allocation40_spill] sm:$0xff] %v6843_v41  ;;  %4081 = vadd.xlane.f32.xlu1 %v4080_v15  ;;  %v2929_v61 = vsel %vm2919_vm1, %v6843_v41, -inf  ;;  %v4013_v22 = vsel %vm3949_vm3, %v6843_v41, 0.0  ;;  %v2304_v60 = vmax.f32 %v6815_v28, 1e-24  ;;  %vm3959_vm3 = vcmp.eq.s32.totalorder %v6828_v62, %v6526_v52 }
 0x397   : > { %8706 = vst [vmem:[#allocation41_spill] sm:$0xff] %v6856_v25  ;;  %v4083_v15 = vsel %vm2919_vm1, %v4013_v22, 0.0  ;;  %v4011_v33 = vsel %vm3947_vm5, %v6856_v25, 0.0  ;;  %v2302_v28 = vmax.f32 %v6819_v40, 1e-24  ;;  %v2923_v7 = vsel %vm2919_vm1, %v6856_v25, -inf }
 0x398   : > { %v6871_v41 = vpop.xlane.xlu1 %2154  ;;  %v4077_v38 = vsel %vm2919_vm1, %v4011_v33, 0.0  ;;  %5562 = vrsqrt.f32 %v2304_v60  ;;  %v2305_v25 = vmax.f32 %v6817_v32, 1e-24  ;;  %vm3964_vm4 = vcmp.eq.s32.totalorder %v6828_v62, %v6739_v47 }
 0x399   : > { %v5372_v56 = vpop.f32.mrb[68].mxu1  ;;  %2921 = vmax.xlane.f32.xlu0 %v2920_v45  ;;  %v4074_v45 = vsel %vm2919_vm1, %v4010_v2, 0.0  ;;  %5564 = vrsqrt.f32 %v2302_v28  ;;  %vm3962_vm5 = vcmp.eq.s32.totalorder %v6828_v62, %v6730_v13 }
 0x39a   : > { %2930 = vmax.xlane.f32.xlu1 %v2929_v61  ;;  %v2616_v20 = vpop.f32.mrb[69].mxu1  ;;  %v5555_v61 = vpop.eup %5554 }
 0x39b   : > { %v5373_v24 = vpop.f32.mrb[70].mxu1  ;;  %v5557_v37 = vpop.eup %5556  ;;  %v6873_v58 = vmul.f32 %v5555_v61, %v5372_v56  ;;  %v2308_v61 = vmax.f32 %v6823_v34, 1e-24 }
 0x39c   : > { %v2619_v23 = vpop.f32.mrb[71].mxu1  ;;  %v5559_v22 = vpop.eup %5558 }
 0x39d   : > { %4084 = vadd.xlane.f32.xlu0 %v4083_v15  ;;  %8707 = vst [vmem:[#allocation42_spill] sm:$0xff] %v6873_v58  ;;  %v6879_v15 = vmul.f32 %v5557_v37, %v5373_v24  ;;  %v6887_v33 = vpop.xlane.xlu1 %2172  ;;  %v2938_v37 = vsel %vm2919_vm1, %v6873_v58, -inf  ;;  %v6899_v24 = vpop.xlane.xlu0 %2163  ;;  %5566 = vrsqrt.f32 %v2308_v61 }
 0x39e   : > { %4075 = vadd.xlane.f32.xlu1 %v4074_v45  ;;  %v6883_v45 = vmul.f32 %v5559_v22, %v2616_v20  ;;  %5568 = vrsqrt.f32 %v2306_v36 }
 0x39f   : > { %8708 = vst [vmem:[#allocation43_spill] sm:$0xff] %v6879_v15  ;;  %v2941_v40 = vsel %vm2919_vm1, %v6879_v15, -inf  ;;  %5570 = vrsqrt.f32 %v2305_v25 }
 0x3a0   : > { %8709 = vst [vmem:[#allocation44_spill] sm:$0xff] %v6883_v45  ;;  %v4014_v20 = vsel %vm3950_vm6, %v6883_v45, 0.0  ;;  %v2932_v34 = vsel %vm2919_vm1, %v6883_v45, -inf  ;;  %vm3985_vm6 = vcmp.eq.s32.totalorder %v6828_v62, %v6616_v6 }
 0x3a1   : > { %v5376_v2 = vpop.f32.mrb[72].mxu1  ;;  %4078 = vadd.xlane.f32.xlu0 %v4077_v38  ;;  %v5561_v38 = vpop.eup %5560 }
 0x3a2   : > { %v2632_v9 = vpop.f32.mrb[73].mxu1  ;;  %2924 = vmax.xlane.f32.xlu1 %v2923_v7  ;;  %v6906_v22 = vmul.f32 %v5561_v38, %v2619_v23  ;;  %v4086_v7 = vsel %vm2919_vm1, %v4014_v20, 0.0  ;;  %v5563_v26 = vpop.eup %5562  ;;  %v2312_v20 = vmax.f32 %v6846_v1, 1e-24  ;;  %v2310_v1 = vmax.f32 %v6865_v49, 1e-24 }
 0x3a3   : > { %v6885_v56 = vpop.f32.mrb[74].mxu1  ;;  %v6915_v45 = vmul.f32 %v5563_v26, %v5376_v2  ;;  %v6920_v38 = vpop.xlane.xlu0 %2181  ;;  %v4017_v2 = vsel %vm3953_vm8, %v6879_v15, 0.0  ;;  %vm3963_vm8 = vcmp.eq.s32.totalorder %v6828_v62, %v6530_v54 }
 0x3a4   : > { %v6890_v60 = vpop.f32.mrb[75].mxu1  ;;  %8710 = vst [vmem:[#allocation45_spill] sm:$0xff] %v6906_v22  ;;  %v2935_v32 = vsel %vm2919_vm1, %v6906_v22, -inf  ;;  %5572 = vrsqrt.f32 %v2312_v20  ;;  %v4095_v25 = vsel %vm2919_vm1, %v4017_v2, 0.0 }
 0x3a5   : > { %2939 = vmax.xlane.f32.xlu0 %v2938_v37  ;;  %v6909_v37 = vpop.xlane.xlu1 %2166  ;;  %8711 = vst [vmem:[#allocation46_spill] sm:$0xff] %v6915_v45  ;;  %v2950_v46 = vsel %vm2919_vm1, %v6915_v45, -inf }
 0x3a6   : > { %2942 = vmax.xlane.f32.xlu1 %v2941_v40  ;;  %v4016_v40 = vsel %vm3952_vm7, %v6873_v58, 0.0  ;;  %vm3965_vm7 = vcmp.eq.s32.totalorder %v6828_v62, %v6532_v4 }
 0x3a7   : > { %v4092_v23 = vsel %vm2919_vm1, %v4016_v40, 0.0  ;;  %v2303_v40 = vmax.f32 %v6821_v59, 1e-24  ;;  %v2176_v59 = vpop.xlane.xlu0 %2175 }
 0x3a9   : > { %v5380_v28 = vpop.f32.mrb[76].mxu1  ;;  %2933 = vmax.xlane.f32.xlu0 %v2932_v34  ;;  %v2185_v34 = vpop.xlane.xlu1 %2184  ;;  %5574 = vrsqrt.f32 %v2303_v40 }
 0x3aa   : > { %v2648_v43 = vpop.f32.mrb[77].mxu1  ;;  %4087 = vadd.xlane.f32.xlu1 %v4086_v7  ;;  %v5565_v7 = vpop.eup %5564  ;;  %5576 = vrsqrt.f32 %v2310_v1 }
 0x3ab   : > { %v6913_v61 = vpop.f32.mrb[78].mxu1  ;;  %v6929_v26 = vmul.f32 %v5565_v7, %v2632_v9  ;;  %v4015_v9 = vsel %vm3951_vm9, %v6906_v22, 0.0  ;;  %v2321_v7 = vmax.f32 %v2185_v34, 1e-24  ;;  %v4020_v34 = vsel %vm3956_vm10, %v6915_v45, 0.0 }
 0x3ac   : > { %v6917_v31 = vpop.f32.mrb[79].mxu1  ;;  %vm3989_vm9 = vcmp.eq.s32.totalorder %v6828_v62, %v6641_v42  ;;  %vm3968_vm10 = vcmp.eq.s32.totalorder %v6828_v62, %v6764_v11 }
 0x3ad   : > { %4093 = vadd.xlane.f32.xlu0 %v4092_v23  ;;  %8712 = vst [vmem:[#allocation47_spill] sm:$0xff] %v6929_v26  ;;  %v5567_v23 = vpop.eup %5566  ;;  %v6941_v5 = vpop.xlane.xlu1 %2178  ;;  %v2944_v20 = vsel %vm2919_vm1, %v6929_v26, -inf }
 0x3ae   : > { %2936 = vmax.xlane.f32.xlu1 %v2935_v32  ;;  %v2316_v32 = vmax.f32 %v6876_v63, 1e-24  ;;  %v6943_v0 = vmul.f32 %v5567_v23, %v5380_v28  ;;  %v4089_v63 = vsel %vm2919_vm1, %v4015_v9, 0.0  ;;  %v5569_v2 = vpop.eup %5568  ;;  %v2314_v28 = vmax.f32 %v6899_v24, 1e-24  ;;  %v2194_v23 = vpop.xlane.xlu0 %2193 }
 0x3af   : > { %v5571_v40 = vpop.eup %5570 }
 0x3b0   : > { %8713 = vst [vmem:[#allocation48_spill] sm:$0xff] %v6943_v0  ;;  %5578 = vrsqrt.f32 %v2316_v32  ;;  %v6959_v35 = vmul.f32 %v5571_v40, %v6885_v56  ;;  %v4104_v32 = vsel %vm2919_vm1, %v4020_v34, 0.0  ;;  %v5573_v24 = vpop.eup %5572 }
 0x3b1   : > { %v5384_v36 = vpop.f32.mrb[80].mxu1  ;;  %2951 = vmax.xlane.f32.xlu0 %v2950_v46  ;;  %5580 = vrsqrt.f32 %v2321_v7  ;;  %v6954_v46 = vmul.f32 %v5569_v2, %v2648_v43  ;;  %v6962_v9 = vpop.xlane.xlu1 %2196  ;;  %v2320_v43 = vmax.f32 %v6920_v38, 1e-24  ;;  %v4018_v38 = vsel %vm3954_vm11, %v6929_v26, 0.0 }
 0x3b2   : > { %v2664_v15 = vpop.f32.mrb[81].mxu1  ;;  %4096 = vadd.xlane.f32.xlu1 %v4095_v25  ;;  %v2962_v25 = vsel %vm2919_vm1, %v6943_v0, -inf  ;;  %8714 = vst [vmem:[#allocation49_spill] sm:$0xff] %v6959_v35  ;;  %8715 = vst [vmem:[#allocation50_spill] sm:$0xff] %v6962_v9  ;;  %5582 = vrsqrt.f32 %v2314_v28  ;;  %v2953_v34 = vsel %vm2919_vm1, %v6959_v35, -inf  ;;  %v2188_v28 = vpop.xlane.xlu0 %2187  ;;  %vm3987_vm11 = vcmp.eq.s32.totalorder %v6828_v62, %v6811_v8 }
 0x3b3   : > { %v6939_v58 = vpop.f32.mrb[82].mxu1  ;;  %v2956_v56 = vsel %vm2919_vm1, %v6954_v46, -inf  ;;  %v5575_v40 = vpop.eup %5574  ;;  %5584 = vrsqrt.f32 %v2320_v43  ;;  %v2309_v26 = vmax.f32 %v6825_v27, 1e-24 }
 0x3b4   : > { %v6945_v49 = vpop.f32.mrb[83].mxu1  ;;  %v6985_v45 = vmul.f32 %v5575_v40, %v6890_v60 }
 0x3b5   : > { %2945 = vmax.xlane.f32.xlu0 %v2944_v20 }
 0x3b6   : > { %4090 = vadd.xlane.f32.xlu1 %v4089_v63  ;;  %v6967_v63 = vmul.f32 %v5573_v24, %v5384_v36  ;;  %v2318_v36 = vmax.f32 %v2176_v59, 1e-24  ;;  %8718 = vst [vmem:[#allocation53_spill] sm:$0xff] %v6985_v45  ;;  %v2324_v59 = vmax.f32 %v2194_v23, 1e-24  ;;  %v2947_v23 = vsel %vm2919_vm1, %v6985_v45, -inf }
 0x3b8   : > { %8716 = vst [vmem:[#allocation51_spill] sm:$0xff] %v6967_v63  ;;  %v2974_v14 = vsel %vm2919_vm1, %v6967_v63, -inf  ;;  %5586 = vrsqrt.f32 %v2318_v36 }
 0x3b9   : > { %v5388_v1 = vpop.f32.mrb[84].mxu1  ;;  %2963 = vmax.xlane.f32.xlu0 %v2962_v25  ;;  %v5577_v25 = vpop.eup %5576  ;;  %5588 = vrsqrt.f32 %v2309_v26  ;;  %v2307_v26 = vmax.f32 %v6841_v18, 1e-24 }
 0x3ba   : > { %v2680_v20 = vpop.f32.mrb[85].mxu1  ;;  %4105 = vadd.xlane.f32.xlu1 %v4104_v32  ;;  %v6978_v32 = vpop.xlane.xlu1 %2190  ;;  %v6980_v22 = vmul.f32 %v5577_v25, %v2664_v15  ;;  %5590 = vrsqrt.f32 %v2324_v59 }
 0x3bb   : > { %v6965_v7 = vpop.f32.mrb[86].mxu1  ;;  %8717 = vst [vmem:[#allocation52_spill] sm:$0xff] %v6978_v32  ;;  %v5579_v24 = vpop.eup %5578 }
 0x3bc   : > { %v6969_v2 = vpop.f32.mrb[87].mxu1  ;;  %v6989_v15 = vmul.f32 %v5579_v24, %v5388_v1  ;;  %v2206_v25 = vpop.xlane.xlu0 %2205  ;;  %v2968_v60 = vsel %vm2919_vm1, %v6980_v22, -inf  ;;  %v4021_v1 = vsel %vm3957_vm12, %v6959_v35, 0.0  ;;  %vm3966_vm12 = vcmp.eq.s32.totalorder %v6828_v62, %v6752_v30 }
 0x3bd   : > { %2957 = vmax.xlane.f32.xlu0 %v2956_v56  ;;  %v5581_v56 = vpop.eup %5580 }
 0x3be   : > { %2954 = vmax.xlane.f32.xlu1 %v2953_v34  ;;  %v4098_v34 = vsel %vm2919_vm1, %v4018_v38, 0.0  ;;  %v5583_v40 = vpop.eup %5582  ;;  %v6999_v27 = vpop.xlane.xlu1 %2208  ;;  %v2322_v38 = vmax.f32 %v2188_v28, 1e-24  ;;  %v4019_v28 = vsel %vm3955_vm13, %v6985_v45, 0.0  ;;  %v4032_v11 = vsel %vm3968_vm10, %v6989_v15, 0.0 }
 0x3bf   : > { %v7004_v36 = vmul.f32 %v5583_v40, %v2680_v20  ;;  %v5585_v24 = vpop.eup %5584  ;;  %v4101_v18 = vsel %vm2919_vm1, %v4019_v28, 0.0  ;;  %vm3969_vm13 = vcmp.eq.s32.totalorder %v6828_v62, %v6541_v57 }
 0x3c0   : > { %5592 = vrsqrt.f32 %v2322_v38  ;;  %v2328_v38 = vmax.f32 %v2206_v25, 1e-24 }
 0x3c1   : > { %v5392_v19 = vpop.f32.mrb[88].mxu1  ;;  %2975 = vmax.xlane.f32.xlu0 %v2974_v14  ;;  %v4107_v14 = vsel %vm2919_vm1, %v4021_v1, 0.0  ;;  %v2980_v50 = vsel %vm2919_vm1, %v7004_v36, -inf  ;;  %5594 = vrsqrt.f32 %v2307_v26 }
 0x3c2   : > { %v2696_v43 = vpop.f32.mrb[89].mxu1  ;;  %4099 = vadd.xlane.f32.xlu1 %v4098_v34  ;;  %v7013_v20 = vpop.xlane.xlu1 %2202  ;;  %5596 = vrsqrt.f32 %v2328_v38 }
 0x3c3   : > { %v5393_v32 = vpop.f32.mrb[90].mxu1 }
 0x3c4   : > { %v6991_v16 = vmul.f32 %v5581_v56, %v5393_v32  ;;  %v6993_v9 = vpop.f32.mrb[91].mxu1  ;;  %v2986_v32 = vsel %vm2919_vm1, %v6989_v15, -inf  ;;  %v2200_v56 = vpop.xlane.xlu0 %2199 }
 0x3c5   : > { %2969 = vmax.xlane.f32.xlu0 %v2968_v60  ;;  %v7017_v60 = vmul.f32 %v5585_v24, %v5392_v19  ;;  %v4024_v19 = vsel %vm3960_vm14, %v6943_v0, 0.0  ;;  %v2326_v25 = vmax.f32 %v2200_v56, 1e-24  ;;  %v4022_v56 = vsel %vm3958_vm15, %v6954_v46, 0.0 }
 0x3c6   : > { %8719 = vst [vmem:[#allocation54_spill] sm:$0xff] %v6991_v16  ;;  %2948 = vmax.xlane.f32.xlu1 %v2947_v23  ;;  %v5587_v23 = vpop.eup %5586  ;;  %v2221_v39 = vpop.xlane.xlu1 %2220  ;;  %v4116_v26 = vsel %vm2919_vm1, %v4024_v19, 0.0  ;;  %vm3993_vm14 = vcmp.eq.s32.totalorder %v6828_v62, %v6687_v17  ;;  %vm3991_vm15 = vcmp.eq.s32.totalorder %v6828_v62, %v6662_v29 }
 0x3c7   : > { %v2998_v1 = vsel %vm2919_vm1, %v7017_v60, -inf  ;;  %v7029_v24 = vmul.f32 %v5587_v23, %v2696_v43  ;;  %5598 = vrsqrt.f32 %v2326_v25 }
 0x3c9   : > { %v5396_v51 = vpop.f32.mrb[92].mxu1  ;;  %2987 = vmax.xlane.f32.xlu0 %v2986_v32  ;;  %v5589_v32 = vpop.eup %5588 }
 0x3ca   : > { %v2712_v34 = vpop.f32.mrb[93].mxu1  ;;  %4108 = vadd.xlane.f32.xlu1 %v4107_v14  ;;  %v2218_v14 = vpop.xlane.xlu0 %2217  ;;  %v7032_v35 = vmul.f32 %v5589_v32, %v6913_v61 }
 0x3cb   : > { %v7015_v59 = vpop.f32.mrb[94].mxu1  ;;  %v5591_v45 = vpop.eup %5590 }
 0x3cc   : > { %v7019_v40 = vpop.f32.mrb[95].mxu1  ;;  %8720 = vst [vmem:[#allocation55_spill] sm:$0xff] %v7032_v35  ;;  %v7041_v23 = vmul.f32 %v5591_v45, %v5396_v51  ;;  %v5593_v61 = vpop.eup %5592  ;;  %v2332_v45 = vmax.f32 %v2218_v14, 1e-24 }
 0x3cd   : > { %2981 = vmax.xlane.f32.xlu0 %v2980_v50  ;;  %v7052_v51 = vpop.xlane.xlu1 %2214  ;;  %v5595_v32 = vpop.eup %5594 }
 0x3ce   : > { %4102 = vadd.xlane.f32.xlu1 %v4101_v18  ;;  %v2992_v18 = vsel %vm2919_vm1, %v7029_v24, -inf  ;;  %8722 = vst [vmem:[#allocation57_spill] sm:$0xff] %v7041_v23  ;;  %v2212_v19 = vpop.xlane.xlu0 %2211  ;;  %v3010_v38 = vsel %vm2919_vm1, %v7041_v23, -inf  ;;  %8724 = vst [vmem:[#allocation59_spill] sm:$0xff] %v7052_v51  ;;  %v7057_v12 = vmul.f32 %v5595_v32, %v6917_v31  ;;  %5600 = vrsqrt.f32 %v2332_v45 }
 0x3cf   : > { %v2330_v25 = vmax.f32 %v2212_v19, 1e-24  ;;  %v2333_v31 = vmax.f32 %v2221_v39, 1e-24  ;;  %v4040_v19 = vsel %vm3976_vm0, %v7041_v23, 0.0  ;;  %vm3967_vm0 = vcmp.eq.s32.totalorder %v6828_v62, %v6534_v55 }
 0x3d0   : > { %8725 = vst [vmem:[#allocation60_spill] sm:$0xff] %v7057_v12  ;;  %v4164_v39 = vsel %vm2919_vm1, %v4040_v19, 0.0 }
 0x3d1   : > { %v5400_v50 = vpop.f32.mrb[96].mxu1  ;;  %2999 = vmax.xlane.f32.xlu0 %v2998_v1  ;;  %v2965_v1 = vsel %vm2919_vm1, %v7032_v35, -inf }
 0x3d2   : > { %v7035_v28 = vpop.f32.mrb[97].mxu1  ;;  %4117 = vadd.xlane.f32.xlu1 %v4116_v26  ;;  %v7054_v26 = vmul.f32 %v5593_v61, %v2712_v34  ;;  %v2230_v34 = vpop.xlane.xlu0 %2229 }
 0x3d3   : > { %v7039_v43 = vpop.f32.mrb[98].mxu1 }
 0x3d4   : > { %8721 = vst [vmem:[#allocation56_spill] sm:$0xff] %v7039_v43  ;;  %v7043_v0 = vpop.f32.mrb[99].mxu1  ;;  %v3004_v14 = vsel %vm2919_vm1, %v7054_v26, -inf }
 0x3d5   : > { %8723 = vst [vmem:[#allocation58_spill] sm:$0xff] %v7043_v0  ;;  %2993 = vmax.xlane.f32.xlu0 %v2992_v18  ;;  %v4110_v0 = vsel %vm2919_vm1, %v4022_v56, 0.0  ;;  %v4025_v56 = vsel %vm3961_vm2, %v7032_v35, 0.0  ;;  %vm3972_vm2 = vcmp.eq.s32.totalorder %v6828_v62, %v6779_v48 }
 0x3d6   : > { %2966 = vmax.xlane.f32.xlu1 %v2965_v1  ;;  %v2313_v1 = vmax.f32 %v6854_v10, 1e-24  ;;  %v2233_v10 = vpop.xlane.xlu1 %2232  ;;  %v4119_v32 = vsel %vm2919_vm1, %v4025_v56, 0.0 }
 0x3d8   : > { %5602 = vrsqrt.f32 %v2313_v1  ;;  %v2311_v1 = vmax.f32 %v6871_v41, 1e-24 }
 0x3d9   : > { %v5404_v18 = vpop.f32.mrb[100].mxu1  ;;  %3011 = vmax.xlane.f32.xlu0 %v3010_v38  ;;  %v5597_v38 = vpop.eup %5596  ;;  %5604 = vrsqrt.f32 %v2330_v25  ;;  %v4023_v25 = vsel %vm3959_vm3, %v7057_v12, 0.0  ;;  %vm3997_vm3 = vcmp.eq.s32.totalorder %v6828_v62, %v6733_v21 }
 0x3da   : > { %v7061_v43 = vpop.f32.mrb[101].mxu1  ;;  %4111 = vadd.xlane.f32.xlu1 %v4110_v0  ;;  %v2959_v0 = vsel %vm2919_vm1, %v7057_v12, -inf  ;;  %5606 = vrsqrt.f32 %v2333_v31  ;;  %v7077_v3 = vmul.f32 %v5597_v38, %v5400_v50  ;;  %v5599_v45 = vpop.eup %5598  ;;  %v2336_v31 = vmax.f32 %v2230_v34, 1e-24 }
 0x3db   : > { %v7065_v51 = vpop.f32.mrb[102].mxu1  ;;  %v2227_v38 = vpop.xlane.xlu1 %2226  ;;  %v7094_v52 = vmul.f32 %v5599_v45, %v7035_v28  ;;  %v4113_v41 = vsel %vm2919_vm1, %v4023_v25, 0.0  ;;  %5608 = vrsqrt.f32 %v2311_v1  ;;  %v2337_v28 = vmax.f32 %v2233_v10, 1e-24 }
 0x3dc   : > { %v7069_v61 = vpop.f32.mrb[103].mxu1  ;;  %v3022_v50 = vsel %vm2919_vm1, %v7077_v3, -inf  ;;  %v5601_v56 = vpop.eup %5600  ;;  %5610 = vrsqrt.f32 %v2336_v31 }
 0x3dd   : > { %8726 = vst [vmem:[#allocation61_spill] sm:$0xff] %v7069_v61  ;;  %3005 = vmax.xlane.f32.xlu0 %v3004_v14  ;;  %v2224_v14 = vpop.xlane.xlu0 %2223  ;;  %v3016_v34 = vsel %vm2919_vm1, %v7094_v52, -inf  ;;  %v7104_v45 = vmul.f32 %v5601_v56, %v5404_v18  ;;  %5612 = vrsqrt.f32 %v2337_v28 }
 0x3de   : > { %2960 = vmax.xlane.f32.xlu1 %v2959_v0  ;;  %v2334_v47 = vmax.f32 %v2224_v14, 1e-24 }
 0x3df   : > { %v3034_v18 = vsel %vm2919_vm1, %v7104_v45, -inf }
 0x3e0   : > { %5614 = vrsqrt.f32 %v2334_v47 }
 0x3e1   : > { %v7082_v53 = vpop.f32.mrb[104].mxu1  ;;  %4165 = vadd.xlane.f32.xlu0 %v4164_v39  ;;  %v2242_v35 = vpop.xlane.xlu0 %2241 }
 0x3e2   : > { %v7086_v0 = vpop.f32.mrb[105].mxu1  ;;  %4120 = vadd.xlane.f32.xlu1 %v4119_v32  ;;  %v4028_v32 = vsel %vm3964_vm4, %v6967_v63, 0.0  ;;  %v5603_v12 = vpop.eup %5602  ;;  %vm3970_vm4 = vcmp.eq.s32.totalorder %v6828_v62, %v6775_v44 }
 0x3e3   : > { %v7091_v19 = vpop.f32.mrb[106].mxu1  ;;  %v5605_v23 = vpop.eup %5604  ;;  %v7107_v61 = vmul.f32 %v5603_v12, %v6939_v58  ;;  %v4128_v25 = vsel %vm2919_vm1, %v4028_v32, 0.0  ;;  %v2335_v58 = vmax.f32 %v2227_v38, 1e-24  ;;  %v4034_v44 = vsel %vm3970_vm4, %v7029_v24, 0.0 }
 0x3e4   : > { %v7096_v39 = vpop.f32.mrb[107].mxu1  ;;  %v7121_v12 = vmul.f32 %v5605_v23, %v7061_v43  ;;  %v4026_v43 = vsel %vm3962_vm5, %v6980_v22, 0.0 }
 0x3e5   : > { %3023 = vmax.xlane.f32.xlu0 %v3022_v50  ;;  %8727 = vst [vmem:[#allocation62_spill] sm:$0xff] %v7107_v61  ;;  %v7109_v50 = vpop.xlane.xlu1 %2244  ;;  %v2977_v56 = vsel %vm2919_vm1, %v7107_v61, -inf  ;;  %5616 = vrsqrt.f32 %v2335_v58  ;;  %v4122_v47 = vsel %vm2919_vm1, %v4026_v43, 0.0  ;;  %v2340_v43 = vmax.f32 %v2242_v35, 1e-24 }
 0x3e6   : > { %4114 = vadd.xlane.f32.xlu1 %v4113_v41  ;;  %v5607_v41 = vpop.eup %5606  ;;  %8728 = vst [vmem:[#allocation63_spill] sm:$0xff] %v7121_v12  ;;  %v3028_v38 = vsel %vm2919_vm1, %v7121_v12, -inf  ;;  %v2341_v4 = vmax.f32 %v7109_v50, 1e-24 }
 0x3e7   : > { %v7128_v31 = vmul.f32 %v5607_v41, %v7065_v51  ;;  %v5609_v32 = vpop.eup %5608  ;;  %v2317_v41 = vmax.f32 %v6887_v33, 1e-24 }
 0x3e8   : > { %v5611_v13 = vpop.eup %5610  ;;  %v7138_v51 = vmul.f32 %v5609_v32, %v6945_v49 }
 0x3e9   : > { %v7111_v1 = vpop.f32.mrb[108].mxu1  ;;  %3017 = vmax.xlane.f32.xlu0 %v3016_v34  ;;  %8729 = vst [vmem:[#allocation64_spill] sm:$0xff] %v7128_v31  ;;  %v2236_v34 = vpop.xlane.xlu0 %2235  ;;  %v7150_v6 = vmul.f32 %v5611_v13, %v7082_v53  ;;  %5618 = vrsqrt.f32 %v2317_v41  ;;  %v4029_v13 = vsel %vm3965_vm7, %v7107_v61, 0.0 }
 0x3ea   : > { %v7114_v63 = vpop.f32.mrb[109].mxu1  ;;  %4129 = vadd.xlane.f32.xlu1 %v4128_v25  ;;  %v2239_v23 = vpop.xlane.xlu1 %2238  ;;  %8730 = vst [vmem:[#allocation65_spill] sm:$0xff] %v7138_v51  ;;  %v4049_v25 = vsel %vm3985_vm6, %v7128_v31, 0.0  ;;  %v2971_v33 = vsel %vm2919_vm1, %v7138_v51, -inf  ;;  %5620 = vrsqrt.f32 %v2340_v43  ;;  %v2338_v35 = vmax.f32 %v2236_v34, 1e-24 }
 0x3eb   : > { %v7118_v10 = vpop.f32.mrb[110].mxu1  ;;  %8731 = vst [vmem:[#allocation66_spill] sm:$0xff] %v7150_v6  ;;  %v3046_v53 = vsel %vm2919_vm1, %v7150_v6, -inf  ;;  %v4131_v41 = vsel %vm2919_vm1, %v4029_v13, 0.0  ;;  %v2315_v6 = vmax.f32 %v6909_v37, 1e-24  ;;  %5622 = vrsqrt.f32 %v2341_v4 }
 0x3ec   : > { %v7123_v14 = vpop.f32.mrb[111].mxu1  ;;  %v4027_v50 = vsel %vm3963_vm8, %v7138_v51, 0.0  ;;  %v2339_v37 = vmax.f32 %v2239_v23, 1e-24  ;;  %5624 = vrsqrt.f32 %v2338_v35 }
 0x3ed   : > { %3035 = vmax.xlane.f32.xlu0 %v3034_v18  ;;  %v7152_v58 = vpop.xlane.xlu0 %2253  ;;  %v4125_v42 = vsel %vm2919_vm1, %v4027_v50, 0.0  ;;  %5626 = vrsqrt.f32 %v2315_v6  ;;  %v4140_v6 = vsel %vm2919_vm1, %v4032_v11, 0.0 }
 0x3ee   : > { %2978 = vmax.xlane.f32.xlu1 %v2977_v56  ;;  %v7159_v32 = vpop.xlane.xlu1 %2256  ;;  %5628 = vrsqrt.f32 %v2339_v37  ;;  %v2344_v37 = vmax.f32 %v7152_v58, 1e-24  ;;  %v4030_v58 = vsel %vm3966_vm12, %v7004_v36, 0.0 }
 0x3ef   : > { %v2345_v30 = vmax.f32 %v7159_v32, 1e-24 }
 0x3f0   : > { %5630 = vrsqrt.f32 %v2344_v37 }
 0x3f1   : > { %v7140_v28 = vpop.f32.mrb[112].mxu1  ;;  %3029 = vmax.xlane.f32.xlu0 %v3028_v38  ;;  %v4191_v38 = vsel %vm2919_vm1, %v4049_v25, 0.0  ;;  %v7179_v31 = vpop.xlane.xlu0 %2247  ;;  %5632 = vrsqrt.f32 %v2345_v30  ;;  %v2319_v30 = vmax.f32 %v6941_v5, 1e-24 }
 0x3f2   : > { %v7145_v18 = vpop.f32.mrb[113].mxu1  ;;  %4123 = vadd.xlane.f32.xlu1 %v4122_v47  ;;  %v5613_v47 = vpop.eup %5612 }
 0x3f3   : > { %v7147_v56 = vpop.f32.mrb[114].mxu1  ;;  %v5615_v12 = vpop.eup %5614  ;;  %v7170_v25 = vmul.f32 %v5613_v47, %v7091_v19 }
 0x3f4   : > { %v7154_v49 = vpop.f32.mrb[115].mxu1  ;;  %v7177_v61 = vmul.f32 %v5615_v12, %v7086_v0  ;;  %v7186_v19 = vpop.xlane.xlu1 %2250 }
 0x3f5   : > { %4192 = vadd.xlane.f32.xlu0 %v4191_v38  ;;  %v4053_v47 = vsel %vm3989_vm9, %v7170_v25, 0.0  ;;  %v7204_v23 = vpop.xlane.xlu0 %2265 }
 0x3f6   : > { %2972 = vmax.xlane.f32.xlu1 %v2971_v33  ;;  %v5617_v33 = vpop.eup %5616  ;;  %v3040_v12 = vsel %vm2919_vm1, %v7177_v61, -inf  ;;  %v4203_v13 = vsel %vm2919_vm1, %v4053_v47, 0.0  ;;  %v2348_v55 = vmax.f32 %v7204_v23, 1e-24 }
 0x3f7   : > { %v7197_v43 = vmul.f32 %v5617_v33, %v7096_v39 }
 0x3f8   : > { %v7210_v4 = vpop.xlane.xlu1 %2268 }
 0x3f9   : > { %v7172_v38 = vpop.f32.mrb[116].mxu1  ;;  %3047 = vmax.xlane.f32.xlu0 %v3046_v53  ;;  %v5619_v53 = vpop.eup %5618 }
 0x3fa   : > { %v7181_v54 = vpop.f32.mrb[117].mxu1  ;;  %4132 = vadd.xlane.f32.xlu1 %v4131_v41  ;;  %v7208_v39 = vmul.f32 %v5619_v53, %v6965_v7  ;;  %v4051_v41 = vsel %vm3987_vm11, %v7197_v43, 0.0  ;;  %v5621_v8 = vpop.eup %5620 }
 0x3fb   : > { %v7188_v34 = vpop.f32.mrb[118].mxu1  ;;  %v4197_v7 = vsel %vm2919_vm1, %v4051_v41, 0.0  ;;  %v5623_v47 = vpop.eup %5622  ;;  %v7229_v11 = vmul.f32 %v5621_v8, %v7111_v1  ;;  %v2342_v1 = vmax.f32 %v7179_v31, 1e-24 }
 0x3fc   : > { %v7192_v0 = vpop.f32.mrb[119].mxu1  ;;  %v7231_v53 = vpop.xlane.xlu0 %2259  ;;  %v7244_v8 = vmul.f32 %v5623_v47, %v7118_v10  ;;  %v2343_v10 = vmax.f32 %v7186_v19, 1e-24  ;;  %v4033_v19 = vsel %vm3969_vm13, %v7208_v39, 0.0 }
 0x3fd   : > { %3041 = vmax.xlane.f32.xlu0 %v3040_v12  ;;  %5634 = vrsqrt.f32 %v2342_v1 }
 0x3fe   : > { %4126 = vadd.xlane.f32.xlu1 %v4125_v42  ;;  %v2989_v42 = vsel %vm2919_vm1, %v7208_v39, -inf  ;;  %5636 = vrsqrt.f32 %v2343_v10 }
 0x3ff   : > { %5638 = vrsqrt.f32 %v2319_v30 }
 0x400   : > { %v7261_v31 = vpop.xlane.xlu0 %2277  ;;  %5640 = vrsqrt.f32 %v2348_v55  ;;  %v8734_v55 = vld [vmem:[#allocation50_spill] sm:$0xff] }
 0x401   : > { %v7212_v35 = vpop.f32.mrb[120].mxu1  ;;  %4204 = vadd.xlane.f32.xlu0 %v4203_v13  ;;  %v5625_v13 = vpop.eup %5624  ;;  %v2325_v21 = vmax.f32 %v8734_v55, 1e-24 }
 0x402   : > { %v7216_v33 = vpop.f32.mrb[121].mxu1  ;;  %4141 = vadd.xlane.f32.xlu1 %v4140_v6  ;;  %v7234_v6 = vpop.xlane.xlu1 %2262  ;;  %v7250_v37 = vmul.f32 %v5625_v13, %v7114_v63 }
 0x403   : > { %v7218_v50 = vpop.f32.mrb[122].mxu1  ;;  %v5627_v41 = vpop.eup %5626 }
 0x404   : > { %8732 = vst [vmem:[#allocation67_spill] sm:$0xff] %v7218_v50  ;;  %v7221_v12 = vpop.f32.mrb[123].mxu1  ;;  %v7240_v51 = vmul.f32 %v5627_v41, %v6969_v2  ;;  %v5629_v50 = vpop.eup %5628  ;;  %v3052_v63 = vsel %vm2919_vm1, %v7250_v37, -inf }
 0x405   : > { %8733 = vst [vmem:[#allocation68_spill] sm:$0xff] %v7221_v12  ;;  %4198 = vadd.xlane.f32.xlu0 %v4197_v7  ;;  %v3058_v7 = vsel %vm2919_vm1, %v7229_v11, -inf  ;;  %v4134_v12 = vsel %vm2919_vm1, %v4030_v58, 0.0  ;;  %v4057_v58 = vsel %vm3993_vm14, %v7244_v8, 0.0  ;;  %v5631_v41 = vpop.eup %5630 }
 0x406   : > { %2990 = vmax.xlane.f32.xlu1 %v2989_v42  ;;  %v7270_v57 = vpop.xlane.xlu1 %2280  ;;  %v2983_v17 = vsel %vm2919_vm1, %v7240_v51, -inf  ;;  %v4215_v13 = vsel %vm2919_vm1, %v4057_v58, 0.0  ;;  %v4031_v1 = vsel %vm3967_vm0, %v7240_v51, 0.0  ;;  %v7293_v5 = vmul.f32 %v5631_v41, %v7140_v28 }
 0x407   : > { %v4137_v10 = vsel %vm2919_vm1, %v4031_v1, 0.0  ;;  %v4036_v58 = vsel %vm3972_vm2, %v7017_v60, 0.0 }
 0x408   : > { %v3070_v48 = vsel %vm2919_vm1, %v7293_v5, -inf  ;;  %v4152_v28 = vsel %vm2919_vm1, %v4036_v58, 0.0 }
 0x409   : > { %v7246_v42 = vpop.f32.mrb[124].mxu1  ;;  %3059 = vmax.xlane.f32.xlu0 %v3058_v7  ;;  %v2272_v7 = vpop.xlane.xlu0 %2271 }
 0x40a   : > { %v7252_v32 = vpop.f32.mrb[125].mxu1  ;;  %4135 = vadd.xlane.f32.xlu1 %v4134_v12  ;;  %v7268_v12 = vmul.f32 %v5629_v50, %v7123_v14  ;;  %v4143_v14 = vsel %vm2919_vm1, %v4033_v19, 0.0 }
 0x40b   : > { %v7256_v2 = vpop.f32.mrb[126].mxu1 }
 0x40c   : > { %v7263_v47 = vpop.f32.mrb[127].mxu1  ;;  %v4055_v50 = vsel %vm3991_vm15, %v7268_v12, 0.0 }
 0x40d   : > { %3053 = vmax.xlane.f32.xlu0 %v3052_v63  ;;  %v7285_v63 = vpop.xlane.xlu1 %2274  ;;  %v4209_v29 = vsel %vm2919_vm1, %v4055_v50, 0.0 }
 0x40e   : > { %2984 = vmax.xlane.f32.xlu1 %v2983_v17  ;;  %v5633_v17 = vpop.eup %5632 }
 0x40f   : > { %v5635_v19 = vpop.eup %5634  ;;  %v7300_v23 = vmul.f32 %v5633_v17, %v7147_v56 }
 0x410   : > { %v5637_v41 = vpop.eup %5636  ;;  %v7306_v30 = vmul.f32 %v5635_v19, %v7145_v18  ;;  %v3001_v18 = vsel %vm2919_vm1, %v6991_v16, -inf  ;;  %v8735_v19 = vld [vmem:[#allocation18_spill] sm:$0xff] }
 0x411   : > { %4216 = vadd.xlane.f32.xlu0 %v4215_v13  ;;  %v2346_v13 = vmax.f32 %v7231_v53, 1e-24  ;;  %v7302_v50 = vpop.xlane.xlu1 %2292  ;;  %v2352_v53 = vmax.f32 %v7261_v31, 1e-24  ;;  %v7316_v1 = vmul.f32 %v5637_v41, %v7154_v49  ;;  %v5639_v58 = vpop.eup %5638  ;;  %vm3995_vm5 = vcmp.eq.s32.totalorder %v6828_v62, %v8735_v19 }
 0x412   : > { %4144 = vadd.xlane.f32.xlu1 %v4143_v14  ;;  %v2290_v14 = vpop.xlane.xlu0 %2289  ;;  %v3064_v56 = vsel %vm2919_vm1, %v7306_v30, -inf  ;;  %v2350_v31 = vmax.f32 %v2272_v7, 1e-24  ;;  %v5641_v41 = vpop.eup %5640 }
 0x413   : > { %5642 = vrsqrt.f32 %v2346_v13  ;;  %v4146_v13 = vsel %vm2919_vm1, %v4034_v44, 0.0  ;;  %v2356_v7 = vmax.f32 %v2290_v14, 1e-24  ;;  %v8739_v44 = vld [vmem:[#allocation52_spill] sm:$0xff] }
 0x414   : > { %5644 = vrsqrt.f32 %v2352_v53  ;;  %v2323_v19 = vmax.f32 %v8739_v44, 1e-24  ;;  %v8743_v44 = vld [vmem:[#allocation38_spill] sm:$0xff] }
 0x415   : > { %4210 = vadd.xlane.f32.xlu0 %v4209_v29  ;;  %v4061_v29 = vsel %vm3997_vm3, %v7300_v23, 0.0  ;;  %v7323_v17 = vpop.xlane.xlu1 %2286  ;;  %5646 = vrsqrt.f32 %v2325_v21 }
 0x416   : > { %4138 = vadd.xlane.f32.xlu1 %v4137_v10  ;;  %v2284_v10 = vpop.xlane.xlu0 %2283  ;;  %v4227_v49 = vsel %vm2919_vm1, %v4061_v29, 0.0  ;;  %v8738_v29 = vld [vmem:[#allocation8_spill] sm:$0xff]  ;;  %5648 = vrsqrt.f32 %v2350_v31  ;;  %v8741_v31 = vld [vmem:[#allocation7_spill] sm:$0xff] }
 0x417   : > { %vm3973_vm6 = vcmp.eq.s32.totalorder %v6828_v62, %v8738_v29  ;;  %vm3971_vm7 = vcmp.eq.s32.totalorder %v6828_v62, %v8741_v31  ;;  %5650 = vrsqrt.f32 %v2356_v7 }
 0x418   : > { %5652 = vrsqrt.f32 %v2323_v19 }
 0x419   : > { %3071 = vmax.xlane.f32.xlu0 %v3070_v48  ;;  %v4059_v48 = vsel %vm3995_vm5, %v7316_v1, 0.0 }
 0x41a   : > { %4153 = vadd.xlane.f32.xlu1 %v4152_v28  ;;  %v4221_v55 = vsel %vm2919_vm1, %v4059_v48, 0.0  ;;  %v2354_v48 = vmax.f32 %v2284_v10, 1e-24 }
 0x41c   : > { %5654 = vrsqrt.f32 %v2354_v48 }
 0x41d   : > { %3065 = vmax.xlane.f32.xlu0 %v3064_v56  ;;  %v7333_v56 = vmul.f32 %v5639_v58, %v6993_v9  ;;  %v5643_v21 = vpop.eup %5642  ;;  %v4037_v58 = vsel %vm3973_vm6, %v6991_v16, 0.0 }
 0x41e   : > { %3002 = vmax.xlane.f32.xlu1 %v3001_v18 }
 0x41f   : > { %v2995_v53 = vsel %vm2919_vm1, %v7333_v56, -inf  ;;  %v4035_v29 = vsel %vm3971_vm7, %v7333_v56, 0.0 }
 0x421   : > { %4228 = vadd.xlane.f32.xlu0 %v4227_v49  ;;  %v7344_v49 = vmul.f32 %v5641_v41, %v7172_v38  ;;  %v7357_v38 = vmul.f32 %v5643_v21, %v7181_v54  ;;  %v4149_v54 = vsel %vm2919_vm1, %v4035_v29, 0.0  ;;  %v8747_v29 = vld [vmem:[#allocation25_spill] sm:$0xff] }
 0x422   : > { %4147 = vadd.xlane.f32.xlu1 %v4146_v13  ;;  %v7330_v28 = vpop.xlane.xlu0 %2927  ;;  %vm3974_vm8 = vcmp.eq.s32.totalorder %v6828_v62, %v8747_v29 }
 0x423   : > { %8736 = vst [vmem:[#allocation50_spill] sm:$0xff] %v7330_v28  ;;  %v7335_v18 = vpop.xlane.xlu1 %4081  ;;  %v3082_v14 = vsel %vm2919_vm1, %v7344_v49, -inf  ;;  %v3076_v10 = vsel %vm2919_vm1, %v7357_v38, -inf }
 0x424   : > { %8737 = vst [vmem:[#allocation18_spill] sm:$0xff] %v7335_v18  ;;  %v3114_v18 = vsub.f32 %v8743_v44, %v7330_v28  ;;  %v8773_v28 = vld [vmem:[#allocation12_spill] sm:$0xff] }
 0x425   : > { %4222 = vadd.xlane.f32.xlu0 %v4221_v55  ;;  %v4155_v55 = vsel %vm2919_vm1, %v4037_v58, 0.0  ;;  %vm3981_vm13 = vcmp.eq.s32.totalorder %v6828_v62, %v8773_v28  ;;  %v8775_v28 = vld [vmem:[#allocation11_spill] sm:$0xff] }
 0x426   : > { %2996 = vmax.xlane.f32.xlu1 %v2995_v53  ;;  %v7346_v9 = vpop.xlane.xlu0 %2921  ;;  %v5645_v53 = vpop.eup %5644  ;;  %v3180_v31 = vmul.f32 1.442695, %v3114_v18  ;;  %v4038_v18 = vsel %vm3974_vm8, %v7054_v26, 0.0  ;;  %vm3979_vm14 = vcmp.eq.s32.totalorder %v6828_v62, %v8775_v28 }
 0x427   : > { %8740 = vst [vmem:[#allocation8_spill] sm:$0xff] %v7346_v9  ;;  %v7349_v13 = vpop.xlane.xlu1 %2930  ;;  %v5647_v7 = vpop.eup %5646  ;;  %v7370_v21 = vmul.f32 %v5645_v53, %v7212_v35 }
 0x428   : > { %v5649_v58 = vpop.eup %5648  ;;  %5656 = vpow2.f32 %v3180_v31 }
 0x429   : > { %3083 = vmax.xlane.f32.xlu0 %v3082_v14  ;;  %v7375_v14 = vmul.f32 %v5647_v7, %v7015_v59  ;;  %v3094_v48 = vsel %vm2919_vm1, %v7370_v21, -inf  ;;  %v7388_v53 = vmul.f32 %v5649_v58, %v7216_v33  ;;  %v5651_v7 = vpop.eup %5650  ;;  %v4158_v33 = vsel %vm2919_vm1, %v4038_v18, 0.0  ;;  %v8753_v18 = vld [vmem:[#allocation10_spill] sm:$0xff] }
 0x42a   : > { %4156 = vadd.xlane.f32.xlu1 %v4155_v55  ;;  %v7359_v41 = vpop.xlane.xlu0 %4084  ;;  %v8746_v55 = vld [vmem:[#allocation39_spill] sm:$0xff]  ;;  %v2329_v58 = vmax.f32 %v6999_v27, 1e-24  ;;  %vm3977_vm9 = vcmp.eq.s32.totalorder %v6828_v62, %v8753_v18 }
 0x42b   : > { %8742 = vst [vmem:[#allocation52_spill] sm:$0xff] %v7359_v41  ;;  %v7364_v16 = vpop.xlane.xlu1 %4075  ;;  %v3112_v44 = vsub.f32 %v8746_v55, %v7346_v9  ;;  %v3013_v35 = vsel %vm2919_vm1, %v7375_v14, -inf  ;;  %v3088_v29 = vsel %vm2919_vm1, %v7388_v53, -inf }
 0x42c   : > { %8744 = vst [vmem:[#allocation7_spill] sm:$0xff] %v7364_v16  ;;  %v8751_v16 = vld [vmem:[#allocation44_spill] sm:$0xff] }
 0x42d   : > { %3077 = vmax.xlane.f32.xlu0 %v3076_v10  ;;  %v3176_v10 = vmul.f32 1.442695, %v3112_v44 }
 0x42e   : > { %4150 = vadd.xlane.f32.xlu1 %v4149_v54  ;;  %v7372_v19 = vpop.xlane.xlu0 %4078  ;;  %v8749_v54 = vld [vmem:[#allocation42_spill] sm:$0xff] }
 0x42f   : > { %8745 = vst [vmem:[#allocation38_spill] sm:$0xff] %v7372_v19  ;;  %v7379_v41 = vpop.xlane.xlu1 %2924  ;;  %5658 = vpow2.f32 %v3176_v10 }
 0x430   : > { %5660 = vrsqrt.f32 %v2329_v58  ;;  %v2327_v58 = vmax.f32 %v7013_v20, 1e-24 }
 0x431   : > { %3095 = vmax.xlane.f32.xlu0 %v3094_v48  ;;  %v5653_v48 = vpop.eup %5652 }
 0x432   : > { %3014 = vmax.xlane.f32.xlu1 %v3013_v35  ;;  %v7390_v59 = vpop.xlane.xlu0 %2939  ;;  %v7402_v35 = vmul.f32 %v5651_v7, %v7246_v42  ;;  %v5655_v44 = vpop.eup %5654 }
 0x433   : > { %8748 = vst [vmem:[#allocation39_spill] sm:$0xff] %v7390_v59  ;;  %v3118_v55 = vsub.f32 %v8749_v54, %v7390_v59  ;;  %v7395_v19 = vpop.xlane.xlu1 %2942  ;;  %v7407_v54 = vmul.f32 %v5653_v48, %v7019_v40  ;;  %v7420_v40 = vmul.f32 %v5655_v44, %v7252_v32 }
 0x434   : > { %v3106_v27 = vsel %vm2919_vm1, %v7402_v35, -inf }
 0x435   : > { %3089 = vmax.xlane.f32.xlu0 %v3088_v29  ;;  %v3188_v59 = vmul.f32 1.442695, %v3118_v55  ;;  %v3007_v42 = vsel %vm2919_vm1, %v7407_v54, -inf  ;;  %v3100_v48 = vsel %vm2919_vm1, %v7420_v40, -inf }
 0x436   : > { %4159 = vadd.xlane.f32.xlu1 %v4158_v33  ;;  %v7404_v31 = vpop.xlane.xlu0 %2933  ;;  %v5657_v33 = vpop.eup %5656 }
 0x437   : > { %8750 = vst [vmem:[#allocation25_spill] sm:$0xff] %v7404_v31  ;;  %v3116_v9 = vsub.f32 %v8751_v16, %v7404_v31  ;;  %v7411_v29 = vpop.xlane.xlu1 %4087  ;;  %v4041_v16 = vsel %vm3977_vm9, %v7375_v14, 0.0  ;;  %5662 = vpow2.f32 %v3188_v59  ;;  %v8767_v31 = vld [vmem:[#allocation28_spill] sm:$0xff] }
 0x438   : > { %8752 = vst [vmem:[#allocation42_spill] sm:$0xff] %v7411_v29  ;;  %v4167_v32 = vsel %vm2919_vm1, %v4041_v16, 0.0  ;;  %v3310_v29 = vsel %vm2919_vm1, %v5657_v33, 0.0  ;;  %vm3978_vm12 = vcmp.eq.s32.totalorder %v6828_v62, %v8767_v31 }
 0x439   : > { %3107 = vmax.xlane.f32.xlu0 %v3106_v27  ;;  %v3184_v10 = vmul.f32 1.442695, %v3116_v9  ;;  %v8755_v27 = vld [vmem:[#allocation9_spill] sm:$0xff]  ;;  %v8757_v9 = vld [vmem:[#allocation46_spill] sm:$0xff] }
 0x43a   : > { %3008 = vmax.xlane.f32.xlu1 %v3007_v42  ;;  %v7422_v7 = vpop.xlane.xlu0 %4093  ;;  %vm3975_vm10 = vcmp.eq.s32.totalorder %v6828_v62, %v8755_v27  ;;  %v8759_v27 = vld [vmem:[#allocation30_spill] sm:$0xff] }
 0x43b   : > { %8754 = vst [vmem:[#allocation44_spill] sm:$0xff] %v7422_v7  ;;  %v7425_v55 = vpop.xlane.xlu1 %2936  ;;  %v4039_v59 = vsel %vm3975_vm10, %v7407_v54, 0.0  ;;  %5664 = vpow2.f32 %v3184_v10  ;;  %v5659_v7 = vpop.eup %5658  ;;  %vm3980_vm11 = vcmp.eq.s32.totalorder %v6828_v62, %v8759_v27 }
 0x43c   : > { %v4161_v20 = vsel %vm2919_vm1, %v4039_v59, 0.0  ;;  %5666 = vrsqrt.f32 %v2327_v58  ;;  %v4044_v10 = vsel %vm3980_vm11, %v7077_v3, 0.0  ;;  %v5661_v33 = vpop.eup %5660  ;;  %v8764_v59 = vld [vmem:[#allocation56_spill] sm:$0xff] }
 0x43d   : > { %3101 = vmax.xlane.f32.xlu0 %v3100_v48 }
 0x43e   : > { %4168 = vadd.xlane.f32.xlu1 %v4167_v32  ;;  %v7433_v44 = vpop.xlane.xlu0 %2951  ;;  %v8761_v32 = vld [vmem:[#allocation47_spill] sm:$0xff] }
 0x43f   : > { %8756 = vst [vmem:[#allocation10_spill] sm:$0xff] %v7433_v44  ;;  %v3122_v18 = vsub.f32 %v8757_v9, %v7433_v44  ;;  %v7438_v42 = vpop.xlane.xlu1 %4096  ;;  %v3304_v44 = vsel %vm2919_vm1, %v5659_v7, 0.0 }
 0x440   : > { %8758 = vst [vmem:[#allocation9_spill] sm:$0xff] %v7438_v42 }
 0x441   : > { %v3196_v16 = vmul.f32 1.442695, %v3122_v18  ;;  %3311 = vadd.xlane.f32.xlu0 %v3310_v29  ;;  %v5663_v27 = vpop.eup %5662  ;;  %v4176_v29 = vsel %vm2919_vm1, %v4044_v10, 0.0 }
 0x442   : > { %4162 = vadd.xlane.f32.xlu1 %v4161_v20  ;;  %v7444_v48 = vpop.xlane.xlu0 %2945  ;;  %v7456_v20 = vmul.f32 %v5661_v33, %v8764_v59  ;;  %v4042_v33 = vsel %vm3978_vm12, %v7094_v52, 0.0 }
 0x443   : > { %8760 = vst [vmem:[#allocation46_spill] sm:$0xff] %v7444_v48  ;;  %5668 = vpow2.f32 %v3196_v16  ;;  %v3120_v9 = vsub.f32 %v8761_v32, %v7444_v48  ;;  %v7449_v42 = vpop.xlane.xlu1 %4090  ;;  %v8765_v16 = vld [vmem:[#allocation48_spill] sm:$0xff] }
 0x444   : > { %8762 = vst [vmem:[#allocation30_spill] sm:$0xff] %v7449_v42  ;;  %v3322_v42 = vsel %vm2919_vm1, %v5663_v27, 0.0  ;;  %v3025_v10 = vsel %vm2919_vm1, %v7456_v20, -inf }
 0x445   : > { %v3192_v18 = vmul.f32 1.442695, %v3120_v9  ;;  %3305 = vadd.xlane.f32.xlu0 %v3304_v44  ;;  %v5665_v7 = vpop.eup %5664 }
 0x446   : > { %4177 = vadd.xlane.f32.xlu1 %v4176_v29  ;;  %v7453_v58 = vpop.xlane.xlu0 %2963  ;;  %v5667_v27 = vpop.eup %5666  ;;  %v3316_v59 = vsel %vm2919_vm1, %v5665_v7, 0.0 }
 0x447   : > { %8763 = vst [vmem:[#allocation47_spill] sm:$0xff] %v7453_v58  ;;  %5670 = vpow2.f32 %v3192_v18  ;;  %v3126_v32 = vsub.f32 %v8765_v16, %v7453_v58  ;;  %v7460_v48 = vpop.xlane.xlu1 %4105 }
 0x448   : > { %8766 = vst [vmem:[#allocation56_spill] sm:$0xff] %v7460_v48 }
 0x449   : > { %v3204_v44 = vmul.f32 1.442695, %v3126_v32  ;;  %3323 = vadd.xlane.f32.xlu0 %v3322_v42  ;;  %v4170_v42 = vsel %vm2919_vm1, %v4042_v33, 0.0 }
 0x44a   : > { %3026 = vmax.xlane.f32.xlu1 %v3025_v10  ;;  %v7467_v9 = vpop.xlane.xlu0 %2957  ;;  %v8770_v10 = vld [vmem:[#allocation58_spill] sm:$0xff] }
 0x44b   : > { %8768 = vst [vmem:[#allocation48_spill] sm:$0xff] %v7467_v9  ;;  %5672 = vpow2.f32 %v3204_v44  ;;  %v3124_v18 = vsub.f32 %v6954_v46, %v7467_v9  ;;  %v7472_v29 = vpop.xlane.xlu1 %2954  ;;  %v7479_v58 = vmul.f32 %v5667_v27, %v8770_v10  ;;  %v8771_v44 = vld [vmem:[#allocation51_spill] sm:$0xff] }
 0x44d   : > { %v5669_v31 = vpop.eup %5668  ;;  %v3200_v16 = vmul.f32 1.442695, %v3124_v18  ;;  %3317 = vadd.xlane.f32.xlu0 %v3316_v59  ;;  %v3019_v33 = vsel %vm2919_vm1, %v7479_v58, -inf  ;;  %v4045_v59 = vsel %vm3981_vm13, %v7456_v20, 0.0 }
 0x44e   : > { %4171 = vadd.xlane.f32.xlu1 %v4170_v42  ;;  %v7476_v32 = vpop.xlane.xlu0 %2975  ;;  %v3334_v48 = vsel %vm2919_vm1, %v5669_v31, 0.0 }
 0x44f   : > { %8769 = vst [vmem:[#allocation28_spill] sm:$0xff] %v7476_v32  ;;  %5674 = vpow2.f32 %v3200_v16  ;;  %v3130_v46 = vsub.f32 %v8771_v44, %v7476_v32  ;;  %v7483_v9 = vpop.xlane.xlu1 %4099 }
 0x450   : > { %8772 = vst [vmem:[#allocation58_spill] sm:$0xff] %v7483_v9  ;;  %v8779_v9 = vld [vmem:[#allocation34_spill] sm:$0xff] }
 0x451   : > { %v5671_v7 = vpop.eup %5670  ;;  %v3212_v18 = vmul.f32 1.442695, %v3130_v46  ;;  %3335 = vadd.xlane.f32.xlu0 %v3334_v48  ;;  %v8776_v48 = vld [vmem:[#allocation59_spill] sm:$0xff]  ;;  %vm3984_vm15 = vcmp.eq.s32.totalorder %v6828_v62, %v8779_v9 }
 0x452   : > { %3020 = vmax.xlane.f32.xlu1 %v3019_v33  ;;  %v7490_v27 = vpop.xlane.xlu0 %2969  ;;  %v3328_v31 = vsel %vm2919_vm1, %v5671_v7, 0.0  ;;  %v2331_v44 = vmax.f32 %v8776_v48, 1e-24  ;;  %v4179_v33 = vsel %vm2919_vm1, %v4045_v59, 0.0  ;;  %v4048_v48 = vsel %vm3984_vm15, %v7104_v45, 0.0 }
 0x453   : > { %8774 = vst [vmem:[#allocation51_spill] sm:$0xff] %v7490_v27  ;;  %5676 = vpow2.f32 %v3212_v18  ;;  %v3128_v16 = vsub.f32 %v6980_v22, %v7490_v27  ;;  %v7495_v42 = vpop.xlane.xlu1 %2948  ;;  %v4043_v18 = vsel %vm3979_vm14, %v7479_v58, 0.0 }
 0x454   : > { %v4173_v59 = vsel %vm2919_vm1, %v4043_v18, 0.0 }
 0x455   : > { %v5673_v10 = vpop.eup %5672  ;;  %v3208_v46 = vmul.f32 1.442695, %v3128_v16  ;;  %3329 = vadd.xlane.f32.xlu0 %v3328_v31 }
 0x456   : > { %4180 = vadd.xlane.f32.xlu1 %v4179_v33  ;;  %v7502_v32 = vpop.xlane.xlu0 %2987  ;;  %v3346_v27 = vsel %vm2919_vm1, %v5673_v10, 0.0 }
 0x457   : > { %8777 = vst [vmem:[#allocation12_spill] sm:$0xff] %v7502_v32  ;;  %5678 = vpow2.f32 %v3208_v46  ;;  %v3134_v22 = vsub.f32 %v6989_v15, %v7502_v32  ;;  %v7507_v7 = vpop.xlane.xlu1 %4108  ;;  %v8788_v32 = vld [vmem:[#allocation61_spill] sm:$0xff] }
 0x458   : > { %8778 = vst [vmem:[#allocation11_spill] sm:$0xff] %v7507_v7  ;;  %5680 = vrsqrt.f32 %v2331_v44 }
 0x459   : > { %v5675_v28 = vpop.eup %5674  ;;  %v3220_v16 = vmul.f32 1.442695, %v3134_v22  ;;  %3347 = vadd.xlane.f32.xlu0 %v3346_v27  ;;  %v4188_v27 = vsel %vm2919_vm1, %v4048_v48, 0.0 }
 0x45a   : > { %4174 = vadd.xlane.f32.xlu1 %v4173_v59  ;;  %v7513_v31 = vpop.xlane.xlu0 %2981  ;;  %v3340_v10 = vsel %vm2919_vm1, %v5675_v28, 0.0  ;;  %v8784_v59 = vld [vmem:[#allocation13_spill] sm:$0xff] }
 0x45b   : > { %8780 = vst [vmem:[#allocation59_spill] sm:$0xff] %v7513_v31  ;;  %5682 = vpow2.f32 %v3220_v16  ;;  %v3132_v15 = vsub.f32 %v7004_v36, %v7513_v31  ;;  %v7518_v46 = vpop.xlane.xlu1 %4102  ;;  %vm3982_vm0 = vcmp.eq.s32.totalorder %v6828_v62, %v8784_v59 }
 0x45c   : > { %8781 = vst [vmem:[#allocation34_spill] sm:$0xff] %v7518_v46 }
 0x45d   : > { %v5677_v33 = vpop.eup %5676  ;;  %v3216_v9 = vmul.f32 1.442695, %v3132_v15  ;;  %3341 = vadd.xlane.f32.xlu0 %v3340_v10  ;;  %v8785_v15 = vld [vmem:[#allocation64_spill] sm:$0xff] }
 0x45e   : > { %4189 = vadd.xlane.f32.xlu1 %v4188_v27  ;;  %v7522_v44 = vpop.xlane.xlu0 %2999  ;;  %v3358_v36 = vsel %vm2919_vm1, %v5677_v33, 0.0  ;;  %v3037_v48 = vsel %vm2919_vm1, %v8785_v15, -inf }
 0x45f   : > { %8782 = vst [vmem:[#allocation69_spill] sm:$0xff] %v7522_v44  ;;  %5684 = vpow2.f32 %v3216_v9  ;;  %v3138_v18 = vsub.f32 %v7017_v60, %v7522_v44  ;;  %v7526_v22 = vpop.xlane.xlu1 %4117  ;;  %v8787_v9 = vld [vmem:[#allocation63_spill] sm:$0xff] }
 0x460   : > { %8783 = vst [vmem:[#allocation70_spill] sm:$0xff] %v7526_v22  ;;  %v4046_v27 = vsel %vm3982_vm0, %v8787_v9, 0.0  ;;  %v8791_v22 = vld [vmem:[#allocation32_spill] sm:$0xff] }
 0x461   : > { %v5679_v16 = vpop.eup %5678  ;;  %v3228_v28 = vmul.f32 1.442695, %v3138_v18  ;;  %3359 = vadd.xlane.f32.xlu0 %v3358_v36  ;;  %v4182_v36 = vsel %vm2919_vm1, %v4046_v27, 0.0  ;;  %vm3983_vm2 = vcmp.eq.s32.totalorder %v6828_v62, %v8791_v22  ;;  %v8793_v22 = vld [vmem:[#allocation14_spill] sm:$0xff] }
 0x462   : > { %3038 = vmax.xlane.f32.xlu1 %v3037_v48  ;;  %v7533_v10 = vpop.xlane.xlu0 %2993  ;;  %v5681_v31 = vpop.eup %5680  ;;  %v3352_v44 = vsel %vm2919_vm1, %v5679_v16, 0.0  ;;  %vm3988_vm3 = vcmp.eq.s32.totalorder %v6828_v62, %v8793_v22 }
 0x463   : > { %8786 = vst [vmem:[#allocation13_spill] sm:$0xff] %v7533_v10  ;;  %5686 = vpow2.f32 %v3228_v28  ;;  %v3136_v60 = vsub.f32 %v7029_v24, %v7533_v10  ;;  %v7538_v33 = vpop.xlane.xlu1 %2966  ;;  %v7543_v48 = vmul.f32 %v5681_v31, %v8788_v32  ;;  %v8790_v28 = vld [vmem:[#allocation57_spill] sm:$0xff] }
 0x465   : > { %v5683_v59 = vpop.eup %5682  ;;  %v3224_v18 = vmul.f32 1.442695, %v3136_v60  ;;  %3353 = vadd.xlane.f32.xlu0 %v3352_v44  ;;  %v3031_v32 = vsel %vm2919_vm1, %v7543_v48, -inf  ;;  %v4047_v27 = vsel %vm3983_vm2, %v7543_v48, 0.0 }
 0x466   : > { %4183 = vadd.xlane.f32.xlu1 %v4182_v36  ;;  %v7545_v46 = vpop.xlane.xlu0 %3011  ;;  %v3370_v10 = vsel %vm2919_vm1, %v5683_v59, 0.0 }
 0x467   : > { %8789 = vst [vmem:[#allocation64_spill] sm:$0xff] %v7545_v46  ;;  %5688 = vpow2.f32 %v3224_v18  ;;  %v3142_v7 = vsub.f32 %v8790_v28, %v7545_v46  ;;  %v7549_v24 = vpop.xlane.xlu1 %4111 }
 0x469   : > { %v5685_v16 = vpop.eup %5684  ;;  %v3236_v44 = vmul.f32 1.442695, %v3142_v7  ;;  %3371 = vadd.xlane.f32.xlu0 %v3370_v10  ;;  %v4185_v10 = vsel %vm2919_vm1, %v4047_v27, 0.0 }
 0x46a   : > { %3032 = vmax.xlane.f32.xlu1 %v3031_v32  ;;  %v7556_v31 = vpop.xlane.xlu0 %3005  ;;  %v3364_v59 = vsel %vm2919_vm1, %v5685_v16, 0.0  ;;  %v8795_v32 = vld [vmem:[#allocation66_spill] sm:$0xff] }
 0x46b   : > { %8792 = vst [vmem:[#allocation63_spill] sm:$0xff] %v7556_v31  ;;  %5690 = vpow2.f32 %v3236_v44  ;;  %v3140_v60 = vsub.f32 %v7054_v26, %v7556_v31  ;;  %v7561_v18 = vpop.xlane.xlu1 %2960  ;;  %v4052_v44 = vsel %vm3988_vm3, %v8795_v32, 0.0 }
 0x46c   : > { %v4200_v16 = vsel %vm2919_vm1, %v4052_v44, 0.0 }
 0x46d   : > { %v5687_v36 = vpop.eup %5686  ;;  %v3232_v7 = vmul.f32 1.442695, %v3140_v60  ;;  %3365 = vadd.xlane.f32.xlu0 %v3364_v59 }
 0x46e   : > { %4186 = vadd.xlane.f32.xlu1 %v4185_v10  ;;  %v7567_v28 = vpop.xlane.xlu0 %4165  ;;  %v3382_v26 = vsel %vm2919_vm1, %v5687_v36, 0.0  ;;  %v3049_v36 = vsel %vm2919_vm1, %v7170_v25, -inf }
 0x46f   : > { %8794 = vst [vmem:[#allocation61_spill] sm:$0xff] %v7567_v28  ;;  %5692 = vpow2.f32 %v3232_v7  ;;  %v7570_v46 = vpop.xlane.xlu1 %4120  ;;  %v8797_v7 = vld [vmem:[#allocation36_spill] sm:$0xff] }
 0x470   : > { %vm3986_vm4 = vcmp.eq.s32.totalorder %v6828_v62, %v8797_v7 }
 0x471   : > { %v5689_v31 = vpop.eup %5688  ;;  %3383 = vadd.xlane.f32.xlu0 %v3382_v26  ;;  %v4050_v26 = vsel %vm3986_vm4, %v7177_v61, 0.0 }
 0x472   : > { %4201 = vadd.xlane.f32.xlu1 %v4200_v16  ;;  %v7574_v22 = vpop.xlane.xlu0 %3023  ;;  %v3376_v59 = vsel %vm2919_vm1, %v5689_v31, 0.0 }
 0x473   : > { %8796 = vst [vmem:[#allocation57_spill] sm:$0xff] %v7574_v22  ;;  %v3146_v27 = vsub.f32 %v7077_v3, %v7574_v22  ;;  %v7578_v60 = vpop.xlane.xlu1 %4114 }
 0x475   : > { %v5691_v10 = vpop.eup %5690  ;;  %v3244_v28 = vmul.f32 1.442695, %v3146_v27  ;;  %3377 = vadd.xlane.f32.xlu0 %v3376_v59  ;;  %v4194_v27 = vsel %vm2919_vm1, %v4050_v26, 0.0 }
 0x476   : > { %3050 = vmax.xlane.f32.xlu1 %v3049_v36  ;;  %v7585_v44 = vpop.xlane.xlu0 %3017  ;;  %v3394_v31 = vsel %vm2919_vm1, %v5691_v10, 0.0 }
 0x477   : > { %8798 = vst [vmem:[#allocation32_spill] sm:$0xff] %v7585_v44  ;;  %5694 = vpow2.f32 %v3244_v28  ;;  %v3144_v3 = vsub.f32 %v7094_v52, %v7585_v44  ;;  %v7590_v16 = vpop.xlane.xlu1 %4129  ;;  %v8800_v44 = vld [vmem:[#allocation16_spill] sm:$0xff] }
 0x478   : > { %vm3992_vm5 = vcmp.eq.s32.totalorder %v6828_v62, %v8800_v44 }
 0x479   : > { %v5693_v22 = vpop.eup %5692  ;;  %v3240_v7 = vmul.f32 1.442695, %v3144_v3  ;;  %3395 = vadd.xlane.f32.xlu0 %v3394_v31  ;;  %v3043_v3 = vsel %vm2919_vm1, %v7197_v43, -inf  ;;  %v4056_v31 = vsel %vm3992_vm5, %v7229_v11, 0.0 }
 0x47a   : > { %4195 = vadd.xlane.f32.xlu1 %v4194_v27  ;;  %v7594_v59 = vpop.xlane.xlu0 %3035  ;;  %v3388_v52 = vsel %vm2919_vm1, %v5693_v22, 0.0  ;;  %v4212_v44 = vsel %vm2919_vm1, %v4056_v31, 0.0 }
 0x47b   : > { %8799 = vst [vmem:[#allocation14_spill] sm:$0xff] %v7594_v59  ;;  %5696 = vpow2.f32 %v3240_v7  ;;  %v3150_v36 = vsub.f32 %v7104_v45, %v7594_v59  ;;  %v7598_v28 = vpop.xlane.xlu1 %2978 }
 0x47d   : > { %v3252_v10 = vmul.f32 1.442695, %v3150_v36  ;;  %3389 = vadd.xlane.f32.xlu0 %v3388_v52 }
 0x47e   : > { %3044 = vmax.xlane.f32.xlu1 %v3043_v3  ;;  %v7605_v26 = vpop.xlane.xlu0 %3029 }
 0x47f   : > { %8801 = vst [vmem:[#allocation66_spill] sm:$0xff] %v7605_v26  ;;  %5698 = vpow2.f32 %v3252_v10  ;;  %v3148_v45 = vsub.f32 %v8787_v9, %v7605_v26  ;;  %v7610_v7 = vpop.xlane.xlu1 %4123  ;;  %v8804_v10 = vld [vmem:[#allocation15_spill] sm:$0xff]  ;;  %v3061_v9 = vsel %vm2919_vm1, %v7244_v8, -inf }
 0x480   : > { %8802 = vst [vmem:[#allocation36_spill] sm:$0xff] %v7610_v7  ;;  %vm3990_vm6 = vcmp.eq.s32.totalorder %v6828_v62, %v8804_v10 }
 0x481   : > { %v5695_v22 = vpop.eup %5694  ;;  %v3248_v27 = vmul.f32 1.442695, %v3148_v45 }
 0x482   : > { %4213 = vadd.xlane.f32.xlu1 %v4212_v44  ;;  %v7613_v36 = vpop.xlane.xlu0 %4192  ;;  %v3406_v52 = vsel %vm2919_vm1, %v5695_v22, 0.0  ;;  %v4054_v44 = vsel %vm3990_vm6, %v7250_v37, 0.0 }
 0x483   : > { %8803 = vst [vmem:[#allocation16_spill] sm:$0xff] %v7613_v36  ;;  %5700 = vpow2.f32 %v3248_v27  ;;  %v7616_v3 = vpop.xlane.xlu1 %2972  ;;  %3407 = vadd.xlane.f32.xlu0 %v3406_v52  ;;  %v4206_v10 = vsel %vm2919_vm1, %v4054_v44, 0.0  ;;  %v3055_v44 = vsel %vm2919_vm1, %v7268_v12, -inf }
 0x485   : > { %v5697_v59 = vpop.eup %5696 }
 0x486   : > { %3062 = vmax.xlane.f32.xlu1 %v3061_v9  ;;  %v7622_v45 = vpop.xlane.xlu0 %3047  ;;  %v3400_v31 = vsel %vm2919_vm1, %v5697_v59, 0.0 }
 0x487   : > { %8805 = vst [vmem:[#allocation15_spill] sm:$0xff] %v7622_v45  ;;  %v3154_v22 = vsub.f32 %v8795_v32, %v7622_v45  ;;  %v7628_v27 = vpop.xlane.xlu1 %4132  ;;  %3401 = vadd.xlane.f32.xlu0 %v3400_v31  ;;  %v8808_v45 = vld [vmem:[#allocation19_spill] sm:$0xff] }
 0x488   : > { %vm3996_vm7 = vcmp.eq.s32.totalorder %v6828_v62, %v8808_v45 }
 0x489   : > { %v5699_v52 = vpop.eup %5698  ;;  %v3260_v36 = vmul.f32 1.442695, %v3154_v22  ;;  %v2349_v22 = vmax.f32 %v7210_v4, 1e-24 }
 0x48a   : > { %4207 = vadd.xlane.f32.xlu1 %v4206_v10  ;;  %v7631_v26 = vpop.xlane.xlu0 %3041  ;;  %v3418_v9 = vsel %vm2919_vm1, %v5699_v52, 0.0 }
 0x48b   : > { %8806 = vst [vmem:[#allocation71_spill] sm:$0xff] %v7631_v26  ;;  %5702 = vpow2.f32 %v3260_v36  ;;  %v3152_v59 = vsub.f32 %v7177_v61, %v7631_v26  ;;  %v7636_v7 = vpop.xlane.xlu1 %4126  ;;  %3419 = vadd.xlane.f32.xlu0 %v3418_v9  ;;  %v4060_v61 = vsel %vm3996_vm7, %v7293_v5, 0.0 }
 0x48c   : > { %8807 = vst [vmem:[#allocation72_spill] sm:$0xff] %v7636_v7  ;;  %v4224_v9 = vsel %vm2919_vm1, %v4060_v61, 0.0 }
 0x48d   : > { %v5701_v32 = vpop.eup %5700  ;;  %v3256_v31 = vmul.f32 1.442695, %v3152_v59 }
 0x48e   : > { %3056 = vmax.xlane.f32.xlu1 %v3055_v44  ;;  %v7643_v10 = vpop.xlane.xlu0 %4204  ;;  %v3412_v36 = vsel %vm2919_vm1, %v5701_v32, 0.0  ;;  %v8812_v44 = vld [vmem:[#allocation17_spill] sm:$0xff]  ;;  %v3073_v32 = vsel %vm2919_vm1, %v7300_v23, -inf }
 0x48f   : > { %8809 = vst [vmem:[#allocation19_spill] sm:$0xff] %v7643_v10  ;;  %5704 = vpow2.f32 %v3256_v31  ;;  %v7647_v52 = vpop.xlane.xlu1 %4141  ;;  %3413 = vadd.xlane.f32.xlu0 %v3412_v36  ;;  %vm3994_vm8 = vcmp.eq.s32.totalorder %v6828_v62, %v8812_v44  ;;  %v2347_v31 = vmax.f32 %v7234_v6, 1e-24  ;;  %v2353_v6 = vmax.f32 %v7270_v57, 1e-24 }
 0x490   : > { %8810 = vst [vmem:[#allocation73_spill] sm:$0xff] %v7647_v52  ;;  %5706 = vrsqrt.f32 %v2349_v22  ;;  %v4058_v22 = vsel %vm3994_vm8, %v7306_v30, 0.0  ;;  %v2351_v57 = vmax.f32 %v7285_v63, 1e-24  ;;  %vm4589_vm8 = vcmask 7168  }
 0x491   : > { %v4218_v26 = vsel %vm2919_vm1, %v4058_v22, 0.0  ;;  %5708 = vrsqrt.f32 %v2347_v31  ;;  %v3067_v22 = vsel %vm2919_vm1, %v7316_v1, -inf }
 0x492   : > { %4225 = vadd.xlane.f32.xlu1 %v4224_v9  ;;  %v7650_v45 = vpop.xlane.xlu0 %4198 }
 0x493   : > { %8811 = vst [vmem:[#allocation74_spill] sm:$0xff] %v7650_v45  ;;  %v7652_v59 = vpop.xlane.xlu1 %2990 }
 0x495   : > { %v5703_v4 = vpop.eup %5702 }
 0x496   : > { %3074 = vmax.xlane.f32.xlu1 %v3073_v32  ;;  %v7659_v10 = vpop.xlane.xlu0 %3059  ;;  %v3430_v36 = vsel %vm2919_vm1, %v5703_v4, 0.0 }
 0x497   : > { %8813 = vst [vmem:[#allocation17_spill] sm:$0xff] %v7659_v10  ;;  %v3158_v61 = vsub.f32 %v7229_v11, %v7659_v10  ;;  %v7665_v9 = vpop.xlane.xlu1 %4135  ;;  %3431 = vadd.xlane.f32.xlu0 %v3430_v36 }
 0x498   : > { %8814 = vst [vmem:[#allocation75_spill] sm:$0xff] %v7665_v9 }
 0x499   : > { %v5705_v45 = vpop.eup %5704  ;;  %v3268_v44 = vmul.f32 1.442695, %v3158_v61  ;;  %v2357_v61 = vmax.f32 %v7302_v50, 1e-24 }
 0x49a   : > { %4219 = vadd.xlane.f32.xlu1 %v4218_v26  ;;  %v7669_v32 = vpop.xlane.xlu0 %3053  ;;  %v3424_v4 = vsel %vm2919_vm1, %v5705_v45, 0.0  ;;  %v5707_v36 = vpop.eup %5706 }
 0x49b   : > { %8815 = vst [vmem:[#allocation76_spill] sm:$0xff] %v7669_v32  ;;  %5710 = vpow2.f32 %v3268_v44  ;;  %v3156_v52 = vsub.f32 %v7250_v37, %v7669_v32  ;;  %v7674_v11 = vpop.xlane.xlu1 %2984  ;;  %3425 = vadd.xlane.f32.xlu0 %v3424_v4  ;;  %v7682_v45 = vmul.f32 %v5707_v36, %v7188_v34  ;;  %v8819_v37 = vld [vmem:[#allocation20_spill] sm:$0xff]  ;;  %v5709_v34 = vpop.eup %5708  ;;  %v2355_v36 = vmax.f32 %v7323_v17, 1e-24  ;;  %v8828_v32 = vld [vmem:[#allocation41_spill] sm:$0xff] }
 0x49c   : > { %8816 = vst [vmem:[#allocation77_spill] sm:$0xff] %v7674_v11  ;;  %5712 = vrsqrt.f32 %v2353_v6  ;;  %vm3998_vm9 = vcmp.eq.s32.totalorder %v6828_v62, %v8819_v37  ;;  %v7702_v50 = vmul.f32 %v5709_v34, %v7192_v0  ;;  %v8826_v34 = vld [vmem:[#allocation67_spill] sm:$0xff] }
 0x49d   : > { %v3264_v10 = vmul.f32 1.442695, %v3156_v52  ;;  %v3085_v52 = vsel %vm2919_vm1, %v7682_v45, -inf  ;;  %v4062_v44 = vsel %vm3998_vm9, %v7357_v38, 0.0 }
 0x49e   : > { %3068 = vmax.xlane.f32.xlu1 %v3067_v22  ;;  %v7679_v26 = vpop.xlane.xlu0 %4216  ;;  %v4230_v4 = vsel %vm2919_vm1, %v4062_v44, 0.0  ;;  %v8824_v44 = vld [vmem:[#allocation40_spill] sm:$0xff] }
 0x49f   : > { %8817 = vst [vmem:[#allocation78_spill] sm:$0xff] %v7679_v26  ;;  %5714 = vpow2.f32 %v3264_v10  ;;  %v7684_v31 = vpop.xlane.xlu1 %4144 }
 0x4a0   : > { %8818 = vst [vmem:[#allocation79_spill] sm:$0xff] %v7684_v31  ;;  %5716 = vrsqrt.f32 %v2351_v57 }
 0x4a1   : > { %5718 = vrsqrt.f32 %v2357_v61  ;;  %v3115_v61 = vsub.f32 %v8824_v44, %v7349_v13 }
 0x4a2   : > { %3086 = vmax.xlane.f32.xlu1 %v3085_v52  ;;  %v7691_v63 = vpop.xlane.xlu0 %4210  ;;  %5720 = vrsqrt.f32 %v2355_v36  ;;  %v3113_v36 = vsub.f32 %v8828_v32, %v7379_v41 }
 0x4a3   : > { %8820 = vst [vmem:[#allocation20_spill] sm:$0xff] %v7691_v63  ;;  %v7694_v6 = vpop.xlane.xlu1 %4138  ;;  %v3182_v44 = vmul.f32 1.442695, %v3115_v61  ;;  %v8832_v61 = vld [vmem:[#allocation43_spill] sm:$0xff] }
 0x4a4   : > { %8821 = vst [vmem:[#allocation80_spill] sm:$0xff] %v7694_v6 }
 0x4a5   : > { %v5711_v10 = vpop.eup %5710 }
 0x4a6   : > { %4231 = vadd.xlane.f32.xlu1 %v4230_v4  ;;  %v7698_v22 = vpop.xlane.xlu0 %3071  ;;  %v3442_v57 = vsel %vm2919_vm1, %v5711_v10, 0.0  ;;  %v5713_v26 = vpop.eup %5712  ;;  %v3079_v4 = vsel %vm2919_vm1, %v7702_v50, -inf }
 0x4a7   : > { %8822 = vst [vmem:[#allocation81_spill] sm:$0xff] %v7698_v22  ;;  %v3162_v37 = vsub.f32 %v7293_v5, %v7698_v22  ;;  %v7706_v52 = vpop.xlane.xlu1 %4153  ;;  %3443 = vadd.xlane.f32.xlu0 %v3442_v57  ;;  %v7716_v5 = vmul.f32 %v5713_v26, %v8826_v34  ;;  %v8830_v26 = vld [vmem:[#allocation68_spill] sm:$0xff] }
 0x4a8   : > { %8823 = vst [vmem:[#allocation82_spill] sm:$0xff] %v7706_v52 }
 0x4a9   : > { %v5715_v63 = vpop.eup %5714  ;;  %v3276_v17 = vmul.f32 1.442695, %v3162_v37  ;;  %v3097_v52 = vsel %vm2919_vm1, %v7716_v5, -inf }
 0x4aa   : > { %3080 = vmax.xlane.f32.xlu1 %v3079_v4  ;;  %v7712_v10 = vpop.xlane.xlu0 %3065  ;;  %v3436_v0 = vsel %vm2919_vm1, %v5715_v63, 0.0  ;;  %v5717_v37 = vpop.eup %5716 }
 0x4ab   : > { %8825 = vst [vmem:[#allocation40_spill] sm:$0xff] %v7712_v10  ;;  %5722 = vpow2.f32 %v3276_v17  ;;  %v3160_v57 = vsub.f32 %v7306_v30, %v7712_v10  ;;  %v7720_v22 = vpop.xlane.xlu1 %3002  ;;  %3437 = vadd.xlane.f32.xlu0 %v3436_v0  ;;  %v7729_v17 = vmul.f32 %v5717_v37, %v8830_v26  ;;  %v5719_v34 = vpop.eup %5718  ;;  %v3178_v0 = vmul.f32 1.442695, %v3113_v36 }
 0x4ac   : > { %8827 = vst [vmem:[#allocation67_spill] sm:$0xff] %v7720_v22  ;;  %v3119_v10 = vsub.f32 %v8832_v61, %v7395_v19 }
 0x4ad   : > { %v3272_v4 = vmul.f32 1.442695, %v3160_v57  ;;  %v3091_v32 = vsel %vm2919_vm1, %v7729_v17, -inf }
 0x4ae   : > { %3098 = vmax.xlane.f32.xlu1 %v3097_v52  ;;  %v7726_v63 = vpop.xlane.xlu0 %4228  ;;  %v7740_v52 = vmul.f32 %v5719_v34, %v7256_v2  ;;  %v3190_v26 = vmul.f32 1.442695, %v3119_v10 }
 0x4af   : > { %8829 = vst [vmem:[#allocation41_spill] sm:$0xff] %v7726_v63  ;;  %5724 = vpow2.f32 %v3272_v4  ;;  %v7731_v30 = vpop.xlane.xlu1 %4147  ;;  %v5721_v4 = vpop.eup %5720 }
 0x4b0   : > { %8831 = vst [vmem:[#allocation68_spill] sm:$0xff] %v7731_v30  ;;  %5726 = vpow2.f32 %v3182_v44  ;;  %v8835_v44 = vld [vmem:[#allocation45_spill] sm:$0xff]  ;;  %v3109_v61 = vsel %vm2919_vm1, %v7740_v52, -inf  ;;  %v7752_v2 = vmul.f32 %v5721_v4, %v7263_v47 }
 0x4b1   : > { %5728 = vpow2.f32 %v3178_v0  ;;  %v3117_v36 = vsub.f32 %v8835_v44, %v7425_v55  ;;  %v8838_v44 = vld [vmem:[#allocation49_spill] sm:$0xff] }
 0x4b2   : > { %3092 = vmax.xlane.f32.xlu1 %v3091_v32  ;;  %v7737_v57 = vpop.xlane.xlu0 %4222  ;;  %5730 = vpow2.f32 %v3190_v26  ;;  %v3103_v31 = vsel %vm2919_vm1, %v7752_v2, -inf }
 0x4b3   : > { %8833 = vst [vmem:[#allocation43_spill] sm:$0xff] %v7737_v57  ;;  %v7742_v37 = vpop.xlane.xlu1 %2996  ;;  %v3186_v10 = vmul.f32 1.442695, %v3117_v36  ;;  %v3123_v57 = vsub.f32 %v8838_v44, %v7472_v29 }
 0x4b4   : > { %8834 = vst [vmem:[#allocation83_spill] sm:$0xff] %v7742_v37 }
 0x4b5   : > { %v5723_v63 = vpop.eup %5722  ;;  %v3198_v36 = vmul.f32 1.442695, %v3123_v57  ;;  %v8844_v57 = vld [vmem:[#allocation55_spill] sm:$0xff] }
 0x4b6   : > { %3110 = vmax.xlane.f32.xlu1 %v3109_v61  ;;  %v7748_v30 = vpop.xlane.xlu0 %3083  ;;  %v3454_v32 = vsel %vm2919_vm1, %v5723_v63, 0.0 }
 0x4b7   : > { %8836 = vst [vmem:[#allocation45_spill] sm:$0xff] %v7748_v30  ;;  %v3166_v34 = vsub.f32 %v7344_v49, %v7748_v30  ;;  %v7756_v0 = vpop.xlane.xlu1 %4156  ;;  %3455 = vadd.xlane.f32.xlu0 %v3454_v32 }
 0x4b8   : > { %8837 = vst [vmem:[#allocation84_spill] sm:$0xff] %v7756_v0 }
 0x4b9   : > { %v5725_v6 = vpop.eup %5724  ;;  %v3284_v61 = vmul.f32 1.442695, %v3166_v34  ;;  %v8841_v34 = vld [vmem:[#allocation53_spill] sm:$0xff] }
 0x4ba   : > { %v5727_v63 = vpop.eup %5726  ;;  %3104 = vmax.xlane.f32.xlu1 %v3103_v31  ;;  %v7762_v47 = vpop.xlane.xlu0 %3077  ;;  %v3448_v4 = vsel %vm2919_vm1, %v5725_v6, 0.0  ;;  %v3121_v44 = vsub.f32 %v8841_v34, %v7495_v42 }
 0x4bb   : > { %8839 = vst [vmem:[#allocation49_spill] sm:$0xff] %v7762_v47  ;;  %5732 = vpow2.f32 %v3284_v61  ;;  %v3164_v32 = vsub.f32 %v7357_v38, %v7762_v47  ;;  %v7767_v26 = vpop.xlane.xlu1 %4150  ;;  %3449 = vadd.xlane.f32.xlu0 %v3448_v4  ;;  %v3313_v0 = vsel %vm2919_vm1, %v5727_v63, 0.0  ;;  %v5729_v31 = vpop.eup %5728 }
 0x4bc   : > { %8840 = vst [vmem:[#allocation85_spill] sm:$0xff] %v7767_v26  ;;  %5734 = vpow2.f32 %v3186_v10  ;;  %v3194_v61 = vmul.f32 1.442695, %v3121_v44  ;;  %v3127_v10 = vsub.f32 %v8844_v57, %v7538_v33  ;;  %v5731_v34 = vpop.eup %5730 }
 0x4bd   : > { %v3280_v30 = vmul.f32 1.442695, %v3164_v32  ;;  %v3307_v32 = vsel %vm2919_vm1, %v5729_v31, 0.0 }
 0x4be   : > { %3314 = vadd.xlane.f32.xlu1 %v3313_v0  ;;  %v7772_v9 = vpop.xlane.xlu0 %3095 }
 0x4bf   : > { %8842 = vst [vmem:[#allocation53_spill] sm:$0xff] %v7772_v9  ;;  %5736 = vpow2.f32 %v3280_v30  ;;  %v3170_v6 = vsub.f32 %v7370_v21, %v7772_v9  ;;  %v7776_v38 = vpop.xlane.xlu1 %3014  ;;  %v3206_v9 = vmul.f32 1.442695, %v3127_v10  ;;  %v8850_v10 = vld [vmem:[#allocation62_spill] sm:$0xff] }
 0x4c0   : > { %8843 = vst [vmem:[#allocation86_spill] sm:$0xff] %v7776_v38  ;;  %5738 = vpow2.f32 %v3198_v36  ;;  %v8847_v36 = vld [vmem:[#allocation60_spill] sm:$0xff] }
 0x4c1   : > { %v3292_v4 = vmul.f32 1.442695, %v3170_v6  ;;  %v3125_v44 = vsub.f32 %v8847_v36, %v7561_v18  ;;  %v3325_v6 = vsel %vm2919_vm1, %v5731_v34, 0.0 }
 0x4c2   : > { %3308 = vadd.xlane.f32.xlu1 %v3307_v32  ;;  %v7781_v63 = vpop.xlane.xlu0 %3089 }
 0x4c3   : > { %8845 = vst [vmem:[#allocation55_spill] sm:$0xff] %v7781_v63  ;;  %5740 = vpow2.f32 %v3292_v4  ;;  %v3168_v30 = vsub.f32 %v7388_v53, %v7781_v63  ;;  %v7785_v0 = vpop.xlane.xlu1 %4159 }
 0x4c4   : > { %8846 = vst [vmem:[#allocation87_spill] sm:$0xff] %v7785_v0  ;;  %5742 = vpow2.f32 %v3194_v61  ;;  %v3202_v61 = vmul.f32 1.442695, %v3125_v44  ;;  %v8853_v44 = vld [vmem:[#allocation65_spill] sm:$0xff] }
 0x4c5   : > { %v5733_v47 = vpop.eup %5732  ;;  %v3288_v57 = vmul.f32 1.442695, %v3168_v30  ;;  %v3131_v30 = vsub.f32 %v8850_v10, %v7598_v28 }
 0x4c6   : > { %v5735_v31 = vpop.eup %5734  ;;  %3326 = vadd.xlane.f32.xlu1 %v3325_v6  ;;  %v7790_v32 = vpop.xlane.xlu0 %3107  ;;  %v3466_v4 = vsel %vm2919_vm1, %v5733_v47, 0.0 }
 0x4c7   : > { %8848 = vst [vmem:[#allocation60_spill] sm:$0xff] %v7790_v32  ;;  %5744 = vpow2.f32 %v3288_v57  ;;  %v3174_v63 = vsub.f32 %v7402_v35, %v7790_v32  ;;  %v7795_v0 = vpop.xlane.xlu1 %3008  ;;  %3467 = vadd.xlane.f32.xlu0 %v3466_v4  ;;  %v3319_v6 = vsel %vm2919_vm1, %v5735_v31, 0.0 }
 0x4c8   : > { %8849 = vst [vmem:[#allocation88_spill] sm:$0xff] %v7795_v0  ;;  %5746 = vpow2.f32 %v3206_v9  ;;  %v3214_v9 = vmul.f32 1.442695, %v3131_v30 }
 0x4c9   : > { %v5737_v36 = vpop.eup %5736  ;;  %v3300_v34 = vmul.f32 1.442695, %v3174_v63  ;;  %v3129_v63 = vsub.f32 %v8853_v44, %v7616_v3 }
 0x4ca   : > { %v5739_v26 = vpop.eup %5738  ;;  %3320 = vadd.xlane.f32.xlu1 %v3319_v6  ;;  %v7800_v7 = vpop.xlane.xlu0 %3101  ;;  %v3460_v47 = vsel %vm2919_vm1, %v5737_v36, 0.0 }
 0x4cb   : > { %8851 = vst [vmem:[#allocation62_spill] sm:$0xff] %v7800_v7  ;;  %5748 = vpow2.f32 %v3300_v34  ;;  %v3172_v57 = vsub.f32 %v7420_v40, %v7800_v7  ;;  %v7805_v4 = vpop.xlane.xlu1 %4168  ;;  %3461 = vadd.xlane.f32.xlu0 %v3460_v47  ;;  %v3337_v6 = vsel %vm2919_vm1, %v5739_v26, 0.0  ;;  %v3210_v7 = vmul.f32 1.442695, %v3129_v63 }
 0x4cc   : > { %8852 = vst [vmem:[#allocation89_spill] sm:$0xff] %v7805_v4  ;;  %5750 = vpow2.f32 %v3202_v61  ;;  %v3135_v61 = vsub.f32 %v7208_v39, %v7652_v59 }
 0x4cd   : > { %v5741_v10 = vpop.eup %5740  ;;  %v3296_v31 = vmul.f32 1.442695, %v3172_v57 }
 0x4ce   : > { %v5743_v32 = vpop.eup %5742  ;;  %3338 = vadd.xlane.f32.xlu1 %v3337_v6  ;;  %v3478_v36 = vsel %vm2919_vm1, %v5741_v10, 0.0  ;;  %v3222_v10 = vmul.f32 1.442695, %v3135_v61 }
 0x4cf   : > { %5752 = vpow2.f32 %v3296_v31  ;;  %v7811_v34 = vpop.xlane.xlu1 %4162  ;;  %3479 = vadd.xlane.f32.xlu0 %v3478_v36  ;;  %v3331_v47 = vsel %vm2919_vm1, %v5743_v32, 0.0  ;;  %v3133_v31 = vsub.f32 %v7240_v51, %v7674_v11  ;;  %v8858_v51 = vld [vmem:[#allocation21_spill] sm:$0xff] }
 0x4d0   : > { %8854 = vst [vmem:[#allocation65_spill] sm:$0xff] %v7811_v34  ;;  %5754 = vpow2.f32 %v3214_v9  ;;  %vm3999_vm10 = vcmp.eq.s32.totalorder %v6828_v62, %v8858_v51  ;;  %v8901_v34 = vld [vmem:[#allocation7_spill] sm:$0xff] }
 0x4d1   : > { %v5745_v30 = vpop.eup %5744  ;;  %5756 = vpow2.f32 %v3210_v7  ;;  %v3218_v36 = vmul.f32 1.442695, %v3133_v31  ;;  %v3137_v31 = vsub.f32 %v7333_v56, %v7742_v37 }
 0x4d2   : > { %v5747_v44 = vpop.eup %5746  ;;  %3332 = vadd.xlane.f32.xlu1 %v3331_v47  ;;  %v3472_v26 = vsel %vm2919_vm1, %v5745_v30, 0.0  ;;  %5758 = vpow2.f32 %v3222_v10  ;;  %v8857_v30 = vld [vmem:[#allocation54_spill] sm:$0xff] }
 0x4d3   : > { %v7817_v57 = vpop.xlane.xlu1 %4177  ;;  %3473 = vadd.xlane.f32.xlu0 %v3472_v26  ;;  %v3349_v63 = vsel %vm2919_vm1, %v5747_v44, 0.0  ;;  %v3139_v47 = vsub.f32 %v8857_v30, %v7720_v22  ;;  %5760 = vpow2.f32 %v3218_v36  ;;  %v8860_v30 = vld [vmem:[#allocation23_spill] sm:$0xff]  ;;  %v3226_v36 = vmul.f32 1.442695, %v3137_v31 }
 0x4d4   : > { %8855 = vst [vmem:[#allocation90_spill] sm:$0xff] %v7817_v57  ;;  %vm4001_vm11 = vcmp.eq.s32.totalorder %v6828_v62, %v8860_v30  ;;  %v3141_v31 = vsub.f32 %v7407_v54, %v7795_v0 }
 0x4d5   : > { %v5749_v9 = vpop.eup %5748  ;;  %v3230_v10 = vmul.f32 1.442695, %v3139_v47  ;;  %v4065_v51 = vsel %vm4001_vm11, %v7682_v45, 0.0  ;;  %v3143_v47 = vsub.f32 %v7375_v14, %v7776_v38 }
 0x4d6   : > { %v5751_v6 = vpop.eup %5750  ;;  %3350 = vadd.xlane.f32.xlu1 %v3349_v63  ;;  %v3490_v39 = vsel %vm2919_vm1, %v5749_v9, 0.0  ;;  %v4063_v9 = vsel %vm3999_vm10, %v7702_v50, 0.0 }
 0x4d7   : > { %v7823_v32 = vpop.xlane.xlu1 %3026  ;;  %3491 = vadd.xlane.f32.xlu0 %v3490_v39  ;;  %v3343_v61 = vsel %vm2919_vm1, %v5751_v6, 0.0  ;;  %5762 = vpow2.f32 %v3230_v10  ;;  %v3238_v10 = vmul.f32 1.442695, %v3143_v47 }
 0x4d8   : > { %8856 = vst [vmem:[#allocation91_spill] sm:$0xff] %v7823_v32  ;;  %5764 = vpow2.f32 %v3226_v36  ;;  %v3234_v36 = vmul.f32 1.442695, %v3141_v31  ;;  %v3147_v47 = vsub.f32 %v7456_v20, %v7823_v32 }
 0x4d9   : > { %v5753_v7 = vpop.eup %5752  ;;  %5766 = vpow2.f32 %v3238_v10 }
 0x4da   : > { %v5755_v26 = vpop.eup %5754  ;;  %3344 = vadd.xlane.f32.xlu1 %v3343_v61  ;;  %v3484_v44 = vsel %vm2919_vm1, %v5753_v7, 0.0  ;;  %v4233_v61 = vsel %vm2919_vm1, %v4063_v9, 0.0  ;;  %5768 = vpow2.f32 %v3234_v36  ;;  %v3246_v10 = vmul.f32 1.442695, %v3147_v47 }
 0x4db   : > { %v7831_v63 = vpop.xlane.xlu1 %4171  ;;  %3485 = vadd.xlane.f32.xlu0 %v3484_v44  ;;  %v3361_v39 = vsel %vm2919_vm1, %v5755_v26, 0.0  ;;  %v5757_v6 = vpop.eup %5756  ;;  %v8862_v44 = vld [vmem:[#allocation26_spill] sm:$0xff] }
 0x4dc   : > { %8859 = vst [vmem:[#allocation54_spill] sm:$0xff] %v7831_v63  ;;  %v3355_v56 = vsel %vm2919_vm1, %v5757_v6, 0.0  ;;  %v5759_v26 = vpop.eup %5758  ;;  %vm4003_vm12 = vcmp.eq.s32.totalorder %v6828_v62, %v8862_v44  ;;  %5770 = vpow2.f32 %v3246_v10 }
 0x4dd   : > { %v4067_v30 = vsel %vm4003_vm12, %v7729_v17, 0.0  ;;  %v3373_v14 = vsel %vm2919_vm1, %v5759_v26, 0.0  ;;  %v5761_v6 = vpop.eup %5760 }
 0x4de   : > { %3362 = vadd.xlane.f32.xlu1 %v3361_v39  ;;  %v4239_v39 = vsel %vm2919_vm1, %v4065_v51, 0.0  ;;  %v3367_v54 = vsel %vm2919_vm1, %v5761_v6, 0.0 }
 0x4df   : > { %v7840_v7 = vpop.xlane.xlu1 %3020  ;;  %4234 = vadd.xlane.f32.xlu0 %v4233_v61  ;;  %v8864_v61 = vld [vmem:[#allocation29_spill] sm:$0xff] }
 0x4e0   : > { %8861 = vst [vmem:[#allocation21_spill] sm:$0xff] %v7840_v7  ;;  %vm4005_vm13 = vcmp.eq.s32.totalorder %v6828_v62, %v8864_v61  ;;  %v3145_v31 = vsub.f32 %v7479_v58, %v7840_v7 }
 0x4e1   : > { %v4069_v44 = vsel %vm4005_vm13, %v7716_v5, 0.0  ;;  %v5763_v26 = vpop.eup %5762 }
 0x4e2   : > { %3356 = vadd.xlane.f32.xlu1 %v3355_v56  ;;  %v4245_v56 = vsel %vm2919_vm1, %v4067_v30, 0.0  ;;  %v3385_v20 = vsel %vm2919_vm1, %v5763_v26, 0.0  ;;  %v5765_v6 = vpop.eup %5764  ;;  %v3242_v36 = vmul.f32 1.442695, %v3145_v31 }
 0x4e3   : > { %v7849_v9 = vpop.xlane.xlu1 %4180  ;;  %4240 = vadd.xlane.f32.xlu0 %v4239_v39  ;;  %v8866_v39 = vld [vmem:[#allocation33_spill] sm:$0xff]  ;;  %v3379_v58 = vsel %vm2919_vm1, %v5765_v6, 0.0  ;;  %v5767_v26 = vpop.eup %5766 }
 0x4e4   : > { %8863 = vst [vmem:[#allocation23_spill] sm:$0xff] %v7849_v9  ;;  %vm4007_vm14 = vcmp.eq.s32.totalorder %v6828_v62, %v8866_v39  ;;  %5772 = vpow2.f32 %v3242_v36 }
 0x4e5   : > { %v4071_v61 = vsel %vm4007_vm14, %v7752_v2, 0.0 }
 0x4e6   : > { %3374 = vadd.xlane.f32.xlu1 %v3373_v14  ;;  %v4251_v14 = vsel %vm2919_vm1, %v4069_v44, 0.0 }
 0x4e7   : > { %v7858_v51 = vpop.xlane.xlu1 %4174  ;;  %4246 = vadd.xlane.f32.xlu0 %v4245_v56  ;;  %v8868_v56 = vld [vmem:[#allocation37_spill] sm:$0xff] }
 0x4e8   : > { %8865 = vst [vmem:[#allocation26_spill] sm:$0xff] %v7858_v51  ;;  %vm4009_vm15 = vcmp.eq.s32.totalorder %v6828_v62, %v8868_v56 }
 0x4e9   : > { %v4073_v39 = vsel %vm4009_vm15, %v7740_v52, 0.0 }
 0x4ea   : > { %3368 = vadd.xlane.f32.xlu1 %v3367_v54  ;;  %v4257_v54 = vsel %vm2919_vm1, %v4071_v61, 0.0 }
 0x4eb   : > { %v7867_v30 = vpop.xlane.xlu1 %4189  ;;  %4252 = vadd.xlane.f32.xlu0 %v4251_v14  ;;  %v4263_v14 = vsel %vm2919_vm1, %v4073_v39, 0.0 }
 0x4ec   : > { %8867 = vst [vmem:[#allocation29_spill] sm:$0xff] %v7867_v30 }
 0x4ee   : > { %3386 = vadd.xlane.f32.xlu1 %v3385_v20  ;;  %v3397_v20 = vsel %vm2919_vm1, %v5767_v26, 0.0 }
 0x4ef   : > { %v7876_v44 = vpop.xlane.xlu1 %3038  ;;  %4258 = vadd.xlane.f32.xlu0 %v4257_v54  ;;  %v5769_v54 = vpop.eup %5768 }
 0x4f0   : > { %8869 = vst [vmem:[#allocation33_spill] sm:$0xff] %v7876_v44  ;;  %v3151_v47 = vsub.f32 %v8785_v15, %v7876_v44  ;;  %v3391_v31 = vsel %vm2919_vm1, %v5769_v54, 0.0  ;;  %v5771_v6 = vpop.eup %5770 }
 0x4f1   : > { %v3409_v36 = vsel %vm2919_vm1, %v5771_v6, 0.0 }
 0x4f2   : > { %3380 = vadd.xlane.f32.xlu1 %v3379_v58  ;;  %v3254_v61 = vmul.f32 1.442695, %v3151_v47  ;;  %v5773_v47 = vpop.eup %5772 }
 0x4f3   : > { %v7883_v56 = vpop.xlane.xlu1 %4183  ;;  %4264 = vadd.xlane.f32.xlu0 %v4263_v14  ;;  %v3403_v14 = vsel %vm2919_vm1, %v5773_v47, 0.0 }
 0x4f4   : > { %8870 = vst [vmem:[#allocation37_spill] sm:$0xff] %v7883_v56  ;;  %5774 = vpow2.f32 %v3254_v61 }
 0x4f6   : > { %3398 = vadd.xlane.f32.xlu1 %v3397_v20 }
 0x4f7   : > { %v7886_v10 = vpop.xlane.xlu1 %3032 }
 0x4f8   : > { %8871 = vst [vmem:[#allocation92_spill] sm:$0xff] %v7886_v10  ;;  %v3149_v15 = vsub.f32 %v7543_v48, %v7886_v10 }
 0x4fa   : > { %v3250_v58 = vmul.f32 1.442695, %v3149_v15  ;;  %3392 = vadd.xlane.f32.xlu1 %v3391_v31 }
 0x4fb   : > { %v7891_v39 = vpop.xlane.xlu1 %4186 }
 0x4fc   : > { %8872 = vst [vmem:[#allocation93_spill] sm:$0xff] %v7891_v39  ;;  %5776 = vpow2.f32 %v3250_v58 }
 0x4fe   : > { %3410 = vadd.xlane.f32.xlu1 %v3409_v36  ;;  %v5775_v61 = vpop.eup %5774 }
 0x4ff   : > { %v7894_v26 = vpop.xlane.xlu1 %4201  ;;  %v3421_v54 = vsel %vm2919_vm1, %v5775_v61, 0.0 }
 0x500   : > { %8873 = vst [vmem:[#allocation94_spill] sm:$0xff] %v7894_v26 }
 0x502   : > { %3404 = vadd.xlane.f32.xlu1 %v3403_v14 }
 0x503   : > { %v7897_v20 = vpop.xlane.xlu1 %3050 }
 0x504   : > { %8874 = vst [vmem:[#allocation95_spill] sm:$0xff] %v7897_v20  ;;  %v3155_v48 = vsub.f32 %v7170_v25, %v7897_v20  ;;  %v3312_v20 = vpop.xlane.xlu0 %3311 }
 0x506   : > { %v5777_v15 = vpop.eup %5776  ;;  %v3262_v31 = vmul.f32 1.442695, %v3155_v48  ;;  %3422 = vadd.xlane.f32.xlu1 %v3421_v54 }
 0x507   : > { %v7902_v58 = vpop.xlane.xlu1 %4195  ;;  %v3415_v6 = vsel %vm2919_vm1, %v5777_v15, 0.0 }
 0x508   : > { %8875 = vst [vmem:[#allocation96_spill] sm:$0xff] %v7902_v58  ;;  %5778 = vpow2.f32 %v3262_v31 }
 0x50a   : > { %3416 = vadd.xlane.f32.xlu1 %v3415_v6 }
 0x50b   : > { %v7905_v36 = vpop.xlane.xlu1 %3044 }
 0x50c   : > { %8876 = vst [vmem:[#allocation97_spill] sm:$0xff] %v7905_v36  ;;  %v3153_v47 = vsub.f32 %v7197_v43, %v7905_v36 }
 0x50e   : > { %v3258_v14 = vmul.f32 1.442695, %v3153_v47 }
 0x50f   : > { %v7909_v26 = vpop.xlane.xlu1 %4213 }
 0x510   : > { %8877 = vst [vmem:[#allocation98_spill] sm:$0xff] %v7909_v26  ;;  %5780 = vpow2.f32 %v3258_v14 }
 0x512   : > { %v5779_v25 = vpop.eup %5778 }
 0x513   : > { %v7911_v61 = vpop.xlane.xlu1 %3062  ;;  %v3433_v48 = vsel %vm2919_vm1, %v5779_v25, 0.0 }
 0x514   : > { %8878 = vst [vmem:[#allocation99_spill] sm:$0xff] %v7911_v61  ;;  %v3159_v54 = vsub.f32 %v7244_v8, %v7911_v61  ;;  %3434 = vadd.xlane.f32.xlu1 %v3433_v48  ;;  %v3306_v8 = vpop.xlane.xlu0 %3305 }
 0x516   : > { %v3270_v15 = vmul.f32 1.442695, %v3159_v54 }
 0x517   : > { %v7916_v31 = vpop.xlane.xlu1 %4207 }
 0x518   : > { %8879 = vst [vmem:[#allocation100_spill] sm:$0xff] %v7916_v31  ;;  %5782 = vpow2.f32 %v3270_v15 }
 0x51a   : > { %v5781_v6 = vpop.eup %5780 }
 0x51b   : > { %v7918_v43 = vpop.xlane.xlu1 %3056  ;;  %v3427_v47 = vsel %vm2919_vm1, %v5781_v6, 0.0  ;;  %v3324_v6 = vpop.xlane.xlu0 %3323 }
 0x51c   : > { %8880 = vst [vmem:[#allocation101_spill] sm:$0xff] %v7918_v43  ;;  %v3157_v14 = vsub.f32 %v7268_v12, %v7918_v43  ;;  %3428 = vadd.xlane.f32.xlu1 %v3427_v47 }
 0x51e   : > { %v3266_v26 = vmul.f32 1.442695, %v3157_v14 }
 0x51f   : > { %v7923_v25 = vpop.xlane.xlu1 %4225 }
 0x520   : > { %8881 = vst [vmem:[#allocation102_spill] sm:$0xff] %v7923_v25  ;;  %5784 = vpow2.f32 %v3266_v26  ;;  %v3318_v25 = vpop.xlane.xlu0 %3317 }
 0x522   : > { %v5783_v48 = vpop.eup %5782 }
 0x523   : > { %v7925_v54 = vpop.xlane.xlu1 %3074  ;;  %v3445_v15 = vsel %vm2919_vm1, %v5783_v48, 0.0 }
 0x524   : > { %8882 = vst [vmem:[#allocation103_spill] sm:$0xff] %v7925_v54  ;;  %v3163_v61 = vsub.f32 %v7300_v23, %v7925_v54  ;;  %3446 = vadd.xlane.f32.xlu1 %v3445_v15 }
 0x526   : > { %v3278_v31 = vmul.f32 1.442695, %v3163_v61 }
 0x527   : > { %v7930_v36 = vpop.xlane.xlu1 %4219 }
 0x528   : > { %8883 = vst [vmem:[#allocation104_spill] sm:$0xff] %v7930_v36  ;;  %5786 = vpow2.f32 %v3278_v31  ;;  %v7941_v31 = vpop.xlane.xlu0 %3335 }
 0x52a   : > { %v5785_v12 = vpop.eup %5784 }
 0x52b   : > { %v7932_v47 = vpop.xlane.xlu1 %3068  ;;  %v3439_v26 = vsel %vm2919_vm1, %v5785_v12, 0.0 }
 0x52c   : > { %8884 = vst [vmem:[#allocation105_spill] sm:$0xff] %v7932_v47  ;;  %v3161_v14 = vsub.f32 %v7316_v1, %v7932_v47  ;;  %3440 = vadd.xlane.f32.xlu1 %v3439_v26 }
 0x52e   : > { %v3274_v48 = vmul.f32 1.442695, %v3161_v14  ;;  %v7950_v14 = vpop.xlane.xlu0 %3329 }
 0x52f   : > { %v7937_v43 = vpop.xlane.xlu1 %3086 }
 0x530   : > { %8885 = vst [vmem:[#allocation106_spill] sm:$0xff] %v7937_v43  ;;  %5788 = vpow2.f32 %v3274_v48  ;;  %v3167_v23 = vsub.f32 %v7682_v45, %v7937_v43 }
 0x532   : > { %v5787_v61 = vpop.eup %5786  ;;  %v3286_v15 = vmul.f32 1.442695, %v3167_v23 }
 0x533   : > { %v7943_v54 = vpop.xlane.xlu1 %4231  ;;  %v3457_v12 = vsel %vm2919_vm1, %v5787_v61, 0.0 }
 0x534   : > { %8886 = vst [vmem:[#allocation107_spill] sm:$0xff] %v7943_v54  ;;  %5790 = vpow2.f32 %v3286_v15  ;;  %3458 = vadd.xlane.f32.xlu1 %v3457_v12  ;;  %v7957_v12 = vpop.xlane.xlu0 %3347 }
 0x537   : > { %v7946_v1 = vpop.xlane.xlu1 %3080 }
 0x538   : > { %8887 = vst [vmem:[#allocation108_spill] sm:$0xff] %v7946_v1  ;;  %v3165_v26 = vsub.f32 %v7702_v50, %v7946_v1 }
 0x53a   : > { %v5789_v48 = vpop.eup %5788  ;;  %v3282_v47 = vmul.f32 1.442695, %v3165_v26 }
 0x53b   : > { %v7952_v45 = vpop.xlane.xlu1 %3098  ;;  %v3451_v23 = vsel %vm2919_vm1, %v5789_v48, 0.0 }
 0x53c   : > { %8888 = vst [vmem:[#allocation109_spill] sm:$0xff] %v7952_v45  ;;  %5792 = vpow2.f32 %v3282_v47  ;;  %v3171_v43 = vsub.f32 %v7716_v5, %v7952_v45  ;;  %3452 = vadd.xlane.f32.xlu1 %v3451_v23  ;;  %v8891_v5 = vlaneseq  ;;  %v8892_v45 = vld [vmem:[#allocation22_spill] sm:$0xff] }
 0x53d   : > { %vm4000_vm0 = vcmp.eq.s32.totalorder %v6828_v62, %v8892_v45 }
 0x53e   : > { %v5791_v61 = vpop.eup %5790  ;;  %v3294_v15 = vmul.f32 1.442695, %v3171_v43  ;;  %v7967_v23 = vshrl.u32 %v8891_v5, 7 }
 0x53f   : > { %v7959_v54 = vpop.xlane.xlu1 %3092  ;;  %v3469_v50 = vsel %vm2919_vm1, %v5791_v61, 0.0  ;;  %v8893_v61 = vld [vmem:[#allocation24_spill] sm:$0xff] }
 0x540   : > { %8889 = vst [vmem:[#allocation110_spill] sm:$0xff] %v7959_v54  ;;  %5794 = vpow2.f32 %v3294_v15  ;;  %v3169_v26 = vsub.f32 %v7729_v17, %v7959_v54  ;;  %3470 = vadd.xlane.f32.xlu1 %v3469_v50  ;;  %vm4002_vm2 = vcmp.eq.s32.totalorder %v6828_v62, %v8893_v61  ;;  %v7975_v17 = vpop.xlane.xlu0 %3341  ;;  %v8894_v15 = vld [vmem:[#allocation27_spill] sm:$0xff]  ;;  %v4348_v36 = vadd.s32 128, %v7967_v23 }
 0x541   : > { %5796 = vlog2.f32 %v3312_v20  ;;  %vm4004_vm3 = vcmp.eq.s32.totalorder %v6828_v62, %v8894_v15  ;;  %v8896_v50 = vld [vmem:[#allocation35_spill] sm:$0xff]  ;;  %v4354_v58 = vadd.s32 176, %v7967_v23  ;;  %v4335_v9 = vadd.s32 24, %v7967_v23 }
 0x542   : > { %v3290_v47 = vmul.f32 1.442695, %v3169_v26  ;;  %5798 = vlog2.f32 %v3306_v8  ;;  %v8895_v8 = vld [vmem:[#allocation31_spill] sm:$0xff]  ;;  %vm4008_vm5 = vcmp.eq.s32.totalorder %v6828_v62, %v8896_v50  ;;  %v4068_v5 = vsel %vm4004_vm3, %v7370_v21, 0.0 }
 0x543   : > { %v7964_v48 = vpop.xlane.xlu1 %3110  ;;  %vm4006_vm4 = vcmp.eq.s32.totalorder %v6828_v62, %v8895_v8  ;;  %v4072_v21 = vsel %vm4008_vm5, %v7402_v35, 0.0  ;;  %v4339_v38 = vadd.s32 56, %v7967_v23 }
 0x544   : > { %8890 = vst [vmem:[#allocation111_spill] sm:$0xff] %v7964_v48  ;;  %5800 = vpow2.f32 %v3290_v47  ;;  %v3175_v43 = vsub.f32 %v7740_v52, %v7964_v48  ;;  %v4064_v47 = vsel %vm4000_vm0, %v7344_v49, 0.0  ;;  %v4334_v48 = vadd.s32 16, %v7967_v23 }
 0x545   : > { %5802 = vlog2.f32 %v3324_v6  ;;  %v4066_v6 = vsel %vm4002_vm2, %v7388_v53, 0.0  ;;  %v4070_v49 = vsel %vm4006_vm4, %v7420_v40, 0.0  ;;  %v8010_v61 = vsel %vm2919_vm1, %v4064_v47, 0.0 }
 0x546   : > { %v5793_v20 = vpop.eup %5792  ;;  %v3302_v52 = vmul.f32 1.442695, %v3175_v43  ;;  %v7996_v43 = vstv %s5017_s21  ;;  %v8016_v40 = vsel %vm2919_vm1, %v4068_v5, 0.0  ;;  %v8022_v35 = vsel %vm2919_vm1, %v4070_v49, 0.0  ;;  %s8517_s21 = scalar_lea.hbm %s8577_s9, %s5019_s20 }
 0x547   : > { %v7984_v26 = vpop.xlane.xlu1 %3104  ;;  %v3463_v45 = vsel %vm2919_vm1, %v5793_v20, 0.0  ;;  %v8019_v62 = vadd.s32 %v7996_v43, %v4334_v48  ;;  %v8025_v50 = vsel %vm2919_vm1, %v4072_v21, 0.0  ;;  %v4338_v5 = vadd.s32 48, %v7967_v23 }
 0x548   : > { %8897 = vst [vmem:[#allocation22_spill] sm:$0xff] %v7984_v26  ;;  %5804 = vpow2.f32 %v3302_v52  ;;  %v3173_v15 = vsub.f32 %v7752_v2, %v7984_v26  ;;  %3464 = vadd.xlane.f32.xlu1 %v3463_v45  ;;  %v8006_v52 = vpop.xlane.xlu0 %3359  ;;  %v4346_v49 = vadd.s32 112, %v7967_v23  ;;  %v4344_v21 = vadd.s32 96, %v7967_v23 }
 0x549   : > { %5806 = vlog2.f32 %v3318_v25  ;;  %v8013_v25 = vsel %vm2919_vm1, %v4066_v6, 0.0  ;;  %v4336_v6 = vadd.s32 32, %v7967_v23  ;;  %v4350_v26 = vadd.s32 144, %v7967_v23 }
 0x54a   : > { %v5795_v2 = vpop.eup %5794  ;;  %v3298_v20 = vmul.f32 1.442695, %v3173_v15  ;;  %v8029_v15 = vadd.s32 %v7996_v43, %v7967_v23  ;;  %vm4463_vm6 = vcmp.lt.s32.totalorder %v8019_v62, 1000 }
 0x54b   : > { %v3315_v45 = vpop.xlane.xlu1 %3314  ;;  %v3481_v53 = vsel %vm2919_vm1, %v5795_v2, 0.0  ;;  %v5797_v8 = vpop.eup %5796  ;;  %v4342_v2 = vadd.s32 80, %v7967_v23  ;;  %v8068_v10 = vadd.s32 %v7996_v43, %v4350_v26  ;;  %v4358_v26 = vadd.s32 208, %v7967_v23 }
 0x54c   : > { %5808 = vpow2.f32 %v3298_v20  ;;  %3482 = vadd.xlane.f32.xlu1 %v3481_v53  ;;  %v5799_v47 = vpop.eup %5798  ;;  %v4340_v20 = vadd.s32 64, %v7967_v23  ;;  %v3501_v53 = vmul.f32 0.6931472, %v5797_v8  ;;  %vm4461_vm7 = vcmp.lt.s32.totalorder %v8029_v15, 1000 }
 0x54d   : > { %5810 = vlog2.f32 %v3315_v45  ;;  %v3497_v45 = vmul.f32 0.6931472, %v5799_v47  ;;  %v8045_v8 = vadd.s32 %v7996_v43, %v4338_v5  ;;  %v4352_v47 = vadd.s32 160, %v7967_v23 }
 0x54e   : > { %v5801_v48 = vpop.eup %5800  ;;  %5812 = vlog2.f32 %v7941_v31  ;;  %v8048_v31 = vadd.s32 %v7996_v43, %v4336_v6  ;;  %v8055_v39 = vadd.s32 %v7996_v43, %v4342_v2  ;;  %v8064_v5 = vadd.s32 %v7996_v43, %v4344_v21 }
 0x54f   : > { %v3309_v54 = vpop.xlane.xlu1 %3308  ;;  %v3475_v1 = vsel %vm2919_vm1, %v5801_v48, 0.0  ;;  %v5803_v44 = vpop.eup %5802  ;;  %v8077_v21 = vadd.s32 %v7996_v43, %v4354_v58  ;;  %vm4467_vm9 = vcmp.lt.s32.totalorder %v8045_v8, 1000  ;;  %v4333_v58 = vadd.s32 8, %v7967_v23 }
 0x550   : > { %5814 = vlog2.f32 %v3309_v54  ;;  %3476 = vadd.xlane.f32.xlu1 %v3475_v1  ;;  %v8051_v48 = vpop.xlane.xlu0 %3353  ;;  %v8058_v54 = vadd.s32 %v7996_v43, %v4340_v20  ;;  %v8061_v1 = vadd.s32 %v7996_v43, %v4346_v49  ;;  %v8899_v20 = vld [vmem:[#allocation8_spill] sm:$0xff]  ;;  %v8074_v49 = vadd.s32 %v7996_v43, %v4348_v36 }
 0x551   : > { %5816 = vlog2.f32 %v7950_v14  ;;  %v8898_v14 = vld [vmem:[#allocation50_spill] sm:$0xff]  ;;  %v3624_v32 = vadd.f32 %v3497_v45, %v8899_v20  ;;  %v3509_v57 = vmul.f32 0.6931472, %v5803_v44  ;;  %v4362_v36 = vadd.s32 240, %v7967_v23 }
 0x552   : > { %v5805_v30 = vpop.eup %5804  ;;  %v3626_v56 = vadd.f32 %v3501_v53, %v8898_v14  ;;  %v8080_v53 = vadd.s32 %v7996_v43, %v4352_v47  ;;  %v4356_v14 = vadd.s32 192, %v7967_v23  ;;  %v4360_v45 = vadd.s32 224, %v7967_v23 }
 0x553   : > { %v5807_v6 = vpop.eup %5806  ;;  %v3327_v2 = vpop.xlane.xlu1 %3326  ;;  %v3493_v51 = vsel %vm2919_vm1, %v5805_v30, 0.0  ;;  %vm4465_vm10 = vcmp.lt.s32.totalorder %v8048_v31, 1000  ;;  %v8094_v20 = vadd.s32 %v7996_v43, %v4335_v9  ;;  %v4266_v4 = vsub.f32 %v3624_v32, %v8901_v34 }
 0x554   : > { %5818 = vlog2.f32 %v3327_v2  ;;  %3494 = vadd.xlane.f32.xlu1 %v3493_v51  ;;  %v3505_v30 = vmul.f32 0.6931472, %v5807_v6  ;;  %v8900_v51 = vld [vmem:[#allocation18_spill] sm:$0xff]  ;;  %v8091_v47 = vpop.xlane.xlu0 %3371  ;;  %v8105_v9 = vadd.s32 %v7996_v43, %v4356_v14  ;;  %v8109_v34 = vadd.s32 %v7996_v43, %v4362_v36 }
 0x555   : > { %v4268_v44 = vsub.f32 %v3626_v56, %v8900_v51  ;;  %5820 = vlog2.f32 %v7957_v12  ;;  %v8902_v51 = vld [vmem:[#allocation39_spill] sm:$0xff]  ;;  %v8102_v12 = vadd.s32 %v7996_v43, %v4358_v26  ;;  %v8112_v32 = vadd.s32 %v7996_v43, %v4360_v45  ;;  %v8905_v45 = vld [vmem:[#allocation44_spill] sm:$0xff] }
 0x556   : > { %v5809_v7 = vpop.eup %5808  ;;  %v3630_v37 = vadd.f32 %v3509_v57, %v8902_v51  ;;  %8904 = vst [vmem:[#allocation24_spill] sm:$0xff] %v8109_v34  ;;  %vm4471_vm11 = vcmp.lt.s32.totalorder %v8055_v39, 1000  ;;  %vm4469_vm13 = vcmp.lt.s32.totalorder %v8058_v54, 1000  ;;  %v8908_v51 = vld [vmem:[#allocation38_spill] sm:$0xff]  ;;  %vm4475_vm15 = vcmp.lt.s32.totalorder %v8061_v1, 1000 }
 0x557   : > { %v5811_v2 = vpop.eup %5810  ;;  %v3321_v63 = vpop.xlane.xlu1 %3320  ;;  %v3487_v6 = vsel %vm2919_vm1, %v5809_v7, 0.0  ;;  %v8903_v7 = vld [vmem:[#allocation25_spill] sm:$0xff]  ;;  %vm4464_vm1 = vcmp.lt.s32.totalorder %v8094_v20, 1000  ;;  %vm4473_vm2 = vcmp.lt.s32.totalorder %v8064_v5, 1000  ;;  %v4345_v54 = vadd.s32 104, %v7967_v23 }
 0x558   : > { %v3503_v0 = vmul.f32 0.6931472, %v5811_v2  ;;  %5822 = vlog2.f32 %v3321_v63  ;;  %3488 = vadd.xlane.f32.xlu1 %v3487_v6  ;;  %v5813_v56 = vpop.eup %5812  ;;  %v3628_v11 = vadd.f32 %v3505_v30, %v8903_v7  ;;  %v4398_v63 = vadd.s32 %v7996_v43, %v4333_v58  ;;  %v8127_v62 = vpop.xlane.xlu0 %3365 }
 0x559   : > { %5824 = vlog2.f32 %v7975_v17  ;;  %v4527_v17 = vsel %vm4463_vm6, %v4268_v44, 0.0  ;;  %v4525_v30 = vsel %vm4461_vm7, %v4266_v4, 0.0  ;;  %v3517_v36 = vmul.f32 0.6931472, %v5813_v56 }
 0x55a   : > { %v5815_v22 = vpop.eup %5814  ;;  %v3627_v26 = vadd.f32 %v3503_v0, %v7349_v13  ;;  %v8122_v6 = vadd.s32 %v7996_v43, %v4339_v38  ;;  %v4272_v58 = vsub.f32 %v3630_v37, %v8905_v45  ;;  %v4343_v0 = vadd.s32 88, %v7967_v23  ;;  %v8906_v38 = vld [vmem:[#allocation42_spill] sm:$0xff]  ;;  %v8907_v37 = vld [vmem:[#allocation52_spill] sm:$0xff] }
 0x55b   : > { %v5817_v57 = vpop.eup %5816  ;;  %v3499_v14 = vmul.f32 0.6931472, %v5815_v22  ;;  %v3339_v2 = vpop.xlane.xlu1 %3338  ;;  %v4337_v22 = vadd.s32 40, %v7967_v23  ;;  %v4593_v15 = vsel %vm4589_vm8, %v4527_v17, 0.0  ;;  %v4270_v44 = vsub.f32 %v3628_v11, %v8906_v38  ;;  %v8909_v45 = vld [vmem:[#allocation10_spill] sm:$0xff] }
 0x55c   : > { %5826 = vlog2.f32 %v3339_v2  ;;  %4237 = vadd.xlane.f32.xlu1 %v8010_v61  ;;  %v3513_v56 = vmul.f32 0.6931472, %v5817_v57  ;;  %vm4462_vm12 = vcmp.lt.s32.totalorder %v4398_v63, 1000  ;;  %v4269_v61 = vsub.f32 %v3627_v26, %v8907_v37  ;;  %v8153_v38 = vpop.xlane.xlu0 %3383 }
 0x55d   : > { %v3625_v13 = vadd.f32 %v3499_v14, %v7379_v41  ;;  %5828 = vlog2.f32 %v8006_v52  ;;  %v4590_v2 = vsel %vm4589_vm8, %v4525_v30, 0.0  ;;  %v3634_v34 = vadd.f32 %v3517_v36, %v8909_v45  ;;  %v8910_v36 = vld [vmem:[#allocation46_spill] sm:$0xff]  ;;  %v8913_v45 = vld [vmem:[#allocation9_spill] sm:$0xff] }
 0x55e   : > { %v5819_v4 = vpop.eup %5818  ;;  %vm4468_vm14 = vcmp.lt.s32.totalorder %v8122_v6, 1000  ;;  %v4531_v63 = vsel %vm4467_vm9, %v4272_v58, 0.0  ;;  %v4402_v57 = vadd.s32 %v7996_v43, %v4337_v22  ;;  %v8146_v17 = vadd.s32 %v7996_v43, %v4343_v0 }
 0x55f   : > { %v4267_v7 = vsub.f32 %v3625_v13, %v8908_v51  ;;  %v3511_v41 = vmul.f32 0.6931472, %v5819_v4  ;;  %v3333_v14 = vpop.xlane.xlu1 %3332  ;;  %v5821_v11 = vpop.eup %5820  ;;  %v4529_v30 = vsel %vm4465_vm10, %v4270_v44, 0.0  ;;  %v3632_v13 = vadd.f32 %v3513_v56, %v8910_v36  ;;  %v8911_v51 = vld [vmem:[#allocation56_spill] sm:$0xff]  ;;  %v8915_v36 = vld [vmem:[#allocation47_spill] sm:$0xff] }
 0x560   : > { %5830 = vlog2.f32 %v3333_v14  ;;  %4243 = vadd.xlane.f32.xlu1 %v8013_v25  ;;  %v4528_v8 = vsel %vm4464_vm1, %v4269_v61, 0.0  ;;  %v4276_v31 = vsub.f32 %v3634_v34, %v8911_v51  ;;  %v3525_v44 = vmul.f32 0.6931472, %v5821_v11  ;;  %v8914_v11 = vld [vmem:[#allocation30_spill] sm:$0xff] }
 0x561   : > { %v4526_v52 = vsel %vm4462_vm12, %v4267_v7, 0.0  ;;  %5832 = vlog2.f32 %v8051_v48  ;;  %v3631_v22 = vadd.f32 %v3511_v41, %v7395_v19  ;;  %v4341_v56 = vadd.s32 72, %v7967_v23  ;;  %v8912_v41 = vld [vmem:[#allocation58_spill] sm:$0xff] }
 0x562   : > { %v5823_v26 = vpop.eup %5822  ;;  %v4591_v25 = vsel %vm4589_vm8, %v4526_v52, 0.0  ;;  %v4601_v48 = vsel %vm4589_vm8, %v4531_v63, 0.0  ;;  %vm4466_vm0 = vcmp.lt.s32.totalorder %v4402_v57, 1000  ;;  %v4597_v19 = vsel %vm4589_vm8, %v4529_v30, 0.0 }
 0x563   : > { %v5825_v4 = vpop.eup %5824  ;;  %v4592_v58 = vadd.f32 %v4591_v25, %v4590_v2  ;;  %v3507_v0 = vmul.f32 0.6931472, %v5823_v26  ;;  %v3351_v37 = vpop.xlane.xlu1 %3350  ;;  %v4274_v14 = vsub.f32 %v3632_v13, %v8912_v41  ;;  %v4595_v2 = vsel %vm4589_vm8, %v4528_v8, 0.0 }
 0x564   : > { %5834 = vlog2.f32 %v3351_v37  ;;  %4249 = vadd.xlane.f32.xlu1 %v8016_v40  ;;  %v3521_v34 = vmul.f32 0.6931472, %v5825_v4  ;;  %v4273_v40 = vsub.f32 %v3631_v22, %v8913_v45  ;;  %v3638_v25 = vadd.f32 %v3525_v44, %v8915_v36  ;;  %v3378_v4 = vpop.xlane.xlu0 %3377  ;;  %v8916_v37 = vld [vmem:[#allocation48_spill] sm:$0xff] }
 0x565   : > { %v4594_v7 = vadd.f32 %v4593_v15, %v4592_v58  ;;  %v3629_v20 = vadd.f32 %v3507_v0, %v7425_v55  ;;  %v4535_v55 = vsel %vm4471_vm11, %v4276_v31, 0.0  ;;  %vm4472_vm3 = vcmp.lt.s32.totalorder %v8146_v17, 1000 }
 0x566   : > { %v5827_v61 = vpop.eup %5826  ;;  %v4406_v30 = vadd.s32 %v7996_v43, %v4341_v56  ;;  %v4347_v22 = vadd.s32 120, %v7967_v23  ;;  %v4533_v0 = vsel %vm4469_vm13, %v4274_v14, 0.0  ;;  %v3636_v51 = vadd.f32 %v3521_v34, %v8916_v37 }
 0x567   : > { %v4271_v63 = vsub.f32 %v3629_v20, %v8914_v11  ;;  %v4596_v52 = vadd.f32 %v4595_v2, %v4594_v7  ;;  %v3519_v26 = vmul.f32 0.6931472, %v5827_v61  ;;  %v3345_v15 = vpop.xlane.xlu1 %3344  ;;  %v5829_v13 = vpop.eup %5828  ;;  %v8917_v20 = vld [vmem:[#allocation70_spill] sm:$0xff]  ;;  %vm4479_vm4 = vcmp.lt.s32.totalorder %v8068_v10, 1000 }
 0x568   : > { %5836 = vlog2.f32 %v3345_v15  ;;  %4255 = vadd.xlane.f32.xlu1 %v8022_v35  ;;  %v4532_v35 = vsel %vm4468_vm14, %v4273_v40, 0.0  ;;  %v4280_v61 = vsub.f32 %v3638_v25, %v8917_v20  ;;  %vm4470_vm5 = vcmp.lt.s32.totalorder %v4406_v30, 1000  ;;  %v8199_v40 = vpop.xlane.xlu0 %3395 }
 0x569   : > { %5838 = vlog2.f32 %v8091_v47  ;;  %v4530_v8 = vsel %vm4466_vm0, %v4271_v63, 0.0  ;;  %v4598_v58 = vadd.f32 %v4597_v19, %v4596_v52  ;;  %v3635_v57 = vadd.f32 %v3519_v26, %v7472_v29  ;;  %v8919_v63 = vld [vmem:[#allocation34_spill] sm:$0xff] }
 0x56a   : > { %v5831_v39 = vpop.eup %5830  ;;  %5840 = vlog2.f32 %v8127_v62  ;;  %v4599_v31 = vsel %vm4589_vm8, %v4530_v8, 0.0  ;;  %v3533_v19 = vmul.f32 0.6931472, %v5829_v13  ;;  %v4609_v62 = vsel %vm4589_vm8, %v4535_v55, 0.0  ;;  %v8920_v55 = vld [vmem:[#allocation28_spill] sm:$0xff] }
 0x56b   : > { %v4600_v47 = vadd.f32 %v4599_v31, %v4598_v58  ;;  %v3515_v44 = vmul.f32 0.6931472, %v5831_v39  ;;  %v3363_v56 = vpop.xlane.xlu1 %3362  ;;  %v5833_v7 = vpop.eup %5832  ;;  %v4605_v14 = vsel %vm4589_vm8, %v4533_v0, 0.0  ;;  %v4278_v34 = vsub.f32 %v3636_v51, %v7549_v24 }
 0x56c   : > { %5842 = vlog2.f32 %v3363_v56  ;;  %4261 = vadd.xlane.f32.xlu1 %v8025_v50  ;;  %v4603_v2 = vsel %vm4589_vm8, %v4532_v35, 0.0  ;;  %v8197_v45 = vadd.s32 %v7996_v43, %v4347_v22  ;;  %v8918_v50 = vld [vmem:[#allocation11_spill] sm:$0xff]  ;;  %v3642_v36 = vadd.f32 %v3533_v19, %v8920_v55  ;;  %v3390_v56 = vpop.xlane.xlu0 %3389 }
 0x56d   : > { %v4602_v6 = vadd.f32 %v4601_v48, %v4600_v47  ;;  %v3633_v41 = vadd.f32 %v3515_v44, %v7495_v42  ;;  %v4277_v11 = vsub.f32 %v3635_v57, %v8918_v50  ;;  %v4539_v42 = vsel %vm4475_vm15, %v4280_v61, 0.0  ;;  %v8921_v57 = vld [vmem:[#allocation51_spill] sm:$0xff] }
 0x56e   : > { %v5835_v29 = vpop.eup %5834  ;;  %v4410_v24 = vadd.s32 %v7996_v43, %v4345_v54  ;;  %v3529_v25 = vmul.f32 0.6931472, %v5833_v7  ;;  %v4537_v22 = vsel %vm4473_vm2, %v4278_v34, 0.0  ;;  %vm4477_vm6 = vcmp.lt.s32.totalorder %v8074_v49, 1000  ;;  %v8922_v34 = vld [vmem:[#allocation36_spill] sm:$0xff] }
 0x56f   : > { %v4275_v52 = vsub.f32 %v3633_v41, %v8919_v63  ;;  %v4604_v48 = vadd.f32 %v4603_v2, %v4602_v6  ;;  %v3527_v26 = vmul.f32 0.6931472, %v5835_v29  ;;  %v3357_v15 = vpop.xlane.xlu1 %3356  ;;  %v4351_v39 = vadd.s32 152, %v7967_v23  ;;  %v8925_v49 = vld [vmem:[#allocation72_spill] sm:$0xff] }
 0x570   : > { %5844 = vlog2.f32 %v3357_v15  ;;  %v4536_v37 = vsel %vm4472_vm3, %v4277_v11, 0.0  ;;  %v4284_v5 = vsub.f32 %v3642_v36, %v7590_v16  ;;  %vm4476_vm7 = vcmp.lt.s32.totalorder %v8197_v45, 1000  ;;  %v8235_v11 = vpop.xlane.xlu0 %3407 }
 0x571   : > { %5846 = vlog2.f32 %v8153_v38  ;;  %v4534_v13 = vsel %vm4470_vm5, %v4275_v52, 0.0  ;;  %v4606_v8 = vadd.f32 %v4605_v14, %v4604_v48  ;;  %v3639_v38 = vadd.f32 %v3527_v26, %v7538_v33 }
 0x572   : > { %v5837_v58 = vpop.eup %5836  ;;  %5848 = vlog2.f32 %v3378_v4  ;;  %v4607_v1 = vsel %vm4589_vm8, %v4534_v13, 0.0  ;;  %v4349_v4 = vadd.s32 136, %v7967_v23  ;;  %v4617_v47 = vsel %vm4589_vm8, %v4539_v42, 0.0  ;;  %v8923_v13 = vld [vmem:[#allocation12_spill] sm:$0xff] }
 0x573   : > { %v5839_v0 = vpop.eup %5838  ;;  %v4608_v51 = vadd.f32 %v4607_v1, %v4606_v8  ;;  %v3523_v30 = vmul.f32 0.6931472, %v5837_v58  ;;  %v3375_v31 = vpop.xlane.xlu1 %3374  ;;  %v3640_v44 = vadd.f32 %v3529_v25, %v8921_v57  ;;  %v4613_v33 = vsel %vm4589_vm8, %v4537_v22, 0.0  ;;  %v8924_v22 = vld [vmem:[#allocation59_spill] sm:$0xff] }
 0x574   : > { %v5841_v35 = vpop.eup %5840  ;;  %5850 = vlog2.f32 %v3375_v31  ;;  %v4611_v61 = vsel %vm4589_vm8, %v4536_v37, 0.0  ;;  %vm4474_vm9 = vcmp.lt.s32.totalorder %v4410_v24, 1000  ;;  %v8226_v16 = vadd.s32 %v7996_v43, %v4351_v39 }
 0x575   : > { %v4610_v17 = vadd.f32 %v4609_v62, %v4608_v51  ;;  %v3637_v7 = vadd.f32 %v3523_v30, %v7561_v18  ;;  %v4281_v19 = vsub.f32 %v3639_v38, %v7570_v46  ;;  %v4543_v62 = vsel %vm4479_vm4, %v4284_v5, 0.0  ;;  %v3402_v38 = vpop.xlane.xlu0 %3401 }
 0x576   : > { %v5843_v20 = vpop.eup %5842  ;;  %v3541_v18 = vmul.f32 0.6931472, %v5839_v0  ;;  %v4414_v14 = vadd.s32 %v7996_v43, %v4349_v4  ;;  %v4282_v2 = vsub.f32 %v3640_v44, %v8922_v34  ;;  %vm4483_vm10 = vcmp.lt.s32.totalorder %v8077_v21, 1000  ;;  %v8927_v44 = vld [vmem:[#allocation75_spill] sm:$0xff] }
 0x577   : > { %v4279_v54 = vsub.f32 %v3637_v7, %v7578_v60  ;;  %v4612_v6 = vadd.f32 %v4611_v61, %v4610_v17  ;;  %v3535_v41 = vmul.f32 0.6931472, %v5843_v20  ;;  %v3369_v29 = vpop.xlane.xlu1 %3368  ;;  %v3537_v50 = vmul.f32 0.6931472, %v5841_v35 }
 0x578   : > { %5852 = vlog2.f32 %v3369_v29  ;;  %vm4481_vm1 = vcmp.lt.s32.totalorder %v8080_v53, 1000  ;;  %vm4480_vm11 = vcmp.lt.s32.totalorder %v8226_v16, 1000  ;;  %v4355_v52 = vadd.s32 184, %v7967_v23 }
 0x579   : > { %v4538_v46 = vsel %vm4474_vm9, %v4279_v54, 0.0  ;;  %v4614_v63 = vadd.f32 %v4613_v33, %v4612_v6  ;;  %5854 = vlog2.f32 %v3390_v56  ;;  %v4540_v26 = vsel %vm4476_vm7, %v4281_v19, 0.0 }
 0x57a   : > { %v5845_v60 = vpop.eup %5844  ;;  %v4615_v10 = vsel %vm4589_vm8, %v4538_v46, 0.0  ;;  %v3643_v42 = vadd.f32 %v3535_v41, %v7598_v28  ;;  %v4625_v25 = vsel %vm4589_vm8, %v4543_v62, 0.0  ;;  %v3646_v8 = vadd.f32 %v3541_v18, %v8923_v13  ;;  %v8929_v46 = vld [vmem:[#allocation13_spill] sm:$0xff]  ;;  %v8933_v13 = vld [vmem:[#allocation82_spill] sm:$0xff] }
 0x57b   : > { %v5847_v48 = vpop.eup %5846  ;;  %v4616_v15 = vadd.f32 %v4615_v10, %v4614_v63  ;;  %v3531_v55 = vmul.f32 0.6931472, %v5845_v60  ;;  %v3387_v36 = vpop.xlane.xlu1 %3386  ;;  %vm4478_vm12 = vcmp.lt.s32.totalorder %v4414_v14, 1000  ;;  %v4541_v58 = vsel %vm4477_vm6, %v4282_v2, 0.0  ;;  %v8928_v14 = vld [vmem:[#allocation69_spill] sm:$0xff] }
 0x57c   : > { %v5849_v24 = vpop.eup %5848  ;;  %5856 = vlog2.f32 %v3387_v36  ;;  %v3644_v1 = vadd.f32 %v3537_v50, %v8924_v22  ;;  %v4619_v28 = vsel %vm4589_vm8, %v4540_v26, 0.0  ;;  %v8253_v37 = vadd.s32 %v7996_v43, %v4355_v52  ;;  %v8930_v60 = vld [vmem:[#allocation77_spill] sm:$0xff] }
 0x57d   : > { %v4618_v39 = vadd.f32 %v4617_v47, %v4616_v15  ;;  %v3641_v45 = vadd.f32 %v3531_v55, %v7616_v3  ;;  %5858 = vlog2.f32 %v8199_v40  ;;  %v4353_v51 = vadd.s32 168, %v7967_v23  ;;  %v8926_v47 = vld [vmem:[#allocation73_spill] sm:$0xff]  ;;  %v8932_v15 = vld [vmem:[#allocation80_spill] sm:$0xff] }
 0x57e   : > { %v5851_v0 = vpop.eup %5850  ;;  %v4285_v30 = vsub.f32 %v3643_v42, %v7628_v27  ;;  %v4621_v3 = vsel %vm4589_vm8, %v4541_v58, 0.0  ;;  %v4288_v57 = vsub.f32 %v3646_v8, %v8926_v47  ;;  %v3549_v40 = vmul.f32 0.6931472, %v5847_v48  ;;  %v8931_v48 = vld [vmem:[#allocation79_spill] sm:$0xff] }
 0x57f   : > { %v4283_v31 = vsub.f32 %v3641_v45, %v8925_v49  ;;  %v4620_v35 = vadd.f32 %v4619_v28, %v4618_v39  ;;  %v3543_v5 = vmul.f32 0.6931472, %v5851_v0  ;;  %v3381_v4 = vpop.xlane.xlu1 %3380  ;;  %v4286_v56 = vsub.f32 %v3644_v1, %v8927_v44  ;;  %v8287_v39 = vpop.xlane.xlu0 %3419 }
 0x580   : > { %5860 = vlog2.f32 %v3381_v4  ;;  %vm4487_vm13 = vcmp.lt.s32.totalorder %v8102_v12, 1000  ;;  %v3545_v17 = vmul.f32 0.6931472, %v5849_v24  ;;  %vm4485_vm14 = vcmp.lt.s32.totalorder %v8105_v9, 1000 }
 0x581   : > { %v4542_v7 = vsel %vm4478_vm12, %v4283_v31, 0.0  ;;  %v4622_v20 = vadd.f32 %v4621_v3, %v4620_v35  ;;  %5862 = vlog2.f32 %v3402_v38  ;;  %vm4484_vm15 = vcmp.lt.s32.totalorder %v8253_v37, 1000  ;;  %v8935_v35 = vld [vmem:[#allocation67_spill] sm:$0xff] }
 0x582   : > { %v5853_v27 = vpop.eup %5852  ;;  %v4623_v33 = vsel %vm4589_vm8, %v4542_v7, 0.0  ;;  %v4418_v61 = vadd.s32 %v7996_v43, %v4353_v51  ;;  %v4544_v19 = vsel %vm4480_vm11, %v4285_v30, 0.0  ;;  %v3647_v6 = vadd.f32 %v3543_v5, %v7652_v59  ;;  %v8937_v37 = vld [vmem:[#allocation63_spill] sm:$0xff] }
 0x583   : > { %v4624_v54 = vadd.f32 %v4623_v33, %v4622_v20  ;;  %v3539_v41 = vmul.f32 0.6931472, %v5853_v27  ;;  %v3399_v29 = vpop.xlane.xlu1 %3398  ;;  %v5855_v62 = vpop.eup %5854  ;;  %v4547_v18 = vsel %vm4483_vm10, %v4288_v57, 0.0  ;;  %v3650_v34 = vadd.f32 %v3549_v40, %v8928_v14  ;;  %v8938_v27 = vld [vmem:[#allocation83_spill] sm:$0xff] }
 0x584   : > { %v4359_v2 = vadd.s32 216, %v7967_v23  ;;  %5864 = vlog2.f32 %v3399_v29  ;;  %v4545_v50 = vsel %vm4481_vm1, %v4286_v56, 0.0  ;;  %v3648_v16 = vadd.f32 %v3545_v17, %v8929_v46  ;;  %v8936_v17 = vld [vmem:[#allocation24_spill] sm:$0xff]  ;;  %v3414_v12 = vpop.xlane.xlu0 %3413  ;;  %v8940_v29 = vld [vmem:[#allocation85_spill] sm:$0xff] }
 0x585   : > { %v4626_v63 = vadd.f32 %v4625_v25, %v4624_v54  ;;  %v3645_v10 = vadd.f32 %v3539_v41, %v8930_v60  ;;  %5866 = vlog2.f32 %v8235_v11  ;;  %v4627_v52 = vsel %vm4589_vm8, %v4544_v19, 0.0  ;;  %v8934_v11 = vld [vmem:[#allocation68_spill] sm:$0xff] }
 0x586   : > { %v5857_v59 = vpop.eup %5856  ;;  %vm4482_vm0 = vcmp.lt.s32.totalorder %v4418_v61, 1000  ;;  %v4357_v21 = vadd.s32 200, %v7967_v23  ;;  %v4289_v26 = vsub.f32 %v3647_v6, %v8931_v48  ;;  %v4629_v25 = vsel %vm4589_vm8, %v4545_v50, 0.0  ;;  %v8939_v6 = vld [vmem:[#allocation84_spill] sm:$0xff] }
 0x587   : > { %v4287_v42 = vsub.f32 %v3645_v10, %v8932_v15  ;;  %v4628_v55 = vadd.f32 %v4627_v52, %v4626_v63  ;;  %v3551_v53 = vmul.f32 0.6931472, %v5857_v59  ;;  %v3393_v36 = vpop.xlane.xlu1 %3392  ;;  %v5859_v24 = vpop.eup %5858  ;;  %v4292_v8 = vsub.f32 %v3650_v34, %v8933_v13  ;;  %v8941_v50 = vld [vmem:[#allocation64_spill] sm:$0xff]  ;;  %v8942_v63 = vld [vmem:[#allocation87_spill] sm:$0xff] }
 0x588   : > { %v4424_v58 = vadd.s32 %v7996_v43, %v4359_v2  ;;  %5868 = vlog2.f32 %v3393_v36  ;;  %v4290_v22 = vsub.f32 %v3648_v16, %v8934_v11  ;;  %v3553_v1 = vmul.f32 0.6931472, %v5855_v62 }
 0x589   : > { %v4546_v45 = vsel %vm4482_vm0, %v4287_v42, 0.0  ;;  %v4630_v0 = vadd.f32 %v4629_v25, %v4628_v55  ;;  %vm4489_vm2 = vcmp.lt.s32.totalorder %v8112_v32, 1000  ;;  %v4364_v51 = vadd.s32 256, %v7967_v23 }
 0x58a   : > { %v5861_v28 = vpop.eup %5860  ;;  %v4631_v38 = vsel %vm4589_vm8, %v4546_v45, 0.0  ;;  %v4422_v30 = vadd.s32 %v7996_v43, %v4357_v21  ;;  %v4548_v49 = vsel %vm4484_vm15, %v4289_v26, 0.0  ;;  %v3651_v5 = vadd.f32 %v3551_v53, %v8935_v35  ;;  %v8943_v53 = vld [vmem:[#allocation86_spill] sm:$0xff] }
 0x58b   : > { %v4632_v31 = vadd.f32 %v4631_v38, %v4630_v0  ;;  %v3547_v4 = vmul.f32 0.6931472, %v5861_v28  ;;  %v3411_v3 = vpop.xlane.xlu1 %3410  ;;  %v5863_v47 = vpop.eup %5862  ;;  %v4633_v57 = vsel %vm4589_vm8, %v4547_v18, 0.0  ;;  %v4551_v40 = vsel %vm4487_vm13, %v4292_v8, 0.0  ;;  %v8944_v8 = vld [vmem:[#allocation61_spill] sm:$0xff]  ;;  %v8945_v0 = vld [vmem:[#allocation32_spill] sm:$0xff] }
 0x58c   : > { %v3557_v44 = vmul.f32 0.6931472, %v5859_v24  ;;  %vm4488_vm3 = vcmp.lt.s32.totalorder %v4424_v58, 1000  ;;  %v4549_v56 = vsel %vm4485_vm14, %v4290_v22, 0.0  ;;  %vm4491_vm4 = vcmp.lt.s32.totalorder %v8936_v17, 1000  ;;  %v8946_v38 = vld [vmem:[#allocation88_spill] sm:$0xff] }
 0x58d   : > { %v3652_v7 = vadd.f32 %v3553_v1, %v8937_v37  ;;  %v4634_v20 = vadd.f32 %v4633_v57, %v4632_v31  ;;  %v3649_v33 = vadd.f32 %v3547_v4, %v8938_v27  ;;  %v4635_v19 = vsel %vm4589_vm8, %v4548_v49, 0.0  ;;  %v8329_v4 = vpop.xlane.xlu0 %3431 }
 0x58e   : > { %v5865_v61 = vpop.eup %5864  ;;  %vm4486_vm5 = vcmp.lt.s32.totalorder %v4422_v30, 1000  ;;  %v4361_v54 = vadd.s32 232, %v7967_v23  ;;  %5870 = vlog2.f32 %v3411_v3  ;;  %v4293_v41 = vsub.f32 %v3651_v5, %v8939_v6 }
 0x58f   : > { %v4291_v9 = vsub.f32 %v3649_v33, %v8940_v29  ;;  %v4636_v62 = vadd.f32 %v4635_v19, %v4634_v20  ;;  %v3559_v18 = vmul.f32 0.6931472, %v5865_v61  ;;  %v3405_v14 = vpop.xlane.xlu1 %3404  ;;  %v5867_v34 = vpop.eup %5866  ;;  %v4637_v2 = vsel %vm4589_vm8, %v4549_v56, 0.0  ;;  %v8950_v19 = vld [vmem:[#allocation57_spill] sm:$0xff] }
 0x590   : > { %v3654_v46 = vadd.f32 %v3557_v44, %v8941_v50  ;;  %v4363_v16 = vadd.s32 248, %v7967_v23  ;;  %5872 = vlog2.f32 %v3405_v14  ;;  %v4294_v60 = vsub.f32 %v3652_v7, %v8942_v63  ;;  %v8949_v7 = vld [vmem:[#allocation54_spill] sm:$0xff]  ;;  %v8951_v50 = vld [vmem:[#allocation21_spill] sm:$0xff] }
 0x591   : > { %v3561_v10 = vmul.f32 0.6931472, %v5863_v47  ;;  %v4550_v59 = vsel %vm4486_vm5, %v4291_v9, 0.0  ;;  %v4638_v52 = vadd.f32 %v4637_v2, %v4636_v62  ;;  %v4366_v48 = vadd.s32 272, %v7967_v23  ;;  %v8948_v47 = vld [vmem:[#allocation65_spill] sm:$0xff] }
 0x592   : > { %v5869_v21 = vpop.eup %5868  ;;  %5874 = vlog2.f32 %v3414_v12  ;;  %v4639_v26 = vsel %vm4589_vm8, %v4550_v59, 0.0  ;;  %v4426_v15 = vadd.s32 %v7996_v43, %v4361_v54  ;;  %v4552_v42 = vsel %vm4488_vm3, %v4293_v41, 0.0  ;;  %v8953_v59 = vld [vmem:[#allocation91_spill] sm:$0xff] }
 0x593   : > { %v4640_v55 = vadd.f32 %v4639_v26, %v4638_v52  ;;  %v3655_v36 = vadd.f32 %v3559_v18, %v8943_v53  ;;  %v3555_v24 = vmul.f32 0.6931472, %v5869_v21  ;;  %v3423_v25 = vpop.xlane.xlu1 %3422  ;;  %v4641_v13 = vsel %vm4589_vm8, %v4551_v40, 0.0  ;;  %v8954_v21 = vld [vmem:[#allocation26_spill] sm:$0xff] }
 0x594   : > { %v4296_v11 = vsub.f32 %v3654_v46, %v8944_v8  ;;  %v4429_v22 = vadd.s32 %v7996_v43, %v4364_v51  ;;  %v4428_v1 = vadd.s32 %v7996_v43, %v4363_v16  ;;  %v4553_v45 = vsel %vm4489_vm2, %v4294_v60, 0.0  ;;  %v8947_v51 = vld [vmem:[#allocation89_spill] sm:$0xff]  ;;  %v8952_v16 = vld [vmem:[#allocation90_spill] sm:$0xff] }
 0x595   : > { %v3656_v28 = vadd.f32 %v3561_v10, %v8945_v0  ;;  %v4642_v58 = vadd.f32 %v4641_v13, %v4640_v55  ;;  %v3653_v30 = vadd.f32 %v3555_v24, %v8946_v38  ;;  %v3565_v49 = vmul.f32 0.6931472, %v5867_v34  ;;  %v3426_v34 = vpop.xlane.xlu0 %3425  ;;  %v8956_v0 = vld [vmem:[#allocation23_spill] sm:$0xff] }
 0x596   : > { %v4643_v31 = vsel %vm4589_vm8, %v4552_v42, 0.0  ;;  %vm4490_vm6 = vcmp.lt.s32.totalorder %v4426_v15, 1000  ;;  %v4365_v35 = vadd.s32 264, %v7967_v23  ;;  %v4431_v5 = vadd.s32 %v7996_v43, %v4366_v48 }
 0x597   : > { %v4297_v3 = vsub.f32 %v3655_v36, %v8947_v51  ;;  %v4295_v32 = vsub.f32 %v3653_v30, %v8948_v47  ;;  %v4644_v57 = vadd.f32 %v4643_v31, %v4642_v58  ;;  %v3417_v40 = vpop.xlane.xlu1 %3416  ;;  %v4555_v56 = vsel %vm4491_vm4, %v4296_v11, 0.0 }
 0x598   : > { %v5871_v44 = vpop.eup %5870  ;;  %v4645_v37 = vsel %vm4589_vm8, %v4553_v45, 0.0  ;;  %vm4492_vm7 = vcmp.lt.s32.totalorder %v4428_v1, 1000  ;;  %5876 = vlog2.f32 %v3417_v40  ;;  %v4298_v20 = vsub.f32 %v3656_v28, %v8949_v7  ;;  %v8955_v1 = vld [vmem:[#allocation66_spill] sm:$0xff]  ;;  %v8959_v7 = vld [vmem:[#allocation93_spill] sm:$0xff] }
 0x599   : > { %5878 = vlog2.f32 %v8287_v39  ;;  %v4554_v27 = vsel %vm4490_vm6, %v4295_v32, 0.0  ;;  %v4646_v33 = vadd.f32 %v4645_v37, %v4644_v57  ;;  %v3658_v54 = vadd.f32 %v3565_v49, %v8950_v19  ;;  %v8351_v53 = vpop.xlane.xlu0 %3443  ;;  %v8957_v49 = vld [vmem:[#allocation92_spill] sm:$0xff]  ;;  %v8958_v32 = vld [vmem:[#allocation37_spill] sm:$0xff]  ;;  %v8960_v19 = vld [vmem:[#allocation14_spill] sm:$0xff] }
 0x59a   : > { %v5873_v61 = vpop.eup %5872  ;;  %vm4493_vm9 = vcmp.lt.s32.totalorder %v4429_v22, 1000  ;;  %v4647_v12 = vsel %vm4589_vm8, %v4554_v27, 0.0  ;;  %v4430_v6 = vadd.s32 %v7996_v43, %v4365_v35  ;;  %v4556_v17 = vsel %vm4492_vm7, %v4297_v3, 0.0 }
 0x59b   : > { %v4648_v41 = vadd.f32 %v4647_v12, %v4646_v33  ;;  %v3567_v29 = vmul.f32 0.6931472, %v5871_v44  ;;  %v3563_v9 = vmul.f32 0.6931472, %v5873_v61  ;;  %v4649_v18 = vsel %vm4589_vm8, %v4555_v56, 0.0 }
 0x59c   : > { %v5875_v62 = vpop.eup %5874  ;;  %v4367_v14 = vadd.s32 280, %v7967_v23  ;;  %vm4495_vm10 = vcmp.lt.s32.totalorder %v4431_v5, 1000  ;;  %v4557_v39 = vsel %vm4493_vm9, %v4298_v20, 0.0  ;;  %v4300_v63 = vsub.f32 %v3658_v54, %v8952_v16 }
 0x59d   : > { %v4650_v2 = vadd.f32 %v4649_v18, %v4648_v41  ;;  %v3657_v46 = vadd.f32 %v3563_v9, %v8951_v50  ;;  %v4651_v60 = vsel %vm4589_vm8, %v4556_v17, 0.0  ;;  %vm4494_vm1 = vcmp.lt.s32.totalorder %v4430_v6, 1000  ;;  %v3438_v40 = vpop.xlane.xlu0 %3437 }
 0x59e   : > { %5880 = vlog2.f32 %v3423_v25  ;;  %v3569_v10 = vmul.f32 0.6931472, %v5875_v62  ;;  %v3659_v52 = vadd.f32 %v3567_v29, %v8953_v59  ;;  %v4653_v15 = vsel %vm4589_vm8, %v4557_v39, 0.0 }
 0x59f   : > { %v4299_v48 = vsub.f32 %v3657_v46, %v8954_v21  ;;  %v4652_v26 = vadd.f32 %v4651_v60, %v4650_v2  ;;  %v4368_v42 = vadd.s32 288, %v7967_v23  ;;  %v4432_v55 = vadd.s32 %v7996_v43, %v4367_v14  ;;  %v8961_v14 = vld [vmem:[#allocation29_spill] sm:$0xff]  ;;  %v8963_v21 = vld [vmem:[#allocation71_spill] sm:$0xff] }
 0x5a0   : > { %v4559_v8 = vsel %vm4495_vm10, %v4300_v63, 0.0  ;;  %5882 = vlog2.f32 %v3426_v34  ;;  %v4369_v11 = vadd.s32 296, %v7967_v23  ;;  %v3660_v45 = vadd.f32 %v3569_v10, %v8955_v1  ;;  %v8962_v2 = vld [vmem:[#allocation33_spill] sm:$0xff] }
 0x5a1   : > { %v4558_v36 = vsel %vm4494_vm1, %v4299_v48, 0.0  ;;  %v4654_v24 = vadd.f32 %v4653_v15, %v4652_v26  ;;  %v4301_v28 = vsub.f32 %v3659_v52, %v8956_v0  ;;  %v4433_v30 = vadd.s32 %v7996_v43, %v4368_v42  ;;  %v3435_v35 = vpop.xlane.xlu1 %3434  ;;  %v8369_v6 = vpop.xlane.xlu0 %3455  ;;  %v8964_v26 = vld [vmem:[#allocation16_spill] sm:$0xff] }
 0x5a2   : > { %v5877_v13 = vpop.eup %5876  ;;  %v4655_v25 = vsel %vm4589_vm8, %v4558_v36, 0.0  ;;  %vm4496_vm11 = vcmp.lt.s32.totalorder %v4432_v55, 1000  ;;  %v4657_v5 = vsel %vm4589_vm8, %v4559_v8, 0.0  ;;  %v4370_v51 = vadd.s32 304, %v7967_v23  ;;  %v8965_v0 = vld [vmem:[#allocation96_spill] sm:$0xff] }
 0x5a3   : > { %v5879_v22 = vpop.eup %5878  ;;  %v4656_v58 = vadd.f32 %v4655_v25, %v4654_v24  ;;  %v3571_v38 = vmul.f32 0.6931472, %v5877_v13  ;;  %v4434_v47 = vadd.s32 %v7996_v43, %v4369_v11  ;;  %v4302_v57 = vsub.f32 %v3660_v45, %v8958_v32 }
 0x5a4   : > { %v3573_v3 = vmul.f32 0.6931472, %v5879_v22  ;;  %5884 = vlog2.f32 %v8329_v4  ;;  %v4560_v44 = vsel %vm4496_vm11, %v4301_v28, 0.0  ;;  %vm4497_vm12 = vcmp.lt.s32.totalorder %v4433_v30, 1000  ;;  %v8966_v30 = vld [vmem:[#allocation97_spill] sm:$0xff] }
 0x5a5   : > { %v3661_v31 = vadd.f32 %v3571_v38, %v8957_v49  ;;  %v4658_v56 = vadd.f32 %v4657_v5, %v4656_v58  ;;  %v4435_v33 = vadd.s32 %v7996_v43, %v4370_v51  ;;  %v4659_v61 = vsel %vm4589_vm8, %v4560_v44, 0.0  ;;  %v3450_v59 = vpop.xlane.xlu0 %3449 }
 0x5a6   : > { %vm4498_vm13 = vcmp.lt.s32.totalorder %v4434_v47, 1000  ;;  %v3662_v54 = vadd.f32 %v3573_v3, %v8960_v19  ;;  %v4561_v12 = vsel %vm4497_vm12, %v4302_v57, 0.0  ;;  %v4371_v29 = vadd.s32 312, %v7967_v23  ;;  %v8968_v3 = vld [vmem:[#allocation74_spill] sm:$0xff] }
 0x5a7   : > { %v4303_v20 = vsub.f32 %v3661_v31, %v8959_v7  ;;  %v4660_v17 = vadd.f32 %v4659_v61, %v4658_v56  ;;  %vm4499_vm14 = vcmp.lt.s32.totalorder %v4435_v33, 1000  ;;  %v4661_v62 = vsel %vm4589_vm8, %v4561_v12, 0.0  ;;  %v8967_v31 = vld [vmem:[#allocation15_spill] sm:$0xff] }
 0x5a8   : > { %v5881_v37 = vpop.eup %5880  ;;  %v4372_v18 = vadd.s32 320, %v7967_v23  ;;  %v4304_v39 = vsub.f32 %v3662_v54, %v8961_v14  ;;  %v4436_v16 = vadd.s32 %v7996_v43, %v4371_v29  ;;  %v4373_v60 = vadd.s32 328, %v7967_v23  ;;  %v8970_v61 = vld [vmem:[#allocation95_spill] sm:$0xff] }
 0x5a9   : > { %v3429_v27 = vpop.xlane.xlu1 %3428  ;;  %v3575_v4 = vmul.f32 0.6931472, %v5881_v37  ;;  %v4562_v9 = vsel %vm4498_vm13, %v4303_v20, 0.0  ;;  %v4662_v46 = vadd.f32 %v4661_v62, %v4660_v17  ;;  %v4374_v8 = vadd.s32 336, %v7967_v23  ;;  %v8384_v25 = vpop.xlane.xlu0 %3467  ;;  %v8969_v20 = vld [vmem:[#allocation94_spill] sm:$0xff] }
 0x5aa   : > { %5886 = vlog2.f32 %v3429_v27  ;;  %v5883_v41 = vpop.eup %5882  ;;  %v4663_v63 = vsel %vm4589_vm8, %v4562_v9, 0.0  ;;  %v4563_v52 = vsel %vm4499_vm14, %v4304_v39, 0.0  ;;  %v4437_v24 = vadd.s32 %v7996_v43, %v4372_v18  ;;  %v8971_v18 = vld [vmem:[#allocation76_spill] sm:$0xff] }
 0x5ab   : > { %5888 = vlog2.f32 %v3435_v35  ;;  %v3577_v34 = vmul.f32 0.6931472, %v5883_v41  ;;  %v3663_v50 = vadd.f32 %v3575_v4, %v8962_v2  ;;  %v4664_v42 = vadd.f32 %v4663_v63, %v4662_v46 }
 0x5ac   : > { %5890 = vlog2.f32 %v3438_v40  ;;  %vm4500_vm15 = vcmp.lt.s32.totalorder %v4436_v16, 1000  ;;  %v4438_v13 = vadd.s32 %v7996_v43, %v4373_v60  ;;  %v4665_v45 = vsel %vm4589_vm8, %v4563_v52, 0.0 }
 0x5ad   : > { %v3664_v48 = vadd.f32 %v3577_v34, %v8963_v21  ;;  %v4305_v15 = vsub.f32 %v3663_v50, %v8964_v26  ;;  %5892 = vlog2.f32 %v8351_v53  ;;  %v4666_v38 = vadd.f32 %v4665_v45, %v4664_v42  ;;  %v3462_v56 = vpop.xlane.xlu0 %3461  ;;  %v8972_v34 = vld [vmem:[#allocation19_spill] sm:$0xff] }
 0x5ae   : > { %v5885_v10 = vpop.eup %5884  ;;  %vm4501_vm0 = vcmp.lt.s32.totalorder %v4437_v24, 1000  ;;  %vm4502_vm2 = vcmp.lt.s32.totalorder %v4438_v13, 1000  ;;  %v4439_v5 = vadd.s32 %v7996_v43, %v4374_v8  ;;  %v4375_v40 = vadd.s32 344, %v7967_v23  ;;  %v8974_v24 = vld [vmem:[#allocation17_spill] sm:$0xff] }
 0x5af   : > { %v3581_v36 = vmul.f32 0.6931472, %v5885_v10  ;;  %v4306_v28 = vsub.f32 %v3664_v48, %v8965_v0  ;;  %v4564_v58 = vsel %vm4500_vm15, %v4305_v15, 0.0  ;;  %v4376_v12 = vadd.s32 352, %v7967_v23 }
 0x5b0   : > { %v4667_v53 = vsel %vm4589_vm8, %v4564_v58, 0.0  ;;  %vm4503_vm3 = vcmp.lt.s32.totalorder %v4439_v5, 1000  ;;  %v4440_v4 = vadd.s32 %v7996_v43, %v4375_v40  ;;  %v4377_v62 = vadd.s32 360, %v7967_v23  ;;  %v8976_v58 = vld [vmem:[#allocation20_spill] sm:$0xff]  ;;  %v8977_v5 = vld [vmem:[#allocation98_spill] sm:$0xff] }
 0x5b1   : > { %v3447_v22 = vpop.xlane.xlu1 %3446  ;;  %v3666_v35 = vadd.f32 %v3581_v36, %v8967_v31  ;;  %v4565_v44 = vsel %vm4501_vm0, %v4306_v28, 0.0  ;;  %v4668_v7 = vadd.f32 %v4667_v53, %v4666_v38  ;;  %v8404_v39 = vpop.xlane.xlu0 %3479  ;;  %v4441_v16 = vadd.s32 %v7996_v43, %v4376_v12 }
 0x5b2   : > { %5894 = vlog2.f32 %v3447_v22  ;;  %v4669_v54 = vsel %vm4589_vm8, %v4565_v44, 0.0  ;;  %vm4504_vm4 = vcmp.lt.s32.totalorder %v4440_v4, 1000  ;;  %v4378_v60 = vadd.s32 368, %v7967_v23  ;;  %v8975_v22 = vld [vmem:[#allocation101_spill] sm:$0xff] }
 0x5b3   : > { %v4308_v27 = vsub.f32 %v3666_v35, %v8969_v20  ;;  %v4670_v41 = vadd.f32 %v4669_v54, %v4668_v7  ;;  %v4442_v21 = vadd.s32 %v7996_v43, %v4377_v62  ;;  %vm4505_vm5 = vcmp.lt.s32.totalorder %v4441_v16, 1000 }
 0x5b4   : > { %v5887_v55 = vpop.eup %5886  ;;  %v4443_v36 = vadd.s32 %v7996_v43, %v4378_v60  ;;  %v4379_v0 = vadd.s32 376, %v7967_v23  ;;  %v4380_v53 = vadd.s32 384, %v7967_v23 }
 0x5b5   : > { %v3579_v11 = vmul.f32 0.6931472, %v5887_v55  ;;  %v5889_v1 = vpop.eup %5888  ;;  %v4567_v9 = vsel %vm4503_vm3, %v4308_v27, 0.0  ;;  %v8414_v8 = vpop.xlane.xlu0 %3473  ;;  %vm4506_vm6 = vcmp.lt.s32.totalorder %v4442_v21, 1000  ;;  %v8979_v27 = vld [vmem:[#allocation40_spill] sm:$0xff]  ;;  %v4384_v21 = vadd.s32 416, %v7967_v23 }
 0x5b6   : > { %v3583_v51 = vmul.f32 0.6931472, %v5889_v1  ;;  %v5891_v57 = vpop.eup %5890  ;;  %v4673_v52 = vsel %vm4589_vm8, %v4567_v9, 0.0  ;;  %vm4507_vm7 = vcmp.lt.s32.totalorder %v4443_v36, 1000  ;;  %v4444_v40 = vadd.s32 %v7996_v43, %v4379_v0 }
 0x5b7   : > { %v3665_v49 = vadd.f32 %v3579_v11, %v8966_v30  ;;  %v3585_v33 = vmul.f32 0.6931472, %v5891_v57  ;;  %v5893_v29 = vpop.eup %5892 }
 0x5b8   : > { %v3667_v19 = vadd.f32 %v3583_v51, %v8970_v61  ;;  %v3589_v10 = vmul.f32 0.6931472, %v5893_v29  ;;  %vm4508_vm9 = vcmp.lt.s32.totalorder %v4444_v40, 1000  ;;  %v4381_v29 = vadd.s32 392, %v7967_v23 }
 0x5b9   : > { %v4307_v47 = vsub.f32 %v3665_v49, %v8968_v3  ;;  %v3441_v32 = vpop.xlane.xlu1 %3440  ;;  %v3668_v14 = vadd.f32 %v3585_v33, %v8971_v18  ;;  %v8978_v3 = vld [vmem:[#allocation99_spill] sm:$0xff] }
 0x5ba   : > { %5896 = vlog2.f32 %v3441_v32  ;;  %v4309_v2 = vsub.f32 %v3667_v19, %v8972_v34  ;;  %v3670_v13 = vadd.f32 %v3589_v10, %v8974_v24  ;;  %v8980_v19 = vld [vmem:[#allocation78_spill] sm:$0xff] }
 0x5bb   : > { %v4566_v37 = vsel %vm4502_vm2, %v4307_v47, 0.0  ;;  %5898 = vlog2.f32 %v3450_v59 }
 0x5bc   : > { %v4671_v17 = vsel %vm4589_vm8, %v4566_v37, 0.0  ;;  %5900 = vlog2.f32 %v8369_v6  ;;  %v5895_v63 = vpop.eup %5894  ;;  %v8973_v6 = vld [vmem:[#allocation100_spill] sm:$0xff]  ;;  %v4568_v26 = vsel %vm4504_vm4, %v4309_v2, 0.0  ;;  %v4312_v51 = vsub.f32 %v3670_v13, %v8977_v5 }
 0x5bd   : > { %v4672_v50 = vadd.f32 %v4671_v17, %v4670_v41  ;;  %v4310_v48 = vsub.f32 %v3668_v14, %v8973_v6  ;;  %v3591_v11 = vmul.f32 0.6931472, %v5895_v63  ;;  %v4675_v45 = vsel %vm4589_vm8, %v4568_v26, 0.0  ;;  %v8981_v14 = vld [vmem:[#allocation81_spill] sm:$0xff]  ;;  %v8982_v2 = vld [vmem:[#allocation104_spill] sm:$0xff] }
 0x5be   : > { %v4571_v61 = vsel %vm4507_vm7, %v4312_v51, 0.0  ;;  %v4382_v17 = vadd.s32 400, %v7967_v23  ;;  %v4445_v41 = vadd.s32 %v7996_v43, %v4380_v53  ;;  %v4446_v6 = vadd.s32 %v7996_v43, %v4381_v29 }
 0x5bf   : > { %v4674_v15 = vadd.f32 %v4673_v52, %v4672_v50  ;;  %v4569_v28 = vsel %vm4505_vm5, %v4310_v48, 0.0  ;;  %v3671_v47 = vadd.f32 %v3591_v11, %v8978_v3  ;;  %v4681_v18 = vsel %vm4589_vm8, %v4571_v61, 0.0  ;;  %v8983_v48 = vld [vmem:[#allocation103_spill] sm:$0xff] }
 0x5c0   : > { %v4677_v57 = vsel %vm4589_vm8, %v4569_v28, 0.0  ;;  %v4447_v52 = vadd.s32 %v7996_v43, %v4382_v17  ;;  %vm4509_vm10 = vcmp.lt.s32.totalorder %v4445_v41, 1000  ;;  %vm4510_vm11 = vcmp.lt.s32.totalorder %v4446_v6, 1000  ;;  %v8989_v3 = vld [vmem:[#allocation107_spill] sm:$0xff] }
 0x5c1   : > { %v3459_v46 = vpop.xlane.xlu1 %3458  ;;  %v4676_v30 = vadd.f32 %v4675_v45, %v4674_v15  ;;  %v4313_v54 = vsub.f32 %v3671_v47, %v8980_v19  ;;  %v8986_v45 = vld [vmem:[#allocation105_spill] sm:$0xff]  ;;  %v4387_v19 = vadd.s32 440, %v7967_v23 }
 0x5c2   : > { %5902 = vlog2.f32 %v3459_v46  ;;  %v4383_v46 = vadd.s32 408, %v7967_v23  ;;  %vm4511_vm1 = vcmp.lt.s32.totalorder %v4447_v52, 1000 }
 0x5c3   : > { %5904 = vlog2.f32 %v3462_v56  ;;  %v8426_v56 = vpop.xlane.xlu0 %3491  ;;  %v4678_v37 = vadd.f32 %v4677_v57, %v4676_v30  ;;  %v4572_v60 = vsel %vm4508_vm9, %v4313_v54, 0.0 }
 0x5c4   : > { %v5897_v59 = vpop.eup %5896  ;;  %v4683_v24 = vsel %vm4589_vm8, %v4572_v60, 0.0  ;;  %v4448_v13 = vadd.s32 %v7996_v43, %v4383_v46  ;;  %v4452_v60 = vadd.s32 %v7996_v43, %v4387_v19  ;;  %v4393_v19 = vadd.s32 488, %v7967_v23 }
 0x5c5   : > { %v3587_v42 = vmul.f32 0.6931472, %v5897_v59  ;;  %v5899_v55 = vpop.eup %5898 }
 0x5c6   : > { %v3593_v31 = vmul.f32 0.6931472, %v5899_v55  ;;  %v5901_v35 = vpop.eup %5900  ;;  %v8984_v55 = vld [vmem:[#allocation102_spill] sm:$0xff]  ;;  %vm4512_vm12 = vcmp.lt.s32.totalorder %v4448_v13, 1000  ;;  %vm4516_vm15 = vcmp.lt.s32.totalorder %v4452_v60, 1000 }
 0x5c7   : > { %v3669_v1 = vadd.f32 %v3587_v42, %v8975_v22  ;;  %v3597_v20 = vmul.f32 0.6931472, %v5901_v35  ;;  %v3486_v63 = vpop.xlane.xlu0 %3485  ;;  %v8985_v22 = vld [vmem:[#allocation49_spill] sm:$0xff] }
 0x5c8   : > { %v3672_v33 = vadd.f32 %v3593_v31, %v8979_v27 }
 0x5c9   : > { %v4311_v38 = vsub.f32 %v3669_v1, %v8976_v58  ;;  %v3453_v49 = vpop.xlane.xlu1 %3452  ;;  %v3674_v34 = vadd.f32 %v3597_v20, %v8981_v14 }
 0x5ca   : > { %5906 = vlog2.f32 %v3453_v49  ;;  %v4314_v50 = vsub.f32 %v3672_v33, %v8982_v2  ;;  %v8988_v49 = vld [vmem:[#allocation43_spill] sm:$0xff] }
 0x5cb   : > { %v4570_v32 = vsel %vm4506_vm6, %v4311_v38, 0.0  ;;  %v4316_v36 = vsub.f32 %v3674_v34, %v8984_v55  ;;  %v4235_v58 = vpop.xlane.xlu0 %4234  ;;  %v8987_v38 = vld [vmem:[#allocation41_spill] sm:$0xff]  ;;  %v4388_v34 = vadd.s32 448, %v7967_v23 }
 0x5cc   : > { %v4679_v44 = vsel %vm4589_vm8, %v4570_v32, 0.0  ;;  %v5903_v7 = vpop.eup %5902  ;;  %v4573_v11 = vsel %vm4509_vm10, %v4314_v50, 0.0  ;;  %v8990_v50 = vld [vmem:[#allocation108_spill] sm:$0xff] }
 0x5cd   : > { %v4680_v12 = vadd.f32 %v4679_v44, %v4678_v37  ;;  %v5905_v4 = vpop.eup %5904  ;;  %v3471_v9 = vpop.xlane.xlu1 %3470  ;;  %v3599_v62 = vmul.f32 0.6931472, %v5903_v7  ;;  %v4685_v5 = vsel %vm4589_vm8, %v4573_v11, 0.0  ;;  %v4575_v51 = vsel %vm4511_vm1, %v4316_v36, 0.0 }
 0x5ce   : > { %v3601_v16 = vmul.f32 0.6931472, %v5905_v4  ;;  %5908 = vlog2.f32 %v3471_v9  ;;  %v4689_v7 = vsel %vm4589_vm8, %v4575_v51, 0.0  ;;  %v4386_v9 = vadd.s32 432, %v7967_v23 }
 0x5cf   : > { %v4682_v10 = vadd.f32 %v4681_v18, %v4680_v12  ;;  %5910 = vlog2.f32 %v8384_v25  ;;  %v3675_v26 = vadd.f32 %v3599_v62, %v8983_v48  ;;  %v4449_v25 = vadd.s32 %v7996_v43, %v4384_v21  ;;  %v4241_v33 = vpop.xlane.xlu0 %4240 }
 0x5d0   : > { %v3676_v1 = vadd.f32 %v3601_v16, %v8985_v22  ;;  %v4389_v21 = vadd.s32 456, %v7967_v23  ;;  %v4453_v36 = vadd.s32 %v7996_v43, %v4388_v34  ;;  %v4391_v22 = vadd.s32 472, %v7967_v23 }
 0x5d1   : > { %v4684_v28 = vadd.f32 %v4683_v24, %v4682_v10  ;;  %v4317_v30 = vsub.f32 %v3675_v26, %v8987_v38  ;;  %vm4513_vm13 = vcmp.lt.s32.totalorder %v4449_v25, 1000  ;;  %v4390_v24 = vadd.s32 464, %v7967_v23 }
 0x5d2   : > { %v4318_v47 = vsub.f32 %v3676_v1, %v8989_v3  ;;  %vm4517_vm2 = vcmp.lt.s32.totalorder %v4453_v36, 1000 }
 0x5d3   : > { %v4686_v57 = vadd.f32 %v4685_v5, %v4684_v28  ;;  %v4576_v40 = vsel %vm4512_vm12, %v4317_v30, 0.0  ;;  %v4247_v48 = vpop.xlane.xlu0 %4246  ;;  %v8993_v30 = vld [vmem:[#allocation55_spill] sm:$0xff]  ;;  %v8994_v5 = vld [vmem:[#allocation53_spill] sm:$0xff] }
 0x5d4   : > { %v5907_v59 = vpop.eup %5906  ;;  %v4577_v27 = vsel %vm4513_vm13, %v4318_v47, 0.0  ;;  %v4691_v12 = vsel %vm4589_vm8, %v4576_v40, 0.0  ;;  %v4456_v40 = vadd.s32 %v7996_v43, %v4391_v22 }
 0x5d5   : > { %v3595_v15 = vmul.f32 0.6931472, %v5907_v59  ;;  %v3465_v42 = vpop.xlane.xlu1 %3464  ;;  %v4693_v14 = vsel %vm4589_vm8, %v4577_v27, 0.0 }
 0x5d6   : > { %5912 = vlog2.f32 %v3465_v42  ;;  %v4451_v42 = vadd.s32 %v7996_v43, %v4386_v9  ;;  %vm4520_vm5 = vcmp.lt.s32.totalorder %v4456_v40, 1000 }
 0x5d7   : > { %v3673_v0 = vadd.f32 %v3595_v15, %v8986_v45  ;;  %5914 = vlog2.f32 %v8414_v8  ;;  %v4253_v47 = vpop.xlane.xlu0 %4252 }
 0x5d8   : > { %5916 = vlog2.f32 %v8404_v39  ;;  %v4385_v39 = vadd.s32 424, %v7967_v23  ;;  %v5909_v53 = vpop.eup %5908  ;;  %vm4515_vm0 = vcmp.lt.s32.totalorder %v4451_v42, 1000 }
 0x5d9   : > { %v4315_v31 = vsub.f32 %v3673_v0, %v8988_v49  ;;  %v3483_v35 = vpop.xlane.xlu1 %3482  ;;  %v5911_v20 = vpop.eup %5910  ;;  %v3607_v4 = vmul.f32 0.6931472, %v5909_v53  ;;  %v8992_v0 = vld [vmem:[#allocation45_spill] sm:$0xff]  ;;  %v4392_v53 = vadd.s32 480, %v7967_v23 }
 0x5da   : > { %5918 = vlog2.f32 %v3483_v35  ;;  %v4450_v17 = vadd.s32 %v7996_v43, %v4385_v39  ;;  %v3605_v59 = vmul.f32 0.6931472, %v5911_v20  ;;  %v4455_v35 = vadd.s32 %v7996_v43, %v4390_v24  ;;  %v8999_v24 = vld [vmem:[#allocation111_spill] sm:$0xff] }
 0x5db   : > { %v4574_v32 = vsel %vm4510_vm11, %v4315_v31, 0.0 }
 0x5dc   : > { %v4687_v8 = vsel %vm4589_vm8, %v4574_v32, 0.0  ;;  %vm4514_vm14 = vcmp.lt.s32.totalorder %v4450_v17, 1000  ;;  %v3678_v28 = vadd.f32 %v3605_v59, %v8992_v0  ;;  %v8995_v32 = vld [vmem:[#allocation109_spill] sm:$0xff]  ;;  %vm4519_vm4 = vcmp.lt.s32.totalorder %v4455_v35, 1000 }
 0x5dd   : > { %v4688_v44 = vadd.f32 %v4687_v8, %v4686_v57  ;;  %v3477_v37 = vpop.xlane.xlu1 %3476  ;;  %v8996_v8 = vld [vmem:[#allocation110_spill] sm:$0xff]  ;;  %v4394_v59 = vadd.s32 496, %v7967_v23 }
 0x5de   : > { %5920 = vlog2.f32 %v3477_v37 }
 0x5df   : > { %v4690_v61 = vadd.f32 %v4689_v7, %v4688_v44  ;;  %5922 = vlog2.f32 %v3486_v63  ;;  %v8991_v63 = vld [vmem:[#allocation106_spill] sm:$0xff] }
 0x5e0   : > { %v5913_v54 = vpop.eup %5912  ;;  %v3679_v52 = vadd.f32 %v3607_v4, %v8991_v63  ;;  %v4458_v63 = vadd.s32 %v7996_v43, %v4393_v19 }
 0x5e1   : > { %v3603_v41 = vmul.f32 0.6931472, %v5913_v54  ;;  %v3495_v29 = vpop.xlane.xlu1 %3494  ;;  %v4692_v62 = vadd.f32 %v4691_v12, %v4690_v61  ;;  %v5915_v18 = vpop.eup %5914  ;;  %v4395_v54 = vadd.s32 504, %v7967_v23 }
 0x5e2   : > { %v5917_v2 = vpop.eup %5916  ;;  %5924 = vlog2.f32 %v3495_v29  ;;  %v3609_v6 = vmul.f32 0.6931472, %v5915_v18  ;;  %v4321_v45 = vsub.f32 %v3679_v52, %v4241_v33  ;;  %vm4522_vm7 = vcmp.lt.s32.totalorder %v4458_v63, 1000 }
 0x5e3   : > { %v3677_v46 = vadd.f32 %v3603_v41, %v8990_v50  ;;  %v4694_v16 = vadd.f32 %v4693_v14, %v4692_v62  ;;  %5926 = vlog2.f32 %v8426_v56  ;;  %v3613_v55 = vmul.f32 0.6931472, %v5917_v2 }
 0x5e4   : > { %v5919_v10 = vpop.eup %5918  ;;  %v4454_v56 = vadd.s32 %v7996_v43, %v4389_v21  ;;  %v3680_v49 = vadd.f32 %v3609_v6, %v8993_v30  ;;  %v4580_v7 = vsel %vm4516_vm15, %v4321_v45, 0.0  ;;  %v4457_v62 = vadd.s32 %v7996_v43, %v4392_v53  ;;  %v9000_v30 = vld [vmem:[#allocation60_spill] sm:$0xff] }
 0x5e5   : > { %v4319_v26 = vsub.f32 %v3677_v46, %v4235_v58  ;;  %v3489_v15 = vpop.xlane.xlu1 %3488  ;;  %v3615_v13 = vmul.f32 0.6931472, %v5919_v10  ;;  %v3682_v51 = vadd.f32 %v3613_v55, %v8994_v5  ;;  %v4699_v9 = vsel %vm4589_vm8, %v4580_v7, 0.0  ;;  %v4259_v46 = vpop.xlane.xlu0 %4258  ;;  %v8998_v55 = vld [vmem:[#allocation62_spill] sm:$0xff] }
 0x5e6   : > { %5928 = vlog2.f32 %v3489_v15  ;;  %vm4518_vm3 = vcmp.lt.s32.totalorder %v4454_v56, 1000  ;;  %vm4521_vm6 = vcmp.lt.s32.totalorder %v4457_v62, 1000 }
 0x5e7   : > { %v4578_v11 = vsel %vm4514_vm14, %v4319_v26, 0.0  ;;  %v3683_v57 = vadd.f32 %v3615_v13, %v8995_v32  ;;  %v8997_v26 = vld [vmem:[#allocation22_spill] sm:$0xff] }
 0x5e8   : > { %v5921_v1 = vpop.eup %5920  ;;  %v4695_v38 = vsel %vm4589_vm8, %v4578_v11, 0.0 }
 0x5e9   : > { %v3611_v25 = vmul.f32 0.6931472, %v5921_v1  ;;  %v4238_v58 = vpop.xlane.xlu1 %4237  ;;  %v5923_v3 = vpop.eup %5922  ;;  %v4696_v37 = vadd.f32 %v4695_v38, %v4694_v16  ;;  %v4325_v29 = vsub.f32 %v3683_v57, %v4253_v47 }
 0x5ea   : > { %v4320_v31 = vsub.f32 %v3678_v28, %v4238_v58  ;;  %v3617_v12 = vmul.f32 0.6931472, %v5923_v3  ;;  %v4459_v28 = vadd.s32 %v7996_v43, %v4394_v59  ;;  %v4265_v58 = vpop.xlane.xlu0 %4264 }
 0x5eb   : > { %v3681_v39 = vadd.f32 %v3611_v25, %v8996_v8  ;;  %v4584_v23 = vsel %vm4520_vm5, %v4325_v29, 0.0 }
 0x5ec   : > { %v4579_v44 = vsel %vm4515_vm0, %v4320_v31, 0.0  ;;  %v5925_v20 = vpop.eup %5924  ;;  %v3684_v36 = vadd.f32 %v3617_v12, %v8998_v55  ;;  %v4707_v38 = vsel %vm4589_vm8, %v4584_v23, 0.0  ;;  %vm4523_vm9 = vcmp.lt.s32.totalorder %v4459_v28, 1000 }
 0x5ed   : > { %v4323_v27 = vsub.f32 %v3681_v39, %v4247_v48  ;;  %v4697_v33 = vsel %vm4589_vm8, %v4579_v44, 0.0  ;;  %v4244_v61 = vpop.xlane.xlu1 %4243  ;;  %v5927_v41 = vpop.eup %5926  ;;  %v3623_v14 = vmul.f32 0.6931472, %v5925_v20  ;;  %v4460_v48 = vadd.s32 %v7996_v43, %v4395_v54 }
 0x5ee   : > { %v4698_v4 = vadd.f32 %v4697_v33, %v4696_v37  ;;  %v4322_v17 = vsub.f32 %v3680_v49, %v4244_v61  ;;  %v3621_v52 = vmul.f32 0.6931472, %v5927_v41 }
 0x5ef   : > { %v4582_v50 = vsel %vm4518_vm3, %v4323_v27, 0.0  ;;  %v3687_v13 = vadd.f32 %v3623_v14, %v8999_v24  ;;  %vm4524_vm10 = vcmp.lt.s32.totalorder %v4460_v48, 1000 }
 0x5f0   : > { %v5929_v18 = vpop.eup %5928  ;;  %v4581_v34 = vsel %vm4517_vm2, %v4322_v17, 0.0  ;;  %v4700_v2 = vadd.f32 %v4699_v9, %v4698_v4  ;;  %v4703_v42 = vsel %vm4589_vm8, %v4582_v50, 0.0  ;;  %v3686_v49 = vadd.f32 %v3621_v52, %v9000_v30 }
 0x5f1   : > { %v3619_v16 = vmul.f32 0.6931472, %v5929_v18  ;;  %v4701_v60 = vsel %vm4589_vm8, %v4581_v34, 0.0  ;;  %v4250_v10 = vpop.xlane.xlu1 %4249  ;;  %v4329_v31 = vsub.f32 %v3687_v13, %v4265_v58 }
 0x5f2   : > { %v4702_v21 = vadd.f32 %v4701_v60, %v4700_v2  ;;  %v4324_v6 = vsub.f32 %v3682_v51, %v4250_v10 }
 0x5f3   : > { %v3685_v15 = vadd.f32 %v3619_v16, %v8997_v26  ;;  %v4588_v53 = vsel %vm4524_vm10, %v4329_v31, 0.0 }
 0x5f4   : > { %v4583_v11 = vsel %vm4519_vm4, %v4324_v6, 0.0  ;;  %v4704_v22 = vadd.f32 %v4703_v42, %v4702_v21  ;;  %v4715_v37 = vsel %vm4589_vm8, %v4588_v53, 0.0 }
 0x5f5   : > { %v4327_v1 = vsub.f32 %v3685_v15, %v4259_v46  ;;  %v4705_v45 = vsel %vm4589_vm8, %v4583_v11, 0.0  ;;  %v4256_v0 = vpop.xlane.xlu1 %4255 }
 0x5f6   : > { %v4706_v56 = vadd.f32 %v4705_v45, %v4704_v22  ;;  %v4326_v25 = vsub.f32 %v3684_v36, %v4256_v0 }
 0x5f7   : > { %v4586_v51 = vsel %vm4522_vm7, %v4327_v1, 0.0 }
 0x5f8   : > { %v4585_v35 = vsel %vm4521_vm6, %v4326_v25, 0.0  ;;  %v4708_v5 = vadd.f32 %v4707_v38, %v4706_v56  ;;  %v4711_v57 = vsel %vm4589_vm8, %v4586_v51, 0.0 }
 0x5f9   : > { %v4709_v3 = vsel %vm4589_vm8, %v4585_v35, 0.0  ;;  %v4262_v47 = vpop.xlane.xlu1 %4261 }
 0x5fa   : > { %v4710_v32 = vadd.f32 %v4709_v3, %v4708_v5  ;;  %v4328_v43 = vsub.f32 %v3686_v49, %v4262_v47 }
 0x5fc   : > { %v4587_v8 = vsel %vm4523_vm9, %v4328_v43, 0.0  ;;  %v4712_v39 = vadd.f32 %v4711_v57, %v4710_v32 }
 0x5fd   : > { %v4713_v40 = vsel %vm4589_vm8, %v4587_v8, 0.0 }
 0x5fe   : > { %v4714_v44 = vadd.f32 %v4713_v40, %v4712_v39 }
 0x600   : > { %v4716_v7 = vadd.f32 %v4715_v37, %v4714_v44 }
 0x602   : > { %4717 = vadd.xlane.f32.xlu1 %v4716_v7 }
 0x68f   : > { %v4718_v20 = vpop.xlane.xlu1 %4717 }
 0x690   : > { %v4719_v27 = vrot.slane %v4718_v20, 4 }
 0x692   : > { %v4720_v33 = vadd.f32 %v4719_v27, %v4718_v20 }
 0x694   : > { %v4721_v61 = vrot.slane %v4720_v33, 2 }
 0x696   : > { %v4722_v19 = vadd.f32 %v4721_v61, %v4720_v33 }
 0x698   : > { %v4723_v54 = vrot.slane %v4722_v19, 1 }
 0x69a   : > { %v4724_v12 = vadd.f32 %v4723_v54, %v4722_v19 }
 0x69c   : > { %5430 = vpush %v4724_v12 }
 0x6cd   : > { %s5431_s19 = spop %5430 }
 0x6ce   : > { %v4726_v4 = vstv %s5431_s19 }
 0x6cf   : > { %4727 = vst [vmem:[%s375_s28] sm:$0x1] %v4726_v4 }
 0x6d0   : > { %5943 = shalt.err (!%p5940_p7)
}
 0x6d1   : > { %s5944_s24 = scalar_lea.hbm %s8517_s21, 16  ;;  %s5948_s20 = scalar_lea.hbm %s8577_s9, 64 }
 0x6d2   : > { %p5945_p9 = scmp.ne.s32.totalorder %s8517_s21, %s5944_s24  ;;  %p5949_p12 = scmp.lt.u32.totalorder %s8517_s21, %s8577_s9 }
 0x6d3   : > { %p5950_p13 = scmp.lt.u32.totalorder %s5948_s20, %s5944_s24  ;;  %p5952_p1 = scmp.lt.u32.totalorder %s5944_s24, %s8517_s21 }
 0x6d4   : > { %p5946_p10 = pnand %p5945_p9, %p6129_p3 }
 0x6d5   : > { %p5951_p0 = por %p5950_p13, %p5949_p12 }
 0x6d6   : > { %p5947_p11 = pneg %p5946_p10 }
 0x6d7   : > { %p5953_p2 = por %p5952_p1, %p5951_p0 }
 0x6d9   : > { %p5954_p4 = pnand %p5953_p2, %p5947_p11 }
 0x6db   : > { %5957 = shalt.err (!%p5954_p4)
}
 0x6dc   : > { %5432 = dma.vmem_to_hbm [thread:$0]  (%p6129_p3), %s8512_s29, 16, %s8517_s21, %s4729_s0  }
 0x6dd PF: > { %p5438_p5 = scmp.ge.s32.totalorder %s6024_s16, 2  ;;  %s4755_s1 = sand.u32 1, %s5996_s30  }
 0x6de   : > { %s4756_s18 = scalar_lea.sflag [#allocation3], %s4755_s1 }
 0x6df   : > { %p5435_p6 = pnand %p5438_p5, %p6138_p8 }
 0x6e1   : > { %5991 = dma.done.wait (!%p5435_p6), %s4756_s18, 16  }
 0x6e2   : > { %5993 = vsyncadd (!%p5435_p6), %s4756_s18, 4294967280  ;;  %s22_s16 = sadd.s32 1, %s6024_s16   ;;  %s9001_s0 = sld [smem:[#allocation5_spill]] }
 0x6e3   : > { %p19_p7 = scmp.ge.s32.totalorder %s22_s16, 6   ;;  %s9002_s22 = sld [smem:[#allocation6_spill]] }
 0x6e4   : > { %s9003_s30 = smov %s6000_s10  ;;  %s9004_s10 = smov %s6004_s11 }
 0x6e5   : > { %s9005_s11 = smov %s6147_s27  ;;  %s9006_s12 = smov %s6016_s14 }
 0x6e6   : > { %s9007_s13 = smov %s6020_s15  ;;  %21 = sbr.rel (!%p19_p7) target bundleno = 8 (0x8), region = 94 }
 0x6e8   : > { %s9008_s14 = smov %s9001_s0 }
 0x6e9   : > { %s9009_s15 = smov %s9002_s22 }
 0x6ed   :  { %4760 = vsyncpa [#allocation3], 1 }
 0x6ee   :  { %4762 = vsyncpa [#allocation3 + $0x1], 1 }

</bundles_post_ra>
